<compile_context>
chip_gen: v6e
topology: v6e:2x2x1
jax: 0.10.0
libtpu: 0.0.40
codegen_flags: <defaults>
</compile_context>

<pallas_src>
import jax
import jax.numpy as jnp
import numpy as np
from jax.experimental import pallas as pl
from jax.experimental.pallas import tpu as pltpu

EMBED_DIM = 32
NUM_HEADS = 4
HEAD_DIM = EMBED_DIM // NUM_HEADS          # 8
SEQ_LEN = 196                              # classifier in-features = E*196 => S = 196
NUM_CLASSES = 3
BATCH = 2
M_TOKENS = BATCH * SEQ_LEN                 # 392
WIDE = NUM_HEADS * NUM_HEADS * HEAD_DIM    # 128 lanes for the expanded products
NSCORE = NUM_HEADS * NUM_HEADS             # 16 lane-dense scores per token
SCALE = 1.0 / float(HEAD_DIM) ** 0.5


def fused_kernel(x_ref, wq_ref, wk_ref, wv_ref, bq_ref, bk_ref, bv_ref,
                 wout_ref, bout_ref,
                 eq_ref, ek_ref, fs_ref, gs_ref, ep_ref, fv_ref,
                 et_ref, wbc_ref, fold_ref, bcls_ref, o_ref):
    f32, bf16 = jnp.float32, jnp.bfloat16
    x = x_ref[...].astype(bf16)                                              # (M, E)

    # Q/K/V projections (weights pre-split on host so head h sits in lanes [h*hd,(h+1)*hd))
    q = jnp.dot(x, wq_ref[...], preferred_element_type=f32) + bq_ref[...]    # (M, E)
    k = jnp.dot(x, wk_ref[...], preferred_element_type=f32) + bk_ref[...]
    v = jnp.dot(x, wv_ref[...], preferred_element_type=f32) + bv_ref[...]

    # lane-dense scores: s16[t, h*H+g] = <q_h[t], k_g[t]> * SCALE
    qe = jnp.dot(q.astype(bf16), eq_ref[...], preferred_element_type=f32)    # (M, 128)
    ke = jnp.dot(k.astype(bf16), ek_ref[...], preferred_element_type=f32)    # (M, 128)
    s16 = jnp.dot((qe * ke).astype(bf16), fs_ref[...],
                  preferred_element_type=f32) * SCALE                        # (M, 16)

    # grouped softmax over g (4 lanes per head group); one per-row max is valid
    m_row = jnp.max(s16, axis=-1, keepdims=True)                             # (M, 1)
    e16 = jnp.exp(s16 - m_row)                                               # (M, 16)
    denom = jnp.dot(e16.astype(bf16), gs_ref[...],
                    preferred_element_type=f32)                              # per-group sums
    p16 = e16 * pl.reciprocal(denom, approx=True)                            # (M, 16)

    # attn[t, h*hd+d] = sum_g p16[t, h*H+g] * v[t, g*hd+d]
    pe = jnp.dot(p16.astype(bf16), ep_ref[...], preferred_element_type=f32)  # (M, 128)
    ve = jnp.dot(v.astype(bf16), ek_ref[...], preferred_element_type=f32)    # (M, 128)
    attn = jnp.dot((pe * ve).astype(bf16), fv_ref[...],
                   preferred_element_type=f32)                               # (M, E)

    # out_proj
    y = jnp.dot(attn.astype(bf16), wout_ref[...],
                preferred_element_type=f32) + bout_ref[...]                  # (M, E)

    # fused classifier: logits[b*C+c] = sum_{s,e} y[b*S+s, e] * wcls[s*E+e, c] + bcls[c]
    y6 = jnp.dot(y.astype(bf16), et_ref[...], preferred_element_type=f32)    # (M, B*C*E)
    z = (y6 * wbc_ref[...]).astype(bf16)                                     # batch-block-diag mask
    ones_row = jnp.ones((1, z.shape[0]), dtype=bf16)
    colsum = jnp.dot(ones_row, z, preferred_element_type=f32)                # (1, B*C*E)
    logits = jnp.dot(colsum.astype(bf16), fold_ref[...],
                     preferred_element_type=f32) + bcls_ref[...]             # (1, B*C)
    o_ref[...] = logits.astype(o_ref.dtype)


def prepare_params(params):
    """Host-side weight layout prep (done once): qkv split, bf16 casts, constant 0/1 matrices."""
    H, hd, E, C, B, S = NUM_HEADS, HEAD_DIM, EMBED_DIM, NUM_CLASSES, BATCH, SEQ_LEN
    bf16 = jnp.bfloat16
    c_bf16 = lambda a: jnp.asarray(np.asarray(a, np.float32), dtype=bf16)

    # torch column layout per head h: [q_h | k_h | v_h] = cols [h*3hd, (h+1)*3hd)
    base = np.arange(H)[:, None] * 3 * hd
    d = np.arange(hd)[None, :]
    q_cols = (base + d).reshape(-1)
    k_cols = (base + hd + d).reshape(-1)
    v_cols = (base + 2 * hd + d).reshape(-1)

    wqkv, bqkv = params["wqkv"], params["bqkv"]
    prep = {
        "wq": wqkv[:, q_cols].astype(bf16), "bq": bqkv[:, q_cols],
        "wk": wqkv[:, k_cols].astype(bf16), "bk": bqkv[:, k_cols],
        "wv": wqkv[:, v_cols].astype(bf16), "bv": bqkv[:, v_cols],
        "wout": params["wout"].astype(bf16), "bout": params["bout"],
    }

    # expansion / fold matrices for lane-dense score & PV contractions
    j = np.arange(H * H * hd)                       # 0..127
    hj, gj, dj = j // (H * hd), (j // hd) % H, j % hd
    pj = j // hd                                    # h*H + g
    eye_e = np.arange(E)
    prep["EQ"] = c_bf16(eye_e[:, None] == (hj * hd + dj)[None, :])           # (E, 128)
    prep["EK"] = c_bf16(eye_e[:, None] == (gj * hd + dj)[None, :])           # (E, 128)
    prep["FS"] = c_bf16(pj[:, None] == np.arange(H * H)[None, :])            # (128, 16)
    prep["GS"] = c_bf16(np.arange(H * H)[:, None] // H
                        == np.arange(H * H)[None, :] // H)                   # (16, 16)
    prep["EP"] = c_bf16(np.arange(H * H)[:, None] == pj[None, :])            # (16, 128)
    prep["FV"] = c_bf16((hj * hd + dj)[:, None] == eye_e[None, :])           # (128, E)

    # classifier folded into the kernel: batch-block-diagonal weight layout
    wcls = np.asarray(params["wcls"], np.float32)                            # (S*E, C)
    w3 = wcls.reshape(S, E, C).transpose(0, 2, 1).reshape(S, C * E)          # [s, c*E+e]
    wbc = np.zeros((B * S, B * C * E), np.float32)
    for b in range(B):
        wbc[b * S:(b + 1) * S, b * C * E:(b + 1) * C * E] = w3
    prep["ET"] = c_bf16(np.tile(np.eye(E), (1, B * C)))                      # (E, B*C*E)
    prep["WBC"] = jnp.asarray(wbc)                                           # (M, B*C*E) f32
    prep["FOLD"] = c_bf16(np.kron(np.eye(B * C), np.ones((E, 1))))           # (B*C*E, B*C)
    prep["bcls"] = jnp.tile(params["bcls"], (1, B))                          # (1, B*C)
    return prep


def mhsa_forward(x, prep):
    B = x.shape[0]
    E, C = EMBED_DIM, NUM_CLASSES
    S = x.shape[1] // E
    M = B * S
    tokens = x.reshape(M, E)
    rep = lambda shape: pl.BlockSpec(shape, lambda i: (0, 0))

    out6 = pl.pallas_call(
        fused_kernel,
        out_shape=jax.ShapeDtypeStruct((1, B * C), jnp.float32),
        grid_spec=pltpu.PrefetchScalarGridSpec(
            num_scalar_prefetch=0,
            grid=(1,),
            in_specs=[
                rep((M, E)),                                   # tokens
                rep((E, E)), rep((E, E)), rep((E, E)),         # wq, wk, wv
                rep((1, E)), rep((1, E)), rep((1, E)),         # bq, bk, bv
                rep((E, E)), rep((1, E)),                      # wout, bout
                rep((E, WIDE)), rep((E, WIDE)),                # EQ, EK
                rep((WIDE, NSCORE)), rep((NSCORE, NSCORE)),    # FS, GS
                rep((NSCORE, WIDE)), rep((WIDE, E)),           # EP, FV
                rep((E, B * C * E)), rep((M, B * C * E)),      # ET, WBC
                rep((B * C * E, B * C)), rep((1, B * C)),      # FOLD, bcls
            ],
            out_specs=rep((1, B * C)),
        ),
        compiler_params=pltpu.CompilerParams(dimension_semantics=("arbitrary",)),
    )(tokens, prep["wq"], prep["wk"], prep["wv"], prep["bq"], prep["bk"], prep["bv"],
      prep["wout"], prep["bout"], prep["EQ"], prep["EK"], prep["FS"], prep["GS"],
      prep["EP"], prep["FV"], prep["ET"], prep["WBC"], prep["FOLD"], prep["bcls"])
    return out6.reshape(B, C)


def mhsa_reference(x, params):
    """Pure-JAX reference mirroring the PyTorch forward exactly."""
    B = x.shape[0]
    E, H, hd = EMBED_DIM, NUM_HEADS, HEAD_DIM
    S = x.shape[1] // E
    xs = x.reshape(B, S, E)
    qkv = xs @ params["wqkv"] + params["bqkv"][0]
    qkv = qkv.reshape(B, S, H, 3 * hd)
    q, k, v = qkv[..., :hd], qkv[..., hd:2 * hd], qkv[..., 2 * hd:]
    scores = jnp.einsum("bshd,bsgd->bshg", q, k) / (hd ** 0.5)
    w = jax.nn.softmax(scores, axis=-1)
    out = jnp.einsum("bshg,bsgd->bshd", w, v).reshape(B, S, E)
    out = out @ params["wout"] + params["bout"][0]
    return out.reshape(B, S * E) @ params["wcls"] + params["bcls"][0]


if __name__ == "__main__":
    key = jax.random.PRNGKey(0)
    k_x, k1, k2, k3, k4, k5, k6 = jax.random.split(key, 7)

    # input consistent with forward(): 2-D (B, S*E), S = 196
    x = jax.random.uniform(k_x, (BATCH, SEQ_LEN * EMBED_DIM), dtype=jnp.float32)

    # deterministic synthetic parameters (Linear weights pre-transposed to (in, out))
    params = {
        "wqkv": jax.random.normal(k1, (EMBED_DIM, 3 * EMBED_DIM), jnp.float32) * 0.05,
        "bqkv": jax.random.normal(k2, (1, 3 * EMBED_DIM), jnp.float32) * 0.01,
        "wout": jax.random.normal(k3, (EMBED_DIM, EMBED_DIM), jnp.float32) * 0.05,
        "bout": jax.random.normal(k4, (1, EMBED_DIM), jnp.float32) * 0.01,
        "wcls": jax.random.normal(k5, (SEQ_LEN * EMBED_DIM, NUM_CLASSES), jnp.float32) * 0.02,
        "bcls": jax.random.normal(k6, (1, NUM_CLASSES), jnp.float32) * 0.01,
    }

    prep = prepare_params(params)
    out = jax.block_until_ready(mhsa_forward(x, prep))
    ref = jax.block_until_ready(mhsa_reference(x, params))
    assert out.shape == (BATCH, NUM_CLASSES)
    np.testing.assert_allclose(np.asarray(out), np.asarray(ref), rtol=5e-2, atol=5e-2)
    print("KERNEL_OK")
</pallas_src>

<mosaic_0001>
module attributes {stable_mosaic.version = 11 : i64} {
  func.func @fused_kernel(%arg0: i32, %arg1: memref<392x32xf32, #tpu.memory_space<vmem>>, %arg2: memref<32x32xbf16, #tpu.memory_space<vmem>>, %arg3: memref<32x32xbf16, #tpu.memory_space<vmem>>, %arg4: memref<32x32xbf16, #tpu.memory_space<vmem>>, %arg5: memref<1x32xf32, #tpu.memory_space<vmem>>, %arg6: memref<1x32xf32, #tpu.memory_space<vmem>>, %arg7: memref<1x32xf32, #tpu.memory_space<vmem>>, %arg8: memref<32x32xbf16, #tpu.memory_space<vmem>>, %arg9: memref<1x32xf32, #tpu.memory_space<vmem>>, %arg10: memref<32x128xbf16, #tpu.memory_space<vmem>>, %arg11: memref<32x128xbf16, #tpu.memory_space<vmem>>, %arg12: memref<128x16xbf16, #tpu.memory_space<vmem>>, %arg13: memref<16x16xbf16, #tpu.memory_space<vmem>>, %arg14: memref<16x128xbf16, #tpu.memory_space<vmem>>, %arg15: memref<128x32xbf16, #tpu.memory_space<vmem>>, %arg16: memref<32x192xbf16, #tpu.memory_space<vmem>>, %arg17: memref<392x192xf32, #tpu.memory_space<vmem>>, %arg18: memref<192x6xbf16, #tpu.memory_space<vmem>>, %arg19: memref<1x6xf32, #tpu.memory_space<vmem>>, %arg20: memref<1x6xf32, #tpu.memory_space<vmem>>) attributes {dimension_semantics = [#tpu.dimension_semantics<arbitrary>], iteration_bounds = array<i64: 1>, scalar_prefetch = 0 : i64, scratch_operands = 0 : i64, tpu.core_type = #tpu.core_type<tc>, window_params = [{pipeline_mode = #tpu.pipeline_mode<synchronous>, transform_indices = @transform_0, window_bounds = array<i64: 392, 32>}, {pipeline_mode = #tpu.pipeline_mode<synchronous>, transform_indices = @transform_1, window_bounds = array<i64: 32, 32>}, {pipeline_mode = #tpu.pipeline_mode<synchronous>, transform_indices = @transform_2, window_bounds = array<i64: 32, 32>}, {pipeline_mode = #tpu.pipeline_mode<synchronous>, transform_indices = @transform_3, window_bounds = array<i64: 32, 32>}, {pipeline_mode = #tpu.pipeline_mode<synchronous>, transform_indices = @transform_4, window_bounds = array<i64: 1, 32>}, {pipeline_mode = #tpu.pipeline_mode<synchronous>, transform_indices = @transform_5, window_bounds = array<i64: 1, 32>}, {pipeline_mode = #tpu.pipeline_mode<synchronous>, transform_indices = @transform_6, window_bounds = array<i64: 1, 32>}, {pipeline_mode = #tpu.pipeline_mode<synchronous>, transform_indices = @transform_7, window_bounds = array<i64: 32, 32>}, {pipeline_mode = #tpu.pipeline_mode<synchronous>, transform_indices = @transform_8, window_bounds = array<i64: 1, 32>}, {pipeline_mode = #tpu.pipeline_mode<synchronous>, transform_indices = @transform_9, window_bounds = array<i64: 32, 128>}, {pipeline_mode = #tpu.pipeline_mode<synchronous>, transform_indices = @transform_10, window_bounds = array<i64: 32, 128>}, {pipeline_mode = #tpu.pipeline_mode<synchronous>, transform_indices = @transform_11, window_bounds = array<i64: 128, 16>}, {pipeline_mode = #tpu.pipeline_mode<synchronous>, transform_indices = @transform_12, window_bounds = array<i64: 16, 16>}, {pipeline_mode = #tpu.pipeline_mode<synchronous>, transform_indices = @transform_13, window_bounds = array<i64: 16, 128>}, {pipeline_mode = #tpu.pipeline_mode<synchronous>, transform_indices = @transform_14, window_bounds = array<i64: 128, 32>}, {pipeline_mode = #tpu.pipeline_mode<synchronous>, transform_indices = @transform_15, window_bounds = array<i64: 32, 192>}, {pipeline_mode = #tpu.pipeline_mode<synchronous>, transform_indices = @transform_16, window_bounds = array<i64: 392, 192>}, {pipeline_mode = #tpu.pipeline_mode<synchronous>, transform_indices = @transform_17, window_bounds = array<i64: 192, 6>}, {pipeline_mode = #tpu.pipeline_mode<synchronous>, transform_indices = @transform_18, window_bounds = array<i64: 1, 6>}, {pipeline_mode = #tpu.pipeline_mode<synchronous>, transform_indices = @transform_19, window_bounds = array<i64: 1, 6>}]} {
    %c0 = arith.constant 0 : index
    %c0_0 = arith.constant 0 : index
    %0 = vector.load %arg1[%c0, %c0_0] : memref<392x32xf32, #tpu.memory_space<vmem>>, vector<392x32xf32>
    %1 = arith.truncf %0 : vector<392x32xf32> to vector<392x32xbf16>
    %c0_1 = arith.constant 0 : index
    %c0_2 = arith.constant 0 : index
    %2 = vector.load %arg2[%c0_1, %c0_2] : memref<32x32xbf16, #tpu.memory_space<vmem>>, vector<32x32xbf16>
    %cst = arith.constant dense<0.000000e+00> : vector<392x32xf32>
    %3 = tpu.matmul %1, %2, %cst {dimension_numbers = #tpu.dot_dimension_numbers<[1], [0], [0], [1], [0, 0, 1, 1], [], []>} : vector<392x32xbf16>, vector<32x32xbf16>, vector<392x32xf32> -> vector<392x32xf32>
    %c0_3 = arith.constant 0 : index
    %c0_4 = arith.constant 0 : index
    %4 = vector.load %arg5[%c0_3, %c0_4] : memref<1x32xf32, #tpu.memory_space<vmem>>, vector<1x32xf32>
    %5 = vector.broadcast %4 : vector<1x32xf32> to vector<392x32xf32>
    %6 = arith.addf %3, %5 : vector<392x32xf32>
    %c0_5 = arith.constant 0 : index
    %c0_6 = arith.constant 0 : index
    %7 = vector.load %arg3[%c0_5, %c0_6] : memref<32x32xbf16, #tpu.memory_space<vmem>>, vector<32x32xbf16>
    %cst_7 = arith.constant dense<0.000000e+00> : vector<392x32xf32>
    %8 = tpu.matmul %1, %7, %cst_7 {dimension_numbers = #tpu.dot_dimension_numbers<[1], [0], [0], [1], [0, 0, 1, 1], [], []>} : vector<392x32xbf16>, vector<32x32xbf16>, vector<392x32xf32> -> vector<392x32xf32>
    %c0_8 = arith.constant 0 : index
    %c0_9 = arith.constant 0 : index
    %9 = vector.load %arg6[%c0_8, %c0_9] : memref<1x32xf32, #tpu.memory_space<vmem>>, vector<1x32xf32>
    %10 = vector.broadcast %9 : vector<1x32xf32> to vector<392x32xf32>
    %11 = arith.addf %8, %10 : vector<392x32xf32>
    %c0_10 = arith.constant 0 : index
    %c0_11 = arith.constant 0 : index
    %12 = vector.load %arg4[%c0_10, %c0_11] : memref<32x32xbf16, #tpu.memory_space<vmem>>, vector<32x32xbf16>
    %cst_12 = arith.constant dense<0.000000e+00> : vector<392x32xf32>
    %13 = tpu.matmul %1, %12, %cst_12 {dimension_numbers = #tpu.dot_dimension_numbers<[1], [0], [0], [1], [0, 0, 1, 1], [], []>} : vector<392x32xbf16>, vector<32x32xbf16>, vector<392x32xf32> -> vector<392x32xf32>
    %c0_13 = arith.constant 0 : index
    %c0_14 = arith.constant 0 : index
    %14 = vector.load %arg7[%c0_13, %c0_14] : memref<1x32xf32, #tpu.memory_space<vmem>>, vector<1x32xf32>
    %15 = vector.broadcast %14 : vector<1x32xf32> to vector<392x32xf32>
    %16 = arith.addf %13, %15 : vector<392x32xf32>
    %17 = arith.truncf %6 : vector<392x32xf32> to vector<392x32xbf16>
    %c0_15 = arith.constant 0 : index
    %c0_16 = arith.constant 0 : index
    %18 = vector.load %arg10[%c0_15, %c0_16] : memref<32x128xbf16, #tpu.memory_space<vmem>>, vector<32x128xbf16>
    %cst_17 = arith.constant dense<0.000000e+00> : vector<392x128xf32>
    %19 = tpu.matmul %17, %18, %cst_17 {dimension_numbers = #tpu.dot_dimension_numbers<[1], [0], [0], [1], [0, 0, 1, 1], [], []>} : vector<392x32xbf16>, vector<32x128xbf16>, vector<392x128xf32> -> vector<392x128xf32>
    %20 = arith.truncf %11 : vector<392x32xf32> to vector<392x32xbf16>
    %c0_18 = arith.constant 0 : index
    %c0_19 = arith.constant 0 : index
    %21 = vector.load %arg11[%c0_18, %c0_19] : memref<32x128xbf16, #tpu.memory_space<vmem>>, vector<32x128xbf16>
    %cst_20 = arith.constant dense<0.000000e+00> : vector<392x128xf32>
    %22 = tpu.matmul %20, %21, %cst_20 {dimension_numbers = #tpu.dot_dimension_numbers<[1], [0], [0], [1], [0, 0, 1, 1], [], []>} : vector<392x32xbf16>, vector<32x128xbf16>, vector<392x128xf32> -> vector<392x128xf32>
    %23 = arith.mulf %19, %22 : vector<392x128xf32>
    %24 = arith.truncf %23 : vector<392x128xf32> to vector<392x128xbf16>
    %c0_21 = arith.constant 0 : index
    %c0_22 = arith.constant 0 : index
    %25 = vector.load %arg12[%c0_21, %c0_22] : memref<128x16xbf16, #tpu.memory_space<vmem>>, vector<128x16xbf16>
    %cst_23 = arith.constant dense<0.000000e+00> : vector<392x16xf32>
    %26 = tpu.matmul %24, %25, %cst_23 {dimension_numbers = #tpu.dot_dimension_numbers<[1], [0], [0], [1], [0, 0, 1, 1], [], []>} : vector<392x128xbf16>, vector<128x16xbf16>, vector<392x16xf32> -> vector<392x16xf32>
    %cst_24 = arith.constant 0.353553385 : f32
    %27 = vector.broadcast %cst_24 : f32 to vector<392x16xf32>
    %28 = arith.mulf %26, %27 : vector<392x16xf32>
    %cst_25 = arith.constant dense<0xFF800000> : vector<392xf32>
    %29 = vector.multi_reduction <maximumf>, %28, %cst_25 [1] : vector<392x16xf32> to vector<392xf32>
    %30 = vector.shape_cast %29 : vector<392xf32> to vector<392x1xf32>
    %31 = vector.broadcast %30 : vector<392x1xf32> to vector<392x16xf32>
    %32 = arith.subf %28, %31 : vector<392x16xf32>
    %33 = math.exp %32 : vector<392x16xf32>
    %34 = arith.truncf %33 : vector<392x16xf32> to vector<392x16xbf16>
    %c0_26 = arith.constant 0 : index
    %c0_27 = arith.constant 0 : index
    %35 = vector.load %arg13[%c0_26, %c0_27] : memref<16x16xbf16, #tpu.memory_space<vmem>>, vector<16x16xbf16>
    %cst_28 = arith.constant dense<0.000000e+00> : vector<392x16xf32>
    %36 = tpu.matmul %34, %35, %cst_28 {dimension_numbers = #tpu.dot_dimension_numbers<[1], [0], [0], [1], [0, 0, 1, 1], [], []>} : vector<392x16xbf16>, vector<16x16xbf16>, vector<392x16xf32> -> vector<392x16xf32>
    %37 = tpu.reciprocal %36 {approx = true} : vector<392x16xf32> -> vector<392x16xf32>
    %38 = arith.mulf %33, %37 : vector<392x16xf32>
    %39 = arith.truncf %38 : vector<392x16xf32> to vector<392x16xbf16>
    %c0_29 = arith.constant 0 : index
    %c0_30 = arith.constant 0 : index
    %40 = vector.load %arg14[%c0_29, %c0_30] : memref<16x128xbf16, #tpu.memory_space<vmem>>, vector<16x128xbf16>
    %cst_31 = arith.constant dense<0.000000e+00> : vector<392x128xf32>
    %41 = tpu.matmul %39, %40, %cst_31 {dimension_numbers = #tpu.dot_dimension_numbers<[1], [0], [0], [1], [0, 0, 1, 1], [], []>} : vector<392x16xbf16>, vector<16x128xbf16>, vector<392x128xf32> -> vector<392x128xf32>
    %42 = arith.truncf %16 : vector<392x32xf32> to vector<392x32xbf16>
    %c0_32 = arith.constant 0 : index
    %c0_33 = arith.constant 0 : index
    %43 = vector.load %arg11[%c0_32, %c0_33] : memref<32x128xbf16, #tpu.memory_space<vmem>>, vector<32x128xbf16>
    %cst_34 = arith.constant dense<0.000000e+00> : vector<392x128xf32>
    %44 = tpu.matmul %42, %43, %cst_34 {dimension_numbers = #tpu.dot_dimension_numbers<[1], [0], [0], [1], [0, 0, 1, 1], [], []>} : vector<392x32xbf16>, vector<32x128xbf16>, vector<392x128xf32> -> vector<392x128xf32>
    %45 = arith.mulf %41, %44 : vector<392x128xf32>
    %46 = arith.truncf %45 : vector<392x128xf32> to vector<392x128xbf16>
    %c0_35 = arith.constant 0 : index
    %c0_36 = arith.constant 0 : index
    %47 = vector.load %arg15[%c0_35, %c0_36] : memref<128x32xbf16, #tpu.memory_space<vmem>>, vector<128x32xbf16>
    %cst_37 = arith.constant dense<0.000000e+00> : vector<392x32xf32>
    %48 = tpu.matmul %46, %47, %cst_37 {dimension_numbers = #tpu.dot_dimension_numbers<[1], [0], [0], [1], [0, 0, 1, 1], [], []>} : vector<392x128xbf16>, vector<128x32xbf16>, vector<392x32xf32> -> vector<392x32xf32>
    %49 = arith.truncf %48 : vector<392x32xf32> to vector<392x32xbf16>
    %c0_38 = arith.constant 0 : index
    %c0_39 = arith.constant 0 : index
    %50 = vector.load %arg8[%c0_38, %c0_39] : memref<32x32xbf16, #tpu.memory_space<vmem>>, vector<32x32xbf16>
    %cst_40 = arith.constant dense<0.000000e+00> : vector<392x32xf32>
    %51 = tpu.matmul %49, %50, %cst_40 {dimension_numbers = #tpu.dot_dimension_numbers<[1], [0], [0], [1], [0, 0, 1, 1], [], []>} : vector<392x32xbf16>, vector<32x32xbf16>, vector<392x32xf32> -> vector<392x32xf32>
    %c0_41 = arith.constant 0 : index
    %c0_42 = arith.constant 0 : index
    %52 = vector.load %arg9[%c0_41, %c0_42] : memref<1x32xf32, #tpu.memory_space<vmem>>, vector<1x32xf32>
    %53 = vector.broadcast %52 : vector<1x32xf32> to vector<392x32xf32>
    %54 = arith.addf %51, %53 : vector<392x32xf32>
    %55 = arith.truncf %54 : vector<392x32xf32> to vector<392x32xbf16>
    %c0_43 = arith.constant 0 : index
    %c0_44 = arith.constant 0 : index
    %56 = vector.load %arg16[%c0_43, %c0_44] : memref<32x192xbf16, #tpu.memory_space<vmem>>, vector<32x192xbf16>
    %cst_45 = arith.constant dense<0.000000e+00> : vector<392x192xf32>
    %57 = tpu.matmul %55, %56, %cst_45 {dimension_numbers = #tpu.dot_dimension_numbers<[1], [0], [0], [1], [0, 0, 1, 1], [], []>} : vector<392x32xbf16>, vector<32x192xbf16>, vector<392x192xf32> -> vector<392x192xf32>
    %c0_46 = arith.constant 0 : index
    %c0_47 = arith.constant 0 : index
    %58 = vector.load %arg17[%c0_46, %c0_47] : memref<392x192xf32, #tpu.memory_space<vmem>>, vector<392x192xf32>
    %59 = arith.mulf %57, %58 : vector<392x192xf32>
    %60 = arith.truncf %59 : vector<392x192xf32> to vector<392x192xbf16>
    %cst_48 = arith.constant 1.000000e+00 : bf16
    %61 = vector.broadcast %cst_48 : bf16 to vector<1x392xbf16>
    %cst_49 = arith.constant dense<0.000000e+00> : vector<1x192xf32>
    %62 = tpu.matmul %61, %60, %cst_49 {dimension_numbers = #tpu.dot_dimension_numbers<[1], [0], [0], [1], [0, 0, 1, 1], [], []>} : vector<1x392xbf16>, vector<392x192xbf16>, vector<1x192xf32> -> vector<1x192xf32>
    %63 = arith.truncf %62 : vector<1x192xf32> to vector<1x192xbf16>
    %c0_50 = arith.constant 0 : index
    %c0_51 = arith.constant 0 : index
    %64 = vector.load %arg18[%c0_50, %c0_51] : memref<192x6xbf16, #tpu.memory_space<vmem>>, vector<192x6xbf16>
    %cst_52 = arith.constant dense<0.000000e+00> : vector<1x6xf32>
    %65 = tpu.matmul %63, %64, %cst_52 {dimension_numbers = #tpu.dot_dimension_numbers<[1], [0], [0], [1], [0, 0, 1, 1], [], []>} : vector<1x192xbf16>, vector<192x6xbf16>, vector<1x6xf32> -> vector<1x6xf32>
    %c0_53 = arith.constant 0 : index
    %c0_54 = arith.constant 0 : index
    %66 = vector.load %arg19[%c0_53, %c0_54] : memref<1x6xf32, #tpu.memory_space<vmem>>, vector<1x6xf32>
    %67 = arith.addf %65, %66 : vector<1x6xf32>
    %c0_55 = arith.constant 0 : index
    %c0_56 = arith.constant 0 : index
    %68 = vector.load %arg20[%c0_55, %c0_56] : memref<1x6xf32, #tpu.memory_space<vmem>>, vector<1x6xf32>
    tpu.vector_store %arg20[%c0_55, %c0_56], %67 {strides = array<i32>} : memref<1x6xf32, #tpu.memory_space<vmem>>, vector<1x6xf32>,
    return
  }
  func.func @transform_0(%arg0: i32) -> (i32, i32) {
    %c0_i32 = arith.constant 0 : i32
    %c0_i32_0 = arith.constant 0 : i32
    %c0_i32_1 = arith.constant 0 : i32
    return %c0_i32, %c0_i32_0 : i32, i32
  }
  func.func @transform_1(%arg0: i32) -> (i32, i32) {
    %c0_i32 = arith.constant 0 : i32
    %c0_i32_0 = arith.constant 0 : i32
    %c0_i32_1 = arith.constant 0 : i32
    return %c0_i32, %c0_i32_0 : i32, i32
  }
  func.func @transform_2(%arg0: i32) -> (i32, i32) {
    %c0_i32 = arith.constant 0 : i32
    %c0_i32_0 = arith.constant 0 : i32
    %c0_i32_1 = arith.constant 0 : i32
    return %c0_i32, %c0_i32_0 : i32, i32
  }
  func.func @transform_3(%arg0: i32) -> (i32, i32) {
    %c0_i32 = arith.constant 0 : i32
    %c0_i32_0 = arith.constant 0 : i32
    %c0_i32_1 = arith.constant 0 : i32
    return %c0_i32, %c0_i32_0 : i32, i32
  }
  func.func @transform_4(%arg0: i32) -> (i32, i32) {
    %c0_i32 = arith.constant 0 : i32
    %c0_i32_0 = arith.constant 0 : i32
    %c0_i32_1 = arith.constant 0 : i32
    return %c0_i32, %c0_i32_0 : i32, i32
  }
  func.func @transform_5(%arg0: i32) -> (i32, i32) {
    %c0_i32 = arith.constant 0 : i32
    %c0_i32_0 = arith.constant 0 : i32
    %c0_i32_1 = arith.constant 0 : i32
    return %c0_i32, %c0_i32_0 : i32, i32
  }
  func.func @transform_6(%arg0: i32) -> (i32, i32) {
    %c0_i32 = arith.constant 0 : i32
    %c0_i32_0 = arith.constant 0 : i32
    %c0_i32_1 = arith.constant 0 : i32
    return %c0_i32, %c0_i32_0 : i32, i32
  }
  func.func @transform_7(%arg0: i32) -> (i32, i32) {
    %c0_i32 = arith.constant 0 : i32
    %c0_i32_0 = arith.constant 0 : i32
    %c0_i32_1 = arith.constant 0 : i32
    return %c0_i32, %c0_i32_0 : i32, i32
  }
  func.func @transform_8(%arg0: i32) -> (i32, i32) {
    %c0_i32 = arith.constant 0 : i32
    %c0_i32_0 = arith.constant 0 : i32
    %c0_i32_1 = arith.constant 0 : i32
    return %c0_i32, %c0_i32_0 : i32, i32
  }
  func.func @transform_9(%arg0: i32) -> (i32, i32) {
    %c0_i32 = arith.constant 0 : i32
    %c0_i32_0 = arith.constant 0 : i32
    %c0_i32_1 = arith.constant 0 : i32
    return %c0_i32, %c0_i32_0 : i32, i32
  }
  func.func @transform_10(%arg0: i32) -> (i32, i32) {
    %c0_i32 = arith.constant 0 : i32
    %c0_i32_0 = arith.constant 0 : i32
    %c0_i32_1 = arith.constant 0 : i32
    return %c0_i32, %c0_i32_0 : i32, i32
  }
  func.func @transform_11(%arg0: i32) -> (i32, i32) {
    %c0_i32 = arith.constant 0 : i32
    %c0_i32_0 = arith.constant 0 : i32
    %c0_i32_1 = arith.constant 0 : i32
    return %c0_i32, %c0_i32_0 : i32, i32
  }
  func.func @transform_12(%arg0: i32) -> (i32, i32) {
    %c0_i32 = arith.constant 0 : i32
    %c0_i32_0 = arith.constant 0 : i32
    %c0_i32_1 = arith.constant 0 : i32
    return %c0_i32, %c0_i32_0 : i32, i32
  }
  func.func @transform_13(%arg0: i32) -> (i32, i32) {
    %c0_i32 = arith.constant 0 : i32
    %c0_i32_0 = arith.constant 0 : i32
    %c0_i32_1 = arith.constant 0 : i32
    return %c0_i32, %c0_i32_0 : i32, i32
  }
  func.func @transform_14(%arg0: i32) -> (i32, i32) {
    %c0_i32 = arith.constant 0 : i32
    %c0_i32_0 = arith.constant 0 : i32
    %c0_i32_1 = arith.constant 0 : i32
    return %c0_i32, %c0_i32_0 : i32, i32
  }
  func.func @transform_15(%arg0: i32) -> (i32, i32) {
    %c0_i32 = arith.constant 0 : i32
    %c0_i32_0 = arith.constant 0 : i32
    %c0_i32_1 = arith.constant 0 : i32
    return %c0_i32, %c0_i32_0 : i32, i32
  }
  func.func @transform_16(%arg0: i32) -> (i32, i32) {
    %c0_i32 = arith.constant 0 : i32
    %c0_i32_0 = arith.constant 0 : i32
    %c0_i32_1 = arith.constant 0 : i32
    return %c0_i32, %c0_i32_0 : i32, i32
  }
  func.func @transform_17(%arg0: i32) -> (i32, i32) {
    %c0_i32 = arith.constant 0 : i32
    %c0_i32_0 = arith.constant 0 : i32
    %c0_i32_1 = arith.constant 0 : i32
    return %c0_i32, %c0_i32_0 : i32, i32
  }
  func.func @transform_18(%arg0: i32) -> (i32, i32) {
    %c0_i32 = arith.constant 0 : i32
    %c0_i32_0 = arith.constant 0 : i32
    %c0_i32_1 = arith.constant 0 : i32
    return %c0_i32, %c0_i32_0 : i32, i32
  }
  func.func @transform_19(%arg0: i32) -> (i32, i32) {
    %c0_i32 = arith.constant 0 : i32
    %c0_i32_0 = arith.constant 0 : i32
    %c0_i32_1 = arith.constant 0 : i32
    return %c0_i32, %c0_i32_0 : i32, i32
  }
}

</mosaic_0001>

<bundles_post_ra>
// kernel: tpu_custom_call.1
= control target key start
LH: loop header
LB: loop body
LE: loop exit
PB: predicated region body
PF: predicated region fallthrough
CT: control target
= control target key end

     0   :  { %s10424_s0 = inlined_call_operand.vmem [shape: f32[392,32], index: 0, kind: input, shape index: {}]   ;;  %s10425_s1 = inlined_call_operand.vmem [shape: bf16[32,32], index: 1, kind: input, shape index: {}]   ;;  %s10426_s2 = inlined_call_operand.vmem [shape: bf16[32,32], index: 2, kind: input, shape index: {}]   ;;  %s10427_s3 = inlined_call_operand.vmem [shape: bf16[32,32], index: 3, kind: input, shape index: {}]   ;;  %s10428_s4 = inlined_call_operand.vmem [shape: f32[1,32], index: 4, kind: input, shape index: {}]   ;;  %s10429_s5 = inlined_call_operand.vmem [shape: f32[1,32], index: 5, kind: input, shape index: {}]   ;;  %s10430_s6 = inlined_call_operand.vmem [shape: f32[1,32], index: 6, kind: input, shape index: {}]   ;;  %s10431_s7 = inlined_call_operand.vmem [shape: bf16[32,32], index: 7, kind: input, shape index: {}]   ;;  %s10432_s8 = inlined_call_operand.vmem [shape: f32[1,32], index: 8, kind: input, shape index: {}]   ;;  %s10433_s9 = inlined_call_operand.vmem [shape: bf16[32,128], index: 9, kind: input, shape index: {}]   ;;  %s10434_s10 = inlined_call_operand.vmem [shape: bf16[32,128], index: 10, kind: input, shape index: {}]   ;;  %s10435_s11 = inlined_call_operand.vmem [shape: bf16[128,16], index: 11, kind: input, shape index: {}]   ;;  %s10436_s12 = inlined_call_operand.vmem [shape: bf16[16,16], index: 12, kind: input, shape index: {}]   ;;  %s10437_s13 = inlined_call_operand.vmem [shape: bf16[16,128], index: 13, kind: input, shape index: {}]   ;;  %s10438_s14 = inlined_call_operand.vmem [shape: bf16[128,32], index: 14, kind: input, shape index: {}]   ;;  %s10439_s15 = inlined_call_operand.vmem [shape: bf16[32,192], index: 15, kind: input, shape index: {}]   ;;  %s10440_s16 = inlined_call_operand.vmem [shape: f32[392,192], index: 16, kind: input, shape index: {}]   ;;  %s10441_s17 = inlined_call_operand.vmem [shape: bf16[192,6], index: 17, kind: input, shape index: {}]   ;;  %s10442_s18 = inlined_call_operand.vmem [shape: f32[1,6], index: 18, kind: input, shape index: {}]   ;;  %s10443_s19 = inlined_call_operand.hbm [shape: f32[1,6], index: 19, kind: output, shape index: {}]  }
   0x1   :  { %10497 = sst [smem:[#allocation50_spill]] %s10424_s0 }
   0x2   :  { %10498 = sst [smem:[#allocation51_spill]] %s10425_s1 }
   0x3   :  { %10499 = sst [smem:[#allocation52_spill]] %s10426_s2 }
   0x4   :  { %10500 = sst [smem:[#allocation53_spill]] %s10427_s3 }
   0x5   :  { %s10501_s20 = sld [smem:[#allocation51_spill]]  ;;  %v10448_v1 = vmov 0.0   ;;  %vm7182_vm0 = vmmov 0   ;;  %vm162_vm1 = vcmask 261120  }
   0x6   :  { %5738 = vmatprep.subr.bf16.mxu0 %v10448_v1  ;;  %6902 = vmatprep.subr.bf16.mxu1 %v10448_v1  ;;  %s10502_s23 = sld [smem:[#allocation50_spill]] }
   0x7   :  { %5742 = vmatprep.mubr.msk.bf16.mxu0 %vm7182_vm0, %v10448_v1  ;;  %5830 = vmatprep.mubr.msk.bf16.mxu1 %vm7182_vm0, %v10448_v1  ;;  %s10503_s30 = sld [smem:[#allocation52_spill]] }
   0x8   :  { %s10504_s0 = sld [smem:[#allocation53_spill]] }
   0xb   :  { %v6911_v0 = vld [vmem:[%s10501_s20 + $0x8] sm:$0xff]   ;;  %v6912_v2 = vld [vmem:[%s10501_s20] sm:$0xff]  }
   0xc   :  { %5739 = vmatpush3.bf16.msra.mxu0 %v6911_v0  ;;  %6904 = vmatpush3.bf16.msra.mxu1 %v6911_v0  ;;  %v65_v3 = vld [vmem:[%s10502_s23] sm:$0xff]  ;;  %v66_v4 = vld [vmem:[%s10502_s23 + $0x8] sm:$0xff]  ;;  %v67_v10 = vld [vmem:[%s10502_s23 + $0x10] sm:$0xff] }
   0xd   :  { %v109_v5 = vld [vmem:[%s10502_s23 + $0x160] sm:$0xff]  ;;  %5740 = vmatprep.subr.bf16.mxu0 %v10448_v1  ;;  %6903 = vmatprep.subr.bf16.mxu1 %v10448_v1  ;;  %v110_v6 = vld [vmem:[%s10502_s23 + $0x168] sm:$0xff]  ;;  %v7312_v7 = vpack.c.bf16 %v66_v4, %v65_v3  ;;  %v68_v11 = vld [vmem:[%s10502_s23 + $0x18] sm:$0xff] }
   0xe   :  { %v7314_v8 = vpack.c.bf16 %v110_v6, %v109_v5  ;;  %v6913_v9 = vld [vmem:[%s10503_s30 + $0x8] sm:$0xff]   ;;  %v111_v12 = vld [vmem:[%s10502_s23 + $0x170] sm:$0xff]  ;;  %v112_v13 = vld [vmem:[%s10502_s23 + $0x178] sm:$0xff]  ;;  %v7345_v15 = vpack.c.bf16 %v68_v11, %v67_v10 }
   0xf   :  { %v6914_v14 = vld [vmem:[%s10503_s30] sm:$0xff]   ;;  %v7347_v16 = vpack.c.bf16 %v112_v13, %v111_v12  ;;  %v70_v18 = vld [vmem:[%s10502_s23 + $0x28] sm:$0xff]  ;;  %v71_v22 = vld [vmem:[%s10502_s23 + $0x30] sm:$0xff] }
  0x10   :  { %5741 = vmatpush3.bf16.msra.mxu0 %v6912_v2  ;;  %6905 = vmatpush3.bf16.msra.mxu1 %v6912_v2  ;;  %v69_v17 = vld [vmem:[%s10502_s23 + $0x20] sm:$0xff]  ;;  %v72_v23 = vld [vmem:[%s10502_s23 + $0x38] sm:$0xff]  ;;  %v74_v26 = vld [vmem:[%s10502_s23 + $0x48] sm:$0xff] }
  0x11   :  { %5842 = vmatprep.subr.bf16.mxu1 %v10448_v1  ;;  %5946 = vmatprep.subr.bf16.mxu0 %v10448_v1  ;;  %v113_v19 = vld [vmem:[%s10502_s23 + $0x180] sm:$0xff]  ;;  %v7367_v20 = vpack.c.bf16 %v70_v18, %v69_v17  ;;  %v7385_v24 = vpack.c.bf16 %v72_v23, %v71_v22  ;;  %v6915_v28 = vld [vmem:[%s10504_s0 + $0x8] sm:$0xff]   ;;  %v75_v29 = vld [vmem:[%s10502_s23 + $0x50] sm:$0xff] }
  0x12   :  { %v7369_v21 = vpack.c.bf16 %v113_v19, %v113_v19  ;;  %v73_v25 = vld [vmem:[%s10502_s23 + $0x40] sm:$0xff]  ;;  %v76_v30 = vld [vmem:[%s10502_s23 + $0x58] sm:$0xff] }
  0x13   :  { %5743 = vmatmul.mubr.msk.bf16.vlgmr.msra.gmra.mxu0 %vm162_vm1, %v7312_v7  ;;  %5831 = vmatmul.mubr.msk.bf16.vlgmr.msra.gmra.mxu1 %vm162_vm1, %v7314_v8  ;;  %v7401_v27 = vpack.c.bf16 %v74_v26, %v73_v25  ;;  %v7421_v31 = vpack.c.bf16 %v76_v30, %v75_v29 }
  0x14   :  { %5746 = vmatprep.mubr.msk.bf16.mxu0 %vm7182_vm0, %v10448_v1  ;;  %5834 = vmatprep.mubr.msk.bf16.mxu1 %vm7182_vm0, %v10448_v1 }
  0x15   :  { %5843 = vmatpush3.bf16.msra.mxu1 %v6913_v9  ;;  %5947 = vmatpush3.bf16.msra.mxu0 %v6915_v28 }
  0x16   :  { %5844 = vmatprep.subr.bf16.mxu1 %v10448_v1  ;;  %5948 = vmatprep.subr.bf16.mxu0 %v10448_v1 }
  0x19   :  { %5845 = vmatpush3.bf16.msra.mxu1 %v6914_v14 }
  0x1a   :  { %6050 = vmatprep.subr.bf16.mxu1 %v10448_v1 }
  0x1b   :  { %5747 = vmatmul.mubr.msk.bf16.gmra.mxu0 %vm162_vm1, %v7345_v15  ;;  %5835 = vmatmul.mubr.msk.bf16.gmra.mxu1 %vm162_vm1, %v7347_v16 }
  0x1c   :  { %5750 = vmatprep.mubr.msk.bf16.mxu0 %vm7182_vm0, %v10448_v1  ;;  %5838 = vmatprep.mubr.msk.bf16.mxu1 %vm7182_vm0, %v10448_v1 }
  0x23   :  { %5751 = vmatmul.mubr.msk.bf16.gmra.mxu0 %vm162_vm1, %v7367_v20  ;;  %5839 = vmatmul.mubr.msk.bf16.gmra.mxu1 %vm162_vm1, %v7369_v21 }
  0x24   :  { %5754 = vmatprep.mubr.msk.bf16.mxu0 %vm7182_vm0, %v10448_v1  ;;  %5846 = vmatprep.mubr.msk.bf16.mxu1 %vm7182_vm0, %v10448_v1 }
  0x2b   :  { %5755 = vmatmul.mubr.msk.bf16.gmra.mxu0 %vm162_vm1, %v7385_v24  ;;  %5847 = vmatmul.mubr.msk.bf16.vlgmr.msra.gmra.mxu1 %vm162_vm1, %v7312_v7 }
  0x2c   :  { %5758 = vmatprep.mubr.msk.bf16.mxu0 %vm7182_vm0, %v10448_v1  ;;  %5850 = vmatprep.mubr.msk.bf16.mxu1 %vm7182_vm0, %v10448_v1 }
  0x33   :  { %5759 = vmatmul.mubr.msk.bf16.gmra.mxu0 %vm162_vm1, %v7401_v27  ;;  %5851 = vmatmul.mubr.msk.bf16.gmra.mxu1 %vm162_vm1, %v7345_v15 }
  0x34   :  { %5762 = vmatprep.mubr.msk.bf16.mxu0 %vm7182_vm0, %v10448_v1  ;;  %5854 = vmatprep.mubr.msk.bf16.mxu1 %vm7182_vm0, %v10448_v1 }
  0x35   :  { %24 = vsyncpa [#allocation3], 0  ;;  %v6916_v32 = vld [vmem:[%s10504_s0] sm:$0xff]   ;;  %v78_v34 = vld [vmem:[%s10502_s23 + $0x68] sm:$0xff]  ;;  %vm2095_vm2 = vcmask 130048   ;;  %vm4876_vm3 = vcmask 64512  }
  0x36   :  { %v77_v33 = vld [vmem:[%s10502_s23 + $0x60] sm:$0xff]  ;;  %5949 = vmatpush3.bf16.msra.mxu0 %v6916_v32  ;;  %v79_v36 = vld [vmem:[%s10502_s23 + $0x70] sm:$0xff]  ;;  %v80_v37 = vld [vmem:[%s10502_s23 + $0x78] sm:$0xff]  ;;  %vm4880_vm4 = vcmask 1043456   ;;  %vm5068_vm5 = vcmask 523264   ;;  %vm5112_vm6 = vcmask 40960  }
  0x37   :  { %6154 = vmatprep.subr.bf16.mxu0 %v10448_v1  ;;  %v7441_v35 = vpack.c.bf16 %v78_v34, %v77_v33  ;;  %v7457_v38 = vpack.c.bf16 %v80_v37, %v79_v36  ;;  %v81_v39 = vld [vmem:[%s10502_s23 + $0x80] sm:$0xff]  ;;  %v82_v40 = vld [vmem:[%s10502_s23 + $0x88] sm:$0xff]  ;;  %v83_v42 = vld [vmem:[%s10502_s23 + $0x90] sm:$0xff] }
  0x38   :  { %v7473_v41 = vpack.c.bf16 %v82_v40, %v81_v39  ;;  %v84_v43 = vld [vmem:[%s10502_s23 + $0x98] sm:$0xff]  ;;  %v85_v45 = vld [vmem:[%s10502_s23 + $0xa0] sm:$0xff]  ;;  %v86_v46 = vld [vmem:[%s10502_s23 + $0xa8] sm:$0xff] }
  0x39   :  { %v7489_v44 = vpack.c.bf16 %v84_v43, %v83_v42  ;;  %v7505_v47 = vpack.c.bf16 %v86_v46, %v85_v45  ;;  %v87_v48 = vld [vmem:[%s10502_s23 + $0xb0] sm:$0xff]  ;;  %v88_v49 = vld [vmem:[%s10502_s23 + $0xb8] sm:$0xff]  ;;  %v6917_v51 = vld [vmem:[%s10433_s9 + $0x8] sm:$0xff]  }
  0x3a   :  { %v7521_v50 = vpack.c.bf16 %v88_v49, %v87_v48  ;;  %v89_v52 = vld [vmem:[%s10502_s23 + $0xc0] sm:$0xff]  ;;  %v90_v53 = vld [vmem:[%s10502_s23 + $0xc8] sm:$0xff]  ;;  %6051 = vmatpush3.bf16.msra.mxu1 %v6917_v51  ;;  %v91_v56 = vld [vmem:[%s10502_s23 + $0xd0] sm:$0xff] }
  0x3b   :  { %5763 = vmatmul.mubr.msk.bf16.gmra.mxu0 %vm162_vm1, %v7421_v31  ;;  %5855 = vmatmul.mubr.msk.bf16.gmra.mxu1 %vm162_vm1, %v7367_v20  ;;  %v6918_v54 = vld [vmem:[%s10433_s9] sm:$0xff]   ;;  %v7544_v55 = vpack.c.bf16 %v90_v53, %v89_v52  ;;  %v92_v57 = vld [vmem:[%s10502_s23 + $0xd8] sm:$0xff]  ;;  %v94_v60 = vld [vmem:[%s10502_s23 + $0xe8] sm:$0xff] }
  0x3c   :  { %5766 = vmatprep.mubr.msk.bf16.mxu0 %vm7182_vm0, %v10448_v1  ;;  %5858 = vmatprep.mubr.msk.bf16.mxu1 %vm7182_vm0, %v10448_v1  ;;  %v7561_v58 = vpack.c.bf16 %v92_v57, %v91_v56  ;;  %v93_v59 = vld [vmem:[%s10502_s23 + $0xe0] sm:$0xff]  ;;  %v95_v62 = vld [vmem:[%s10502_s23 + $0xf0] sm:$0xff]  ;;  %v96_v63 = vld [vmem:[%s10502_s23 + $0xf8] sm:$0xff] }
  0x3d   :  { %6052 = vmatprep.subr.bf16.mxu1 %v10448_v1  ;;  %v7577_v61 = vpack.c.bf16 %v94_v60, %v93_v59  ;;  %v7593_v0 = vpack.c.bf16 %v96_v63, %v95_v62  ;;  %v97_v2 = vld [vmem:[%s10502_s23 + $0x100] sm:$0xff]  ;;  %v98_v3 = vld [vmem:[%s10502_s23 + $0x108] sm:$0xff]  ;;  %v99_v5 = vld [vmem:[%s10502_s23 + $0x110] sm:$0xff] }
  0x3e   :  { %6053 = vmatpush3.bf16.msra.mxu1 %v6918_v54  ;;  %v7609_v4 = vpack.c.bf16 %v98_v3, %v97_v2  ;;  %v100_v6 = vld [vmem:[%s10502_s23 + $0x118] sm:$0xff]  ;;  %v101_v10 = vld [vmem:[%s10502_s23 + $0x120] sm:$0xff]  ;;  %v102_v11 = vld [vmem:[%s10502_s23 + $0x128] sm:$0xff] }
  0x3f   :  { %6258 = vmatprep.subr.bf16.mxu1 %v10448_v1  ;;  %v7625_v9 = vpack.c.bf16 %v100_v6, %v99_v5  ;;  %v7641_v12 = vpack.c.bf16 %v102_v11, %v101_v10  ;;  %v103_v13 = vld [vmem:[%s10502_s23 + $0x130] sm:$0xff]  ;;  %v104_v14 = vld [vmem:[%s10502_s23 + $0x138] sm:$0xff]  ;;  %v105_v18 = vld [vmem:[%s10502_s23 + $0x140] sm:$0xff] }
  0x40   :  { %v7657_v17 = vpack.c.bf16 %v104_v14, %v103_v13  ;;  %v106_v19 = vld [vmem:[%s10502_s23 + $0x148] sm:$0xff]  ;;  %v107_v23 = vld [vmem:[%s10502_s23 + $0x150] sm:$0xff]  ;;  %v108_v25 = vld [vmem:[%s10502_s23 + $0x158] sm:$0xff] }
  0x41   :  { %v7673_v22 = vpack.c.bf16 %v106_v19, %v105_v18  ;;  %v7689_v26 = vpack.c.bf16 %v108_v25, %v107_v23  ;;  %v6919_v3 = vld [vmem:[%s10434_s10 + $0x8] sm:$0xff]  }
  0x43   :  { %5767 = vmatmul.mubr.msk.bf16.gmra.mxu0 %vm162_vm1, %v7441_v35  ;;  %5859 = vmatmul.mubr.msk.bf16.gmra.mxu1 %vm162_vm1, %v7385_v24 }
  0x44   :  { %5770 = vmatprep.mubr.msk.bf16.mxu0 %vm7182_vm0, %v10448_v1  ;;  %5862 = vmatprep.mubr.msk.bf16.mxu1 %vm7182_vm0, %v10448_v1 }
  0x4b   :  { %5771 = vmatmul.mubr.msk.bf16.gmra.mxu0 %vm162_vm1, %v7457_v38  ;;  %5863 = vmatmul.mubr.msk.bf16.gmra.mxu1 %vm162_vm1, %v7401_v27 }
  0x4c   :  { %5774 = vmatprep.mubr.msk.bf16.mxu0 %vm7182_vm0, %v10448_v1  ;;  %5866 = vmatprep.mubr.msk.bf16.mxu1 %vm7182_vm0, %v10448_v1 }
  0x53   :  { %5775 = vmatmul.mubr.msk.bf16.gmra.mxu0 %vm162_vm1, %v7473_v41  ;;  %5867 = vmatmul.mubr.msk.bf16.gmra.mxu1 %vm162_vm1, %v7421_v31 }
  0x54   :  { %5778 = vmatprep.mubr.msk.bf16.mxu0 %vm7182_vm0, %v10448_v1  ;;  %5870 = vmatprep.mubr.msk.bf16.mxu1 %vm7182_vm0, %v10448_v1 }
  0x5b   :  { %5779 = vmatmul.mubr.msk.bf16.gmra.mxu0 %vm162_vm1, %v7489_v44  ;;  %5871 = vmatmul.mubr.msk.bf16.gmra.mxu1 %vm162_vm1, %v7441_v35 }
  0x5c   :  { %5782 = vmatprep.mubr.msk.bf16.mxu0 %vm7182_vm0, %v10448_v1  ;;  %5874 = vmatprep.mubr.msk.bf16.mxu1 %vm7182_vm0, %v10448_v1 }
  0x63   :  { %5783 = vmatmul.mubr.msk.bf16.gmra.mxu0 %vm162_vm1, %v7505_v47  ;;  %5875 = vmatmul.mubr.msk.bf16.gmra.mxu1 %vm162_vm1, %v7457_v38 }
  0x64   :  { %5786 = vmatprep.mubr.msk.bf16.mxu0 %vm7182_vm0, %v10448_v1  ;;  %5878 = vmatprep.mubr.msk.bf16.mxu1 %vm7182_vm0, %v10448_v1 }
  0x6b   :  { %5787 = vmatmul.mubr.msk.bf16.gmra.mxu0 %vm162_vm1, %v7521_v50  ;;  %5879 = vmatmul.mubr.msk.bf16.gmra.mxu1 %vm162_vm1, %v7473_v41 }
  0x6c   :  { %5790 = vmatprep.mubr.msk.bf16.mxu0 %vm7182_vm0, %v10448_v1  ;;  %5882 = vmatprep.mubr.msk.bf16.mxu1 %vm7182_vm0, %v10448_v1 }
  0x73   :  { %5791 = vmatmul.mubr.msk.bf16.gmra.mxu0 %vm162_vm1, %v7544_v55  ;;  %5883 = vmatmul.mubr.msk.bf16.gmra.mxu1 %vm162_vm1, %v7489_v44 }
  0x74   :  { %5794 = vmatprep.mubr.msk.bf16.mxu0 %vm7182_vm0, %v10448_v1  ;;  %5886 = vmatprep.mubr.msk.bf16.mxu1 %vm7182_vm0, %v10448_v1 }
  0x7b   :  { %5795 = vmatmul.mubr.msk.bf16.gmra.mxu0 %vm162_vm1, %v7561_v58  ;;  %5887 = vmatmul.mubr.msk.bf16.gmra.mxu1 %vm162_vm1, %v7505_v47 }
  0x7c   :  { %5798 = vmatprep.mubr.msk.bf16.mxu0 %vm7182_vm0, %v10448_v1  ;;  %5890 = vmatprep.mubr.msk.bf16.mxu1 %vm7182_vm0, %v10448_v1 }
  0x83   :  { %5799 = vmatmul.mubr.msk.bf16.gmra.mxu0 %vm162_vm1, %v7577_v61  ;;  %5891 = vmatmul.mubr.msk.bf16.gmra.mxu1 %vm162_vm1, %v7521_v50 }
  0x84   :  { %5802 = vmatprep.mubr.msk.bf16.mxu0 %vm7182_vm0, %v10448_v1  ;;  %5894 = vmatprep.mubr.msk.bf16.mxu1 %vm7182_vm0, %v10448_v1 }
  0x8b   :  { %5803 = vmatmul.mubr.msk.bf16.gmra.mxu0 %vm162_vm1, %v7593_v0  ;;  %5895 = vmatmul.mubr.msk.bf16.gmra.mxu1 %vm162_vm1, %v7544_v55 }
  0x8c   :  { %5806 = vmatprep.mubr.msk.bf16.mxu0 %vm7182_vm0, %v10448_v1  ;;  %5898 = vmatprep.mubr.msk.bf16.mxu1 %vm7182_vm0, %v10448_v1 }
  0x93   :  { %5807 = vmatmul.mubr.msk.bf16.gmra.mxu0 %vm162_vm1, %v7609_v4  ;;  %5899 = vmatmul.mubr.msk.bf16.gmra.mxu1 %vm162_vm1, %v7561_v58 }
  0x94   :  { %5810 = vmatprep.mubr.msk.bf16.mxu0 %vm7182_vm0, %v10448_v1  ;;  %5902 = vmatprep.mubr.msk.bf16.mxu1 %vm7182_vm0, %v10448_v1 }
  0x9b   :  { %5811 = vmatmul.mubr.msk.bf16.gmra.mxu0 %vm162_vm1, %v7625_v9  ;;  %5903 = vmatmul.mubr.msk.bf16.gmra.mxu1 %vm162_vm1, %v7577_v61 }
  0x9c   :  { %5814 = vmatprep.mubr.msk.bf16.mxu0 %vm7182_vm0, %v10448_v1  ;;  %5906 = vmatprep.mubr.msk.bf16.mxu1 %vm7182_vm0, %v10448_v1 }
  0xa3   :  { %5815 = vmatmul.mubr.msk.bf16.gmra.mxu0 %vm162_vm1, %v7641_v12  ;;  %5907 = vmatmul.mubr.msk.bf16.gmra.mxu1 %vm162_vm1, %v7593_v0 }
  0xa4   :  { %5818 = vmatprep.mubr.msk.bf16.mxu0 %vm7182_vm0, %v10448_v1  ;;  %5910 = vmatprep.mubr.msk.bf16.mxu1 %vm7182_vm0, %v10448_v1 }
  0xab   :  { %5819 = vmatmul.mubr.msk.bf16.gmra.mxu0 %vm162_vm1, %v7657_v17  ;;  %5911 = vmatmul.mubr.msk.bf16.gmra.mxu1 %vm162_vm1, %v7609_v4 }
  0xac   :  { %5822 = vmatprep.mubr.msk.bf16.mxu0 %vm7182_vm0, %v10448_v1  ;;  %5914 = vmatprep.mubr.msk.bf16.mxu1 %vm7182_vm0, %v10448_v1 }
  0xb3   :  { %5823 = vmatmul.mubr.msk.bf16.gmra.mxu0 %vm162_vm1, %v7673_v22  ;;  %5915 = vmatmul.mubr.msk.bf16.gmra.mxu1 %vm162_vm1, %v7625_v9 }
  0xb4   :  { %5826 = vmatprep.mubr.msk.bf16.mxu0 %vm7182_vm0, %v10448_v1  ;;  %5918 = vmatprep.mubr.msk.bf16.mxu1 %vm7182_vm0, %v10448_v1 }
  0xbb   :  { %5827 = vmatmul.mubr.msk.bf16.gmra.mxu0 %vm162_vm1, %v7689_v26  ;;  %5919 = vmatmul.mubr.msk.bf16.gmra.mxu1 %vm162_vm1, %v7641_v12 }
  0xbc   :  { %5922 = vmatprep.mubr.msk.bf16.mxu1 %vm7182_vm0, %v10448_v1  ;;  %5950 = vmatprep.mubr.msk.bf16.mxu0 %vm7182_vm0, %v10448_v1 }
  0xc3   :  { %5923 = vmatmul.mubr.msk.bf16.gmra.mxu1 %vm162_vm1, %v7657_v17  ;;  %5951 = vmatmul.mubr.msk.bf16.vlgmr.msra.gmra.mxu0 %vm162_vm1, %v7312_v7 }
  0xc4   :  { %5926 = vmatprep.mubr.msk.bf16.mxu1 %vm7182_vm0, %v10448_v1  ;;  %5954 = vmatprep.mubr.msk.bf16.mxu0 %vm7182_vm0, %v10448_v1 }
  0xc5   :  { %6155 = vmatpush3.bf16.msra.mxu0 %v6919_v3 }
  0xc6   :  { %6156 = vmatprep.subr.bf16.mxu0 %v10448_v1 }
  0xcb   :  { %5927 = vmatmul.mubr.msk.bf16.gmra.mxu1 %vm162_vm1, %v7673_v22  ;;  %5955 = vmatmul.mubr.msk.bf16.gmra.mxu0 %vm162_vm1, %v7345_v15  ;;  %v7726_v15 = vld [vmem:[%s10428_s4] ss:$0 sm:$0xff] }
  0xcc   :  { %5930 = vmatprep.mubr.msk.bf16.mxu1 %vm7182_vm0, %v10448_v1  ;;  %5958 = vmatprep.mubr.msk.bf16.mxu0 %vm7182_vm0, %v10448_v1 }
  0xd3   :  { %v272_v28 = vpop.f32.mrf.mxu0  ;;  %v448_v7 = vpop.f32.mrf.mxu1  ;;  %5931 = vmatmul.mubr.msk.bf16.gmra.mxu1 %vm162_vm1, %v7689_v26  ;;  %5959 = vmatmul.mubr.msk.bf16.gmra.mxu0 %vm162_vm1, %v7367_v20 }
  0xd4   :  { %5934 = vmatprep.mubr.msk.bf16.mxu1 %vm7182_vm0, %v10448_v1  ;;  %5962 = vmatprep.mubr.msk.bf16.mxu0 %vm7182_vm0, %v10448_v1  ;;  %v7729_v32 = vadd.f32 %v7726_v15, %v448_v7  ;;  %v273_v18 = vadd.f32 %v7726_v15, %v272_v28 }
  0xd5   :  { %v5744_v29 = vpop.f32.mrf.mxu0  ;;  %v5832_v30 = vpop.f32.mrf.mxu1 }
  0xd7   :  { %v275_v33 = vpop.f32.mrf.mxu0  ;;  %v451_v34 = vpop.f32.mrf.mxu1 }
  0xd8   :  { %v7732_v20 = vadd.f32 %v7726_v15, %v451_v34  ;;  %v276_v10 = vadd.f32 %v7726_v15, %v275_v33 }
  0xd9   :  { %v5745_v36 = vpop.f32.mrf.mxu0  ;;  %v5833_v37 = vpop.f32.mrf.mxu1 }
  0xda   :  { %v980_v25 = vpack.c.bf16 %v276_v10, %v273_v18 }
  0xdb   :  { %v280_v40 = vpop.f32.mrf.mxu0  ;;  %v456_v42 = vpop.f32.mrf.mxu1  ;;  %5935 = vmatmul.mubr.msk.bf16.gmra.mxu1 %vm162_vm1, %v7314_v8  ;;  %5963 = vmatmul.mubr.msk.bf16.gmra.mxu0 %vm162_vm1, %v7385_v24 }
  0xdc   :  { %5938 = vmatprep.mubr.msk.bf16.mxu1 %vm7182_vm0, %v10448_v1  ;;  %5966 = vmatprep.mubr.msk.bf16.mxu0 %vm7182_vm0, %v10448_v1  ;;  %v7745_v46 = vadd.f32 %v7726_v15, %v456_v42 }
  0xdd   :  { %v5748_v43 = vpop.f32.mrf.mxu0  ;;  %v5836_v45 = vpop.f32.mrf.mxu1 }
  0xde   :  { %v281_v43 = vadd.f32 %v7726_v15, %v280_v40 }
  0xdf   :  { %v283_v48 = vpop.f32.mrf.mxu0  ;;  %v459_v49 = vpop.f32.mrf.mxu1 }
  0xe0   :  { %v7748_v51 = vadd.f32 %v7726_v15, %v459_v49  ;;  %v284_v28 = vadd.f32 %v7726_v15, %v283_v48 }
  0xe1   :  { %v5749_v52 = vpop.f32.mrf.mxu0  ;;  %v5837_v53 = vpop.f32.mrf.mxu1 }
  0xe2   :  { %v981_v52 = vpack.c.bf16 %v284_v28, %v281_v43 }
  0xe3   :  { %v288_v54 = vpop.f32.mrf.mxu0  ;;  %v7752_v56 = vpop.f32.mrf.mxu1  ;;  %5939 = vmatmul.mubr.msk.bf16.gmra.mxu1 %vm162_vm1, %v7347_v16  ;;  %5967 = vmatmul.mubr.msk.bf16.gmra.mxu0 %vm162_vm1, %v7401_v27  ;;  %v7770_v27 = vld [vmem:[%s10429_s5] ss:$0 sm:$0xff] }
  0xe4   :  { %5942 = vmatprep.mubr.msk.bf16.mxu1 %vm7182_vm0, %v10448_v1  ;;  %5970 = vmatprep.mubr.msk.bf16.mxu0 %vm7182_vm0, %v10448_v1 }
  0xe5   :  { %v5752_v57 = vpop.f32.mrf.mxu0  ;;  %v5840_v59 = vpop.f32.mrf.mxu1 }
  0xe7   :  { %v291_v60 = vpop.f32.mrf.mxu0  ;;  %v467_v62 = vpop.f32.mrf.mxu1 }
  0xe8   :  { %v292_v40 = vadd.f32 %v7726_v15, %v291_v60 }
  0xe9   :  { %v5753_v63 = vpop.f32.mrf.mxu0  ;;  %v5841_v2 = vpop.f32.mrf.mxu1 }
  0xeb   :  { %v7765_v5 = vpop.f32.mrf.mxu0  ;;  %v527_v6 = vpop.f32.mrf.mxu1  ;;  %5943 = vmatmul.mubr.msk.bf16.gmra.mxu1 %vm162_vm1, %v7369_v21  ;;  %5971 = vmatmul.mubr.msk.bf16.gmra.mxu0 %vm162_vm1, %v7421_v31 }
  0xec   :  { %5974 = vmatprep.mubr.msk.bf16.mxu0 %vm7182_vm0, %v10448_v1  ;;  %6054 = vmatprep.mubr.msk.bf16.mxu1 %vm7182_vm0, %v10448_v1  ;;  %v7782_v14 = vadd.f32 %v7770_v27, %v527_v6  ;;  %v289_v6 = vadd.f32 %v7726_v15, %v288_v54 }
  0xed   :  { %v5756_v11 = vpop.f32.mrf.mxu0  ;;  %v5848_v13 = vpop.f32.mrf.mxu1 }
  0xee   :  { %v982_v13 = vpack.c.bf16 %v292_v40, %v289_v6 }
  0xef   :  { %v299_v19 = vpop.f32.mrf.mxu0  ;;  %v530_v31 = vpop.f32.mrf.mxu1 }
  0xf0   :  { %v7787_v23 = vadd.f32 %v7770_v27, %v530_v31  ;;  %v300_v54 = vadd.f32 %v7726_v15, %v299_v19 }
  0xf1   :  { %v5757_v7 = vpop.f32.mrf.mxu0  ;;  %v5849_v29 = vpop.f32.mrf.mxu1 }
  0xf3   :  { %v7791_v33 = vpop.f32.mrf.mxu0  ;;  %v535_v34 = vpop.f32.mrf.mxu1  ;;  %5975 = vmatmul.mubr.msk.bf16.gmra.mxu0 %vm162_vm1, %v7441_v35  ;;  %6055 = vmatmul.mubr.msk.bf16.vlgmr.msra.gmra.mxu1 %vm162_vm1, %v980_v25 }
  0xf4   :  { %5978 = vmatprep.mubr.msk.bf16.mxu0 %vm7182_vm0, %v10448_v1  ;;  %6058 = vmatprep.mubr.msk.bf16.mxu1 %vm7182_vm0, %v10448_v1  ;;  %v7802_v42 = vadd.f32 %v7770_v27, %v535_v34 }
  0xf5   :  { %v5760_v36 = vpop.f32.mrf.mxu0  ;;  %v5852_v37 = vpop.f32.mrf.mxu1 }
  0xf6   :  { %v6920_v36 = vld [vmem:[%s10434_s10] sm:$0xff]  }
  0xf7   :  { %v307_v45 = vpop.f32.mrf.mxu0  ;;  %v538_v49 = vpop.f32.mrf.mxu1  ;;  %6157 = vmatpush3.bf16.msra.mxu0 %v6920_v36 }
  0xf8   :  { %v7806_v35 = vadd.f32 %v7770_v27, %v538_v49  ;;  %6374 = vmatprep.subr.bf16.mxu0 %v10448_v1 }
  0xf9   :  { %v5761_v53 = vpop.f32.mrf.mxu0  ;;  %v5853_v57 = vpop.f32.mrf.mxu1 }
  0xfb   :  { %v7810_v62 = vpop.f32.mrf.mxu0  ;;  %v543_v48 = vpop.f32.mrf.mxu1  ;;  %5979 = vmatmul.mubr.msk.bf16.gmra.mxu0 %vm162_vm1, %v7457_v38  ;;  %6059 = vmatmul.mubr.msk.bf16.gmra.mxu1 %vm162_vm1, %v981_v52 }
  0xfc   :  { %5982 = vmatprep.mubr.msk.bf16.mxu0 %vm7182_vm0, %v10448_v1  ;;  %6062 = vmatprep.mubr.msk.bf16.mxu1 %vm7182_vm0, %v10448_v1  ;;  %v7821_v3 = vadd.f32 %v7770_v27, %v543_v48 }
  0xfd   :  { %v5764_v63 = vpop.f32.mrf.mxu0  ;;  %v5856_v2 = vpop.f32.mrf.mxu1 }
  0xff   :  { %v315_v10 = vpop.f32.mrf.mxu0  ;;  %v546_v11 = vpop.f32.mrf.mxu1 }
 0x100   :  { %v7825_v38 = vadd.f32 %v7770_v27, %v546_v11  ;;  %v305_v11 = vadd.f32 %v7726_v15, %v7791_v33  ;;  %v316_v33 = vadd.f32 %v7726_v15, %v315_v10 }
 0x101   :  { %v5765_v18 = vpop.f32.mrf.mxu0  ;;  %v5857_v31 = vpop.f32.mrf.mxu1 }
 0x103   :  { %v7829_v7 = vpop.f32.mrf.mxu0  ;;  %v551_v60 = vpop.f32.mrf.mxu1  ;;  %5983 = vmatmul.mubr.msk.bf16.gmra.mxu0 %vm162_vm1, %v7473_v41  ;;  %6063 = vmatmul.mubr.msk.bf16.gmra.mxu1 %vm162_vm1, %v982_v13  ;;  %v297_v41 = vadd.f32 %v7726_v15, %v7765_v5  ;;  %v308_v5 = vadd.f32 %v7726_v15, %v307_v45 }
 0x104   :  { %5986 = vmatprep.mubr.msk.bf16.mxu0 %vm7182_vm0, %v10448_v1  ;;  %6066 = vmatprep.mubr.msk.bf16.mxu1 %vm7182_vm0, %v10448_v1  ;;  %v7840_v28 = vadd.f32 %v7770_v27, %v551_v60 }
 0x105   :  { %v5768_v29 = vpop.f32.mrf.mxu0  ;;  %v5860_v34 = vpop.f32.mrf.mxu1  ;;  %v983_v52 = vpack.c.bf16 %v300_v54, %v297_v41  ;;  %v984_v31 = vpack.c.bf16 %v308_v5, %v305_v11 }
 0x107   :  { %v323_v37 = vpop.f32.mrf.mxu0  ;;  %v554_v43 = vpop.f32.mrf.mxu1 }
 0x108   :  { %v7848_v49 = vadd.f32 %v7770_v27, %v554_v43 }
 0x109   :  { %v5769_v19 = vpop.f32.mrf.mxu0  ;;  %v5861_v53 = vpop.f32.mrf.mxu1 }
 0x10b   :  { %v7853_v48 = vpop.f32.mrf.mxu0  ;;  %v559_v40 = vpop.f32.mrf.mxu1  ;;  %5987 = vmatmul.mubr.msk.bf16.gmra.mxu0 %vm162_vm1, %v7489_v44  ;;  %6067 = vmatmul.mubr.msk.bf16.gmra.mxu1 %vm162_vm1, %v983_v52  ;;  %v313_v52 = vadd.f32 %v7726_v15, %v7810_v62  ;;  %v324_v62 = vadd.f32 %v7726_v15, %v323_v37 }
 0x10c   :  { %5990 = vmatprep.mubr.msk.bf16.mxu0 %vm7182_vm0, %v10448_v1  ;;  %6070 = vmatprep.mubr.msk.bf16.mxu1 %vm7182_vm0, %v10448_v1  ;;  %v7864_v6 = vadd.f32 %v7770_v27, %v559_v40 }
 0x10d   :  { %v5772_v63 = vpop.f32.mrf.mxu0  ;;  %v5864_v2 = vpop.f32.mrf.mxu1  ;;  %v985_v40 = vpack.c.bf16 %v316_v33, %v313_v52 }
 0x10f   :  { %v331_v13 = vpop.f32.mrf.mxu0  ;;  %v562_v44 = vpop.f32.mrf.mxu1 }
 0x110   :  { %v7869_v18 = vadd.f32 %v7770_v27, %v562_v44 }
 0x111   :  { %v5773_v60 = vpop.f32.mrf.mxu0  ;;  %v5865_v54 = vpop.f32.mrf.mxu1 }
 0x112   :  { %v321_v54 = vadd.f32 %v7726_v15, %v7829_v7  ;;  %v332_v7 = vadd.f32 %v7726_v15, %v331_v13 }
 0x113   :  { %v7873_v45 = vpop.f32.mrf.mxu0  ;;  %v567_v34 = vpop.f32.mrf.mxu1  ;;  %5991 = vmatmul.mubr.msk.bf16.gmra.mxu0 %vm162_vm1, %v7505_v47  ;;  %6071 = vmatmul.mubr.msk.bf16.gmra.mxu1 %vm162_vm1, %v984_v31 }
 0x114   :  { %5994 = vmatprep.mubr.msk.bf16.mxu0 %vm7182_vm0, %v10448_v1  ;;  %6074 = vmatprep.mubr.msk.bf16.mxu1 %vm7182_vm0, %v10448_v1  ;;  %v7884_v43 = vadd.f32 %v7770_v27, %v567_v34 }
 0x115   :  { %v5776_v36 = vpop.f32.mrf.mxu0  ;;  %v5868_v41 = vpop.f32.mrf.mxu1 }
 0x116   :  { %v986_v36 = vpack.c.bf16 %v324_v62, %v321_v54  ;;  %v329_v62 = vadd.f32 %v7726_v15, %v7853_v48 }
 0x117   :  { %v339_v19 = vpop.f32.mrf.mxu0  ;;  %v570_v47 = vpop.f32.mrf.mxu1 }
 0x118   :  { %v7889_v53 = vadd.f32 %v7770_v27, %v570_v47  ;;  %v987_v54 = vpack.c.bf16 %v332_v7, %v329_v62  ;;  %v340_v48 = vadd.f32 %v7726_v15, %v339_v19 }
 0x119   :  { %v5777_v5 = vpop.f32.mrf.mxu0  ;;  %v5869_v63 = vpop.f32.mrf.mxu1 }
 0x11b   :  { %v7893_v10 = vpop.f32.mrf.mxu0  ;;  %v575_v11 = vpop.f32.mrf.mxu1  ;;  %5995 = vmatmul.mubr.msk.bf16.gmra.mxu0 %vm162_vm1, %v7521_v50  ;;  %6075 = vmatmul.mubr.msk.bf16.gmra.mxu1 %vm162_vm1, %v985_v40 }
 0x11c   :  { %5998 = vmatprep.mubr.msk.bf16.mxu0 %vm7182_vm0, %v10448_v1  ;;  %6078 = vmatprep.mubr.msk.bf16.mxu1 %vm7182_vm0, %v10448_v1  ;;  %v7904_v60 = vadd.f32 %v7770_v27, %v575_v11 }
 0x11d   :  { %v5780_v44 = vpop.f32.mrf.mxu0  ;;  %v5872_v31 = vpop.f32.mrf.mxu1 }
 0x11f   :  { %v347_v34 = vpop.f32.mrf.mxu0  ;;  %v578_v50 = vpop.f32.mrf.mxu1 }
 0x120   :  { %v7909_v33 = vadd.f32 %v7770_v27, %v578_v50 }
 0x121   :  { %v5781_v41 = vpop.f32.mrf.mxu0  ;;  %v5873_v52 = vpop.f32.mrf.mxu1 }
 0x123   :  { %v7913_v37 = vpop.f32.mrf.mxu0  ;;  %v583_v40 = vpop.f32.mrf.mxu1  ;;  %5999 = vmatmul.mubr.msk.bf16.gmra.mxu0 %vm162_vm1, %v7544_v55  ;;  %6079 = vmatmul.mubr.msk.bf16.gmra.mxu1 %vm162_vm1, %v986_v36 }
 0x124   :  { %6002 = vmatprep.mubr.msk.bf16.mxu0 %vm7182_vm0, %v10448_v1  ;;  %6082 = vmatprep.mubr.msk.bf16.mxu1 %vm7182_vm0, %v10448_v1  ;;  %v7924_v11 = vadd.f32 %v7770_v27, %v583_v40 }
 0x125   :  { %v5784_v5 = vpop.f32.mrf.mxu0  ;;  %v5876_v63 = vpop.f32.mrf.mxu1 }
 0x126   :  { %v337_v63 = vadd.f32 %v7726_v15, %v7873_v45  ;;  %v348_v45 = vadd.f32 %v7726_v15, %v347_v34 }
 0x127   :  { %v355_v44 = vpop.f32.mrf.mxu0  ;;  %v586_v55 = vpop.f32.mrf.mxu1 }
 0x128   :  { %v7929_v31 = vadd.f32 %v7770_v27, %v586_v55 }
 0x129   :  { %v5785_v50 = vpop.f32.mrf.mxu0  ;;  %v5877_v36 = vpop.f32.mrf.mxu1 }
 0x12b   :  { %v7933_v13 = vpop.f32.mrf.mxu0  ;;  %v591_v52 = vpop.f32.mrf.mxu1  ;;  %6003 = vmatmul.mubr.msk.bf16.gmra.mxu0 %vm162_vm1, %v7561_v58  ;;  %6083 = vmatmul.mubr.msk.bf16.gmra.mxu1 %vm162_vm1, %v987_v54  ;;  %v988_v54 = vpack.c.bf16 %v340_v48, %v337_v63  ;;  %v345_v63 = vadd.f32 %v7726_v15, %v7893_v10  ;;  %v356_v10 = vadd.f32 %v7726_v15, %v355_v44 }
 0x12c   :  { %6006 = vmatprep.mubr.msk.bf16.mxu0 %vm7182_vm0, %v10448_v1  ;;  %6086 = vmatprep.mubr.msk.bf16.mxu1 %vm7182_vm0, %v10448_v1  ;;  %v7944_v5 = vadd.f32 %v7770_v27, %v591_v52 }
 0x12d   :  { %v5788_v40 = vpop.f32.mrf.mxu0  ;;  %v5880_v7 = vpop.f32.mrf.mxu1 }
 0x12f   :  { %v363_v62 = vpop.f32.mrf.mxu0  ;;  %v594_v58 = vpop.f32.mrf.mxu1 }
 0x130   :  { %v7949_v55 = vadd.f32 %v7770_v27, %v594_v58 }
 0x131   :  { %v5789_v50 = vpop.f32.mrf.mxu0  ;;  %v5881_v36 = vpop.f32.mrf.mxu1 }
 0x132   :  { %v989_v50 = vpack.c.bf16 %v348_v45, %v345_v63 }
 0x133   :  { %v7953_v19 = vpop.f32.mrf.mxu0  ;;  %v599_v40 = vpop.f32.mrf.mxu1  ;;  %6007 = vmatmul.mubr.msk.bf16.gmra.mxu0 %vm162_vm1, %v7577_v61  ;;  %6087 = vmatmul.mubr.msk.bf16.gmra.mxu1 %vm162_vm1, %v988_v54 }
 0x134   :  { %6010 = vmatprep.mubr.msk.bf16.mxu0 %vm7182_vm0, %v10448_v1  ;;  %6090 = vmatprep.mubr.msk.bf16.mxu1 %vm7182_vm0, %v10448_v1  ;;  %v7964_v7 = vadd.f32 %v7770_v27, %v599_v40 }
 0x135   :  { %v5792_v52 = vpop.f32.mrf.mxu0  ;;  %v5884_v48 = vpop.f32.mrf.mxu1 }
 0x136   :  { %v353_v48 = vadd.f32 %v7726_v15, %v7913_v37  ;;  %v364_v37 = vadd.f32 %v7726_v15, %v363_v62 }
 0x137   :  { %v371_v58 = vpop.f32.mrf.mxu0  ;;  %v602_v61 = vpop.f32.mrf.mxu1 }
 0x138   :  { %v7969_v54 = vadd.f32 %v7770_v27, %v602_v61 }
 0x139   :  { %v5793_v36 = vpop.f32.mrf.mxu0  ;;  %v5885_v41 = vpop.f32.mrf.mxu1 }
 0x13b   :  { %v7973_v34 = vpop.f32.mrf.mxu0  ;;  %v607_v52 = vpop.f32.mrf.mxu1  ;;  %6011 = vmatmul.mubr.msk.bf16.gmra.mxu0 %vm162_vm1, %v7593_v0  ;;  %6091 = vmatmul.mubr.msk.bf16.gmra.mxu1 %vm162_vm1, %v989_v50  ;;  %v990_v50 = vpack.c.bf16 %v356_v10, %v353_v48 }
 0x13c   :  { %6014 = vmatprep.mubr.msk.bf16.mxu0 %vm7182_vm0, %v10448_v1  ;;  %6094 = vmatprep.mubr.msk.bf16.mxu1 %vm7182_vm0, %v10448_v1  ;;  %v7984_v45 = vadd.f32 %v7770_v27, %v607_v52 }
 0x13d   :  { %v5796_v41 = vpop.f32.mrf.mxu0  ;;  %v5888_v40 = vpop.f32.mrf.mxu1 }
 0x13e   :  { %v361_v40 = vadd.f32 %v7726_v15, %v7933_v13  ;;  %v372_v13 = vadd.f32 %v7726_v15, %v371_v58 }
 0x13f   :  { %v379_v63 = vpop.f32.mrf.mxu0  ;;  %v610_v0 = vpop.f32.mrf.mxu1 }
 0x140   :  { %v7989_v61 = vadd.f32 %v7770_v27, %v610_v0 }
 0x141   :  { %v5797_v36 = vpop.f32.mrf.mxu0  ;;  %v5889_v47 = vpop.f32.mrf.mxu1 }
 0x143   :  { %v7993_v44 = vpop.f32.mrf.mxu0  ;;  %v615_v41 = vpop.f32.mrf.mxu1  ;;  %6015 = vmatmul.mubr.msk.bf16.gmra.mxu0 %vm162_vm1, %v7609_v4  ;;  %6095 = vmatmul.mubr.msk.bf16.gmra.mxu1 %vm162_vm1, %v990_v50  ;;  %v991_v50 = vpack.c.bf16 %v364_v37, %v361_v40 }
 0x144   :  { %6018 = vmatprep.mubr.msk.bf16.mxu0 %vm7182_vm0, %v10448_v1  ;;  %6098 = vmatprep.mubr.msk.bf16.mxu1 %vm7182_vm0, %v10448_v1  ;;  %v8004_v10 = vadd.f32 %v7770_v27, %v615_v41 }
 0x145   :  { %v5800_v47 = vpop.f32.mrf.mxu0  ;;  %v5892_v52 = vpop.f32.mrf.mxu1 }
 0x146   :  { %v369_v52 = vadd.f32 %v7726_v15, %v7953_v19  ;;  %v380_v19 = vadd.f32 %v7726_v15, %v379_v63 }
 0x147   :  { %v387_v48 = vpop.f32.mrf.mxu0  ;;  %v618_v4 = vpop.f32.mrf.mxu1 }
 0x148   :  { %v8009_v0 = vadd.f32 %v7770_v27, %v618_v4 }
 0x149   :  { %v5801_v36 = vpop.f32.mrf.mxu0  ;;  %v5893_v2 = vpop.f32.mrf.mxu1 }
 0x14b   :  { %v8013_v62 = vpop.f32.mrf.mxu0  ;;  %v623_v47 = vpop.f32.mrf.mxu1  ;;  %6019 = vmatmul.mubr.msk.bf16.gmra.mxu0 %vm162_vm1, %v7625_v9  ;;  %6099 = vmatmul.mubr.msk.bf16.gmra.mxu1 %vm162_vm1, %v991_v50  ;;  %v992_v50 = vpack.c.bf16 %v372_v13, %v369_v52 }
 0x14c   :  { %6022 = vmatprep.mubr.msk.bf16.mxu0 %vm7182_vm0, %v10448_v1  ;;  %6102 = vmatprep.mubr.msk.bf16.mxu1 %vm7182_vm0, %v10448_v1  ;;  %v8024_v37 = vadd.f32 %v7770_v27, %v623_v47 }
 0x14d   :  { %v5804_v2 = vpop.f32.mrf.mxu0  ;;  %v5896_v41 = vpop.f32.mrf.mxu1 }
 0x14e   :  { %v377_v41 = vadd.f32 %v7726_v15, %v7973_v34  ;;  %v388_v34 = vadd.f32 %v7726_v15, %v387_v48 }
 0x14f   :  { %v395_v40 = vpop.f32.mrf.mxu0  ;;  %v626_v9 = vpop.f32.mrf.mxu1 }
 0x150   :  { %v8029_v4 = vadd.f32 %v7770_v27, %v626_v9 }
 0x151   :  { %v5805_v36 = vpop.f32.mrf.mxu0  ;;  %v5897_v29 = vpop.f32.mrf.mxu1 }
 0x153   :  { %v8033_v58 = vpop.f32.mrf.mxu0  ;;  %v631_v2 = vpop.f32.mrf.mxu1  ;;  %6023 = vmatmul.mubr.msk.bf16.gmra.mxu0 %vm162_vm1, %v7641_v12  ;;  %6103 = vmatmul.mubr.msk.bf16.gmra.mxu1 %vm162_vm1, %v992_v50  ;;  %v993_v50 = vpack.c.bf16 %v380_v19, %v377_v41 }
 0x154   :  { %6026 = vmatprep.mubr.msk.bf16.mxu0 %vm7182_vm0, %v10448_v1  ;;  %6106 = vmatprep.mubr.msk.bf16.mxu1 %vm7182_vm0, %v10448_v1  ;;  %v8044_v13 = vadd.f32 %v7770_v27, %v631_v2 }
 0x155   :  { %v5808_v29 = vpop.f32.mrf.mxu0  ;;  %v5900_v47 = vpop.f32.mrf.mxu1 }
 0x156   :  { %v385_v47 = vadd.f32 %v7726_v15, %v7993_v44  ;;  %v396_v44 = vadd.f32 %v7726_v15, %v395_v40 }
 0x157   :  { %v403_v52 = vpop.f32.mrf.mxu0  ;;  %v634_v12 = vpop.f32.mrf.mxu1 }
 0x158   :  { %v8049_v9 = vadd.f32 %v7770_v27, %v634_v12 }
 0x159   :  { %v5809_v36 = vpop.f32.mrf.mxu0  ;;  %v5901_v24 = vpop.f32.mrf.mxu1 }
 0x15b   :  { %v8053_v63 = vpop.f32.mrf.mxu0  ;;  %v639_v29 = vpop.f32.mrf.mxu1  ;;  %6027 = vmatmul.mubr.msk.bf16.gmra.mxu0 %vm162_vm1, %v7657_v17  ;;  %6107 = vmatmul.mubr.msk.bf16.gmra.mxu1 %vm162_vm1, %v993_v50  ;;  %v994_v50 = vpack.c.bf16 %v388_v34, %v385_v47 }
 0x15c   :  { %6030 = vmatprep.mubr.msk.bf16.mxu0 %vm7182_vm0, %v10448_v1  ;;  %6110 = vmatprep.mubr.msk.bf16.mxu1 %vm7182_vm0, %v10448_v1  ;;  %v8064_v19 = vadd.f32 %v7770_v27, %v639_v29 }
 0x15d   :  { %v5812_v24 = vpop.f32.mrf.mxu0  ;;  %v5904_v2 = vpop.f32.mrf.mxu1 }
 0x15e   :  { %v393_v2 = vadd.f32 %v7726_v15, %v8013_v62  ;;  %v404_v62 = vadd.f32 %v7726_v15, %v403_v52 }
 0x15f   :  { %v411_v41 = vpop.f32.mrf.mxu0  ;;  %v642_v17 = vpop.f32.mrf.mxu1 }
 0x160   :  { %v8069_v12 = vadd.f32 %v7770_v27, %v642_v17 }
 0x161   :  { %v5813_v36 = vpop.f32.mrf.mxu0  ;;  %v5905_v57 = vpop.f32.mrf.mxu1 }
 0x163   :  { %v8073_v48 = vpop.f32.mrf.mxu0  ;;  %v647_v24 = vpop.f32.mrf.mxu1  ;;  %6031 = vmatmul.mubr.msk.bf16.gmra.mxu0 %vm162_vm1, %v7673_v22  ;;  %6111 = vmatmul.mubr.msk.bf16.gmra.mxu1 %vm162_vm1, %v994_v50  ;;  %v995_v50 = vpack.c.bf16 %v396_v44, %v393_v2 }
 0x164   :  { %6034 = vmatprep.mubr.msk.bf16.mxu0 %vm7182_vm0, %v10448_v1  ;;  %6114 = vmatprep.mubr.msk.bf16.mxu1 %vm7182_vm0, %v10448_v1  ;;  %v8084_v34 = vadd.f32 %v7770_v27, %v647_v24 }
 0x165   :  { %v5816_v57 = vpop.f32.mrf.mxu0  ;;  %v5908_v29 = vpop.f32.mrf.mxu1 }
 0x166   :  { %v401_v29 = vadd.f32 %v7726_v15, %v8033_v58  ;;  %v412_v58 = vadd.f32 %v7726_v15, %v411_v41 }
 0x167   :  { %v419_v47 = vpop.f32.mrf.mxu0  ;;  %v650_v22 = vpop.f32.mrf.mxu1 }
 0x168   :  { %v8089_v17 = vadd.f32 %v7770_v27, %v650_v22 }
 0x169   :  { %v5817_v36 = vpop.f32.mrf.mxu0  ;;  %v5909_v39 = vpop.f32.mrf.mxu1 }
 0x16b   :  { %v8093_v40 = vpop.f32.mrf.mxu0  ;;  %v655_v57 = vpop.f32.mrf.mxu1  ;;  %6035 = vmatmul.mubr.msk.bf16.gmra.mxu0 %vm162_vm1, %v7689_v26  ;;  %6115 = vmatmul.mubr.msk.bf16.gmra.mxu1 %vm162_vm1, %v995_v50  ;;  %v996_v50 = vpack.c.bf16 %v404_v62, %v401_v29 }
 0x16c   :  { %6038 = vmatprep.mubr.msk.bf16.mxu0 %vm7182_vm0, %v10448_v1  ;;  %6118 = vmatprep.mubr.msk.bf16.mxu1 %vm7182_vm0, %v10448_v1  ;;  %v8104_v44 = vadd.f32 %v7770_v27, %v655_v57 }
 0x16d   :  { %v5820_v39 = vpop.f32.mrf.mxu0  ;;  %v5912_v24 = vpop.f32.mrf.mxu1 }
 0x16e   :  { %v409_v24 = vadd.f32 %v7726_v15, %v8053_v63  ;;  %v420_v63 = vadd.f32 %v7726_v15, %v419_v47 }
 0x16f   :  { %v427_v2 = vpop.f32.mrf.mxu0  ;;  %v658_v26 = vpop.f32.mrf.mxu1 }
 0x170   :  { %v8109_v22 = vadd.f32 %v7770_v27, %v658_v26 }
 0x171   :  { %v5821_v36 = vpop.f32.mrf.mxu0  ;;  %v5913_v25 = vpop.f32.mrf.mxu1 }
 0x173   :  { %v8113_v52 = vpop.f32.mrf.mxu0  ;;  %v663_v39 = vpop.f32.mrf.mxu1  ;;  %6039 = vmatmul.mubr.msk.bf16.gmra.mxu0 %vm162_vm1, %v7314_v8  ;;  %6119 = vmatmul.mubr.msk.bf16.gmra.mxu1 %vm162_vm1, %v996_v50  ;;  %v997_v50 = vpack.c.bf16 %v412_v58, %v409_v24 }
 0x174   :  { %6042 = vmatprep.mubr.msk.bf16.mxu0 %vm7182_vm0, %v10448_v1  ;;  %6122 = vmatprep.mubr.msk.bf16.mxu1 %vm7182_vm0, %v10448_v1  ;;  %v8124_v62 = vadd.f32 %v7770_v27, %v663_v39 }
 0x175   :  { %v5824_v25 = vpop.f32.mrf.mxu0  ;;  %v5916_v57 = vpop.f32.mrf.mxu1 }
 0x176   :  { %10505 = vst [vmem:[#allocation5_spill] sm:$0xff] %v8124_v62  ;;  %v417_v57 = vadd.f32 %v7726_v15, %v8073_v48  ;;  %v428_v48 = vadd.f32 %v7726_v15, %v427_v2 }
 0x177   :  { %v435_v29 = vpop.f32.mrf.mxu0  ;;  %v666_v8 = vpop.f32.mrf.mxu1 }
 0x178   :  { %v8129_v26 = vadd.f32 %v7770_v27, %v666_v8 }
 0x179   :  { %v5825_v36 = vpop.f32.mrf.mxu0  ;;  %v5917_v59 = vpop.f32.mrf.mxu1 }
 0x17b   :  { %v8133_v41 = vpop.f32.mrf.mxu0  ;;  %v671_v25 = vpop.f32.mrf.mxu1  ;;  %6043 = vmatmul.mubr.msk.bf16.gmra.mxu0 %vm162_vm1, %v7347_v16  ;;  %6123 = vmatmul.mubr.msk.bf16.gmra.mxu1 %vm162_vm1, %v997_v50  ;;  %v998_v50 = vpack.c.bf16 %v420_v63, %v417_v57 }
 0x17c   :  { %6046 = vmatprep.mubr.msk.bf16.mxu0 %vm7182_vm0, %v10448_v1  ;;  %6126 = vmatprep.mubr.msk.bf16.mxu1 %vm7182_vm0, %v10448_v1  ;;  %v8144_v58 = vadd.f32 %v7770_v27, %v671_v25  ;;  %v10508_v25 = vmov 0.0  }
 0x17d   :  { %v5828_v59 = vpop.f32.mrf.mxu0  ;;  %v5920_v39 = vpop.f32.mrf.mxu1 }
 0x17e   :  { %10506 = vst [vmem:[#allocation6_spill] sm:$0xff] %v8144_v58 }
 0x17f   :  { %v443_v24 = vpop.f32.mrf.mxu0  ;;  %v674_v16 = vpop.f32.mrf.mxu1 }
 0x180   :  { %v8149_v8 = vadd.f32 %v7770_v27, %v674_v16 }
 0x181   :  { %v5829_v36 = vpop.f32.mrf.mxu0  ;;  %v5921_v30 = vpop.f32.mrf.mxu1 }
 0x182   :  { %10507 = vst [vmem:[#allocation7_spill] sm:$0xff] %v8149_v8  ;;  %v8164_v30 = vld [vmem:[%s10430_s6] ss:$0 sm:$0xff] }
 0x183   :  { %v679_v47 = vpop.f32.mrf.mxu1  ;;  %v782_v59 = vpop.f32.mrf.mxu0  ;;  %6047 = vmatmul.mubr.msk.bf16.gmra.mxu0 %vm162_vm1, %v7369_v21  ;;  %6127 = vmatmul.mubr.msk.bf16.gmra.mxu1 %vm162_vm1, %v998_v50  ;;  %v425_v21 = vadd.f32 %v7726_v15, %v8093_v40 }
 0x184   :  { %6130 = vmatprep.mubr.msk.bf16.mxu1 %vm7182_vm0, %v10508_v25  ;;  %6158 = vmatprep.mubr.msk.bf16.mxu0 %vm7182_vm0, %v10508_v25  ;;  %v8167_v57 = vadd.f32 %v7770_v27, %v679_v47  ;;  %v8172_v36 = vadd.f32 %v8164_v30, %v782_v59  ;;  %v10509_v59 = vpack.c.bf16 %v7787_v23, %v7782_v14 }
 0x185   :  { %v5924_v63 = vpop.f32.mrf.mxu1  ;;  %v5952_v39 = vpop.f32.mrf.mxu0  ;;  %v999_v58 = vpack.c.bf16 %v428_v48, %v425_v21  ;;  %v436_v48 = vadd.f32 %v7726_v15, %v435_v29 }
 0x187   :  { %v682_v16 = vpop.f32.mrf.mxu1  ;;  %v785_v50 = vpop.f32.mrf.mxu0 }
 0x188   :  { %v8175_v2 = vadd.f32 %v7770_v27, %v682_v16  ;;  %v8178_v1 = vadd.f32 %v8164_v30, %v785_v50 }
 0x189   :  { %v5925_v63 = vpop.f32.mrf.mxu1  ;;  %v5953_v39 = vpop.f32.mrf.mxu0 }
 0x18b   :  { %v687_v8 = vpop.f32.mrf.mxu1  ;;  %v790_v62 = vpop.f32.mrf.mxu0  ;;  %6131 = vmatmul.mubr.msk.bf16.gmra.mxu1 %vm162_vm1, %v999_v58  ;;  %6159 = vmatmul.mubr.msk.bf16.vlgmr.msra.gmra.mxu0 %vm162_vm1, %v10509_v59  ;;  %v433_v58 = vadd.f32 %v7726_v15, %v8113_v52 }
 0x18c   :  { %6134 = vmatprep.mubr.msk.bf16.mxu1 %vm7182_vm0, %v10508_v25  ;;  %6162 = vmatprep.mubr.msk.bf16.mxu0 %vm7182_vm0, %v10508_v25  ;;  %v8195_v50 = vadd.f32 %v7770_v27, %v687_v8  ;;  %v8200_v23 = vadd.f32 %v8164_v30, %v790_v62  ;;  %v10510_v62 = vpack.c.bf16 %v7806_v35, %v7802_v42 }
 0x18d   :  { %v5928_v21 = vpop.f32.mrf.mxu1  ;;  %v5956_v16 = vpop.f32.mrf.mxu0  ;;  %v1000_v29 = vpack.c.bf16 %v436_v48, %v433_v58  ;;  %v444_v48 = vadd.f32 %v7726_v15, %v443_v24 }
 0x18f   :  { %v690_v63 = vpop.f32.mrf.mxu1  ;;  %v793_v14 = vpop.f32.mrf.mxu0 }
 0x190   :  { %v8203_v39 = vadd.f32 %v7770_v27, %v690_v63  ;;  %v8206_v59 = vadd.f32 %v8164_v30, %v793_v14 }
 0x191   :  { %v5929_v21 = vpop.f32.mrf.mxu1  ;;  %v5957_v16 = vpop.f32.mrf.mxu0 }
 0x193   :  { %v695_v40 = vpop.f32.mrf.mxu1  ;;  %v798_v47 = vpop.f32.mrf.mxu0  ;;  %6135 = vmatmul.mubr.msk.bf16.gmra.mxu1 %vm162_vm1, %v1000_v29  ;;  %6163 = vmatmul.mubr.msk.bf16.gmra.mxu0 %vm162_vm1, %v10510_v62  ;;  %v441_v29 = vadd.f32 %v7726_v15, %v8133_v41 }
 0x194   :  { %6138 = vmatprep.mubr.msk.bf16.mxu1 %vm7182_vm0, %v10508_v25  ;;  %6166 = vmatprep.mubr.msk.bf16.mxu0 %vm7182_vm0, %v10508_v25  ;;  %v8223_v14 = vadd.f32 %v7770_v27, %v695_v40  ;;  %v8228_v35 = vadd.f32 %v8164_v30, %v798_v47  ;;  %v10511_v47 = vpack.c.bf16 %v7825_v38, %v7821_v3 }
 0x195   :  { %v5932_v58 = vpop.f32.mrf.mxu1  ;;  %v5960_v63 = vpop.f32.mrf.mxu0  ;;  %v1001_v24 = vpack.c.bf16 %v444_v48, %v441_v29 }
 0x197   :  { %v698_v21 = vpop.f32.mrf.mxu1  ;;  %v801_v42 = vpop.f32.mrf.mxu0 }
 0x198   :  { %v8231_v16 = vadd.f32 %v7770_v27, %v698_v21  ;;  %v8234_v62 = vadd.f32 %v8164_v30, %v801_v42 }
 0x199   :  { %v5933_v58 = vpop.f32.mrf.mxu1  ;;  %v5961_v63 = vpop.f32.mrf.mxu0 }
 0x19b   :  { %v703_v52 = vpop.f32.mrf.mxu1  ;;  %v806_v8 = vpop.f32.mrf.mxu0  ;;  %6139 = vmatmul.mubr.msk.bf16.gmra.mxu1 %vm162_vm1, %v1001_v24  ;;  %6167 = vmatmul.mubr.msk.bf16.gmra.mxu0 %vm162_vm1, %v10511_v47 }
 0x19c   :  { %6142 = vmatprep.mubr.msk.bf16.mxu1 %vm7182_vm0, %v10508_v25  ;;  %6170 = vmatprep.mubr.msk.bf16.mxu0 %vm7182_vm0, %v10508_v25  ;;  %v8250_v21 = vadd.f32 %v7770_v27, %v703_v52  ;;  %v8253_v24 = vadd.f32 %v8164_v30, %v806_v8  ;;  %v10512_v8 = vpack.c.bf16 %v7732_v20, %v7729_v32 }
 0x19d   :  { %v5936_v48 = vpop.f32.mrf.mxu1  ;;  %v5964_v29 = vpop.f32.mrf.mxu0 }
 0x19f   :  { %v706_v42 = vpop.f32.mrf.mxu1  ;;  %v809_v58 = vpop.f32.mrf.mxu0 }
 0x1a0   :  { %v8256_v3 = vadd.f32 %v7770_v27, %v706_v42  ;;  %v8259_v38 = vadd.f32 %v8164_v30, %v809_v58  ;;  %v10513_v42 = vpack.c.bf16 %v7848_v49, %v7840_v28 }
 0x1a1   :  { %v5937_v63 = vpop.f32.mrf.mxu1  ;;  %v5965_v47 = vpop.f32.mrf.mxu0 }
 0x1a3   :  { %v711_v29 = vpop.f32.mrf.mxu1  ;;  %v814_v41 = vpop.f32.mrf.mxu0  ;;  %6143 = vmatmul.mubr.msk.bf16.gmra.mxu1 %vm162_vm1, %v10512_v8  ;;  %6171 = vmatmul.mubr.msk.bf16.gmra.mxu0 %vm162_vm1, %v10513_v42 }
 0x1a4   :  { %6146 = vmatprep.mubr.msk.bf16.mxu1 %vm7182_vm0, %v10508_v25  ;;  %6174 = vmatprep.mubr.msk.bf16.mxu0 %vm7182_vm0, %v10508_v25  ;;  %v8278_v47 = vadd.f32 %v7770_v27, %v711_v29  ;;  %v8281_v20 = vadd.f32 %v8164_v30, %v814_v41  ;;  %v10516_v41 = vpack.c.bf16 %v7748_v51, %v7745_v46 }
 0x1a5   :  { %v5940_v58 = vpop.f32.mrf.mxu1  ;;  %v5968_v63 = vpop.f32.mrf.mxu0 }
 0x1a6   :  { %10514 = vst [vmem:[#allocation8_spill] sm:$0xff] %v8281_v20  ;;  %v10526_v58 = vpack.c.bf16 %v7929_v31, %v7924_v11  ;;  %v6926_v11 = vld [vmem:[%s10435_s11 + $0x10] sm:$0xff]  }
 0x1a7   :  { %v714_v52 = vpop.f32.mrf.mxu1  ;;  %v817_v32 = vpop.f32.mrf.mxu0 }
 0x1a8   :  { %v8284_v28 = vadd.f32 %v7770_v27, %v714_v52  ;;  %v8287_v49 = vadd.f32 %v8164_v30, %v817_v32  ;;  %v10517_v27 = vpack.c.bf16 %v7869_v18, %v7864_v6  ;;  %v465_v52 = vadd.f32 %v7726_v15, %v7752_v56  ;;  %v6921_v15 = vld [vmem:[%s10435_s11 + $0x38] sm:$0xff]  }
 0x1a9   :  { %v5941_v8 = vpop.f32.mrf.mxu1  ;;  %v5969_v42 = vpop.f32.mrf.mxu0  ;;  %6259 = vmatpush3.bf16.msra.mxu1 %v6921_v15 }
 0x1aa   :  { %10515 = vst [vmem:[#allocation9_spill] sm:$0xff] %v8287_v49  ;;  %v1004_v18 = vpack.c.bf16 %v465_v52, %v465_v52  ;;  %6260 = vmatprep.subr.bf16.mxu1 %v10508_v25 }
 0x1ab   :  { %v8293_v63 = vpop.f32.mrf.mxu1  ;;  %v822_v48 = vpop.f32.mrf.mxu0  ;;  %6147 = vmatmul.mubr.msk.bf16.gmra.mxu1 %vm162_vm1, %v10516_v41  ;;  %6175 = vmatmul.mubr.msk.bf16.gmra.mxu0 %vm162_vm1, %v10517_v27 }
 0x1ac   :  { %6150 = vmatprep.mubr.msk.bf16.mxu1 %vm7182_vm0, %v10508_v25  ;;  %6178 = vmatprep.mubr.msk.bf16.mxu0 %vm7182_vm0, %v10508_v25  ;;  %v8310_v51 = vadd.f32 %v8164_v30, %v822_v48  ;;  %v10520_v48 = vpack.c.bf16 %v7889_v53, %v7884_v43  ;;  %v6922_v43 = vld [vmem:[%s10435_s11 + $0x30] sm:$0xff]  }
 0x1ad   :  { %v5944_v32 = vpop.f32.mrf.mxu1  ;;  %v5972_v8 = vpop.f32.mrf.mxu0  ;;  %6261 = vmatpush3.bf16.msra.mxu1 %v6922_v43 }
 0x1ae   :  { %10518 = vst [vmem:[#allocation10_spill] sm:$0xff] %v8310_v51  ;;  %6262 = vmatprep.subr.bf16.mxu1 %v10508_v25 }
 0x1af   :  { %v722_v42 = vpop.f32.mrf.mxu1  ;;  %v825_v46 = vpop.f32.mrf.mxu0 }
 0x1b0   :  { %v8313_v6 = vadd.f32 %v8164_v30, %v825_v46 }
 0x1b1   :  { %v5945_v41 = vpop.f32.mrf.mxu1  ;;  %v5973_v27 = vpop.f32.mrf.mxu0 }
 0x1b2   :  { %10519 = vst [vmem:[#allocation11_spill] sm:$0xff] %v8313_v6 }
 0x1b3   :  { %v830_v56 = vpop.f32.mrf.mxu0  ;;  %v8320_v32 = vpop.f32.mrf.mxu1  ;;  %6151 = vmatmul.mubr.msk.bf16.gmra.mxu1 %vm162_vm1, %v1004_v18  ;;  %6179 = vmatmul.mubr.msk.bf16.gmra.mxu0 %vm162_vm1, %v10520_v48 }
 0x1b4   :  { %6182 = vmatprep.mubr.msk.bf16.mxu0 %vm7182_vm0, %v10508_v25  ;;  %6274 = vmatprep.mubr.msk.bf16.mxu1 %vm7182_vm0, %v10508_v25  ;;  %v8338_v53 = vadd.f32 %v8164_v30, %v830_v56  ;;  %v6923_v56 = vld [vmem:[%s10435_s11 + $0x28] sm:$0xff]  }
 0x1b5   :  { %v5976_v52 = vpop.f32.mrf.mxu0  ;;  %v6056_v8 = vpop.f32.mrf.mxu1  ;;  %6263 = vmatpush3.bf16.msra.mxu1 %v6923_v56 }
 0x1b6   :  { %10521 = vst [vmem:[#allocation12_spill] sm:$0xff] %v8338_v53  ;;  %v10523_v8 = vpack.c.bf16 %v7909_v33, %v7904_v60  ;;  %6264 = vmatprep.subr.bf16.mxu1 %v10508_v25  ;;  %v6924_v60 = vld [vmem:[%s10435_s11 + $0x20] sm:$0xff]  }
 0x1b7   :  { %v833_v42 = vpop.f32.mrf.mxu0  ;;  %v8332_v46 = vpop.f32.mrf.mxu1 }
 0x1b8   :  { %v8341_v18 = vadd.f32 %v8164_v30, %v833_v42 }
 0x1b9   :  { %v5977_v41 = vpop.f32.mrf.mxu0  ;;  %v6057_v27 = vpop.f32.mrf.mxu1  ;;  %6265 = vmatpush3.bf16.msra.mxu1 %v6924_v60 }
 0x1ba   :  { %10522 = vst [vmem:[#allocation13_spill] sm:$0xff] %v8341_v18  ;;  %6266 = vmatprep.subr.bf16.mxu1 %v10508_v25 }
 0x1bb   :  { %v838_v48 = vpop.f32.mrf.mxu0  ;;  %v8346_v52 = vpop.f32.mrf.mxu1  ;;  %6183 = vmatmul.mubr.msk.bf16.gmra.mxu0 %vm162_vm1, %v10523_v8 }
 0x1bc   :  { %6186 = vmatprep.mubr.msk.bf16.mxu0 %vm7182_vm0, %v10508_v25  ;;  %v8364_v33 = vadd.f32 %v8164_v30, %v838_v48  ;;  %v6925_v48 = vld [vmem:[%s10435_s11 + $0x18] sm:$0xff]  }
 0x1bd   :  { %v5980_v42 = vpop.f32.mrf.mxu0  ;;  %v6060_v43 = vpop.f32.mrf.mxu1  ;;  %6267 = vmatpush3.bf16.msra.mxu1 %v6925_v48 }
 0x1be   :  { %10524 = vst [vmem:[#allocation14_spill] sm:$0xff] %v8364_v33  ;;  %6268 = vmatprep.subr.bf16.mxu1 %v10508_v25  ;;  %v10529_v33 = vpack.c.bf16 %v7949_v55, %v7944_v5  ;;  %v6928_v5 = vld [vmem:[%s10435_s11] sm:$0xff]  }
 0x1bf   :  { %v841_v41 = vpop.f32.mrf.mxu0  ;;  %v8358_v27 = vpop.f32.mrf.mxu1 }
 0x1c0   :  { %v8367_v8 = vadd.f32 %v8164_v30, %v841_v41 }
 0x1c1   :  { %v5981_v15 = vpop.f32.mrf.mxu0  ;;  %v6061_v29 = vpop.f32.mrf.mxu1  ;;  %6269 = vmatpush3.bf16.msra.mxu1 %v6926_v11 }
 0x1c2   :  { %10525 = vst [vmem:[#allocation15_spill] sm:$0xff] %v8367_v8  ;;  %6270 = vmatprep.subr.bf16.mxu1 %v10508_v25 }
 0x1c3   :  { %v846_v42 = vpop.f32.mrf.mxu0  ;;  %v8372_v43 = vpop.f32.mrf.mxu1  ;;  %6187 = vmatmul.mubr.msk.bf16.gmra.mxu0 %vm162_vm1, %v10526_v58 }
 0x1c4   :  { %6190 = vmatprep.mubr.msk.bf16.mxu0 %vm7182_vm0, %v10508_v25  ;;  %v8390_v31 = vadd.f32 %v8164_v30, %v846_v42  ;;  %v6927_v42 = vld [vmem:[%s10435_s11 + $0x8] sm:$0xff]  }
 0x1c5   :  { %v5984_v29 = vpop.f32.mrf.mxu0  ;;  %v6064_v15 = vpop.f32.mrf.mxu1  ;;  %6271 = vmatpush3.bf16.msra.mxu1 %v6927_v42 }
 0x1c6   :  { %10527 = vst [vmem:[#allocation16_spill] sm:$0xff] %v8390_v31  ;;  %6272 = vmatprep.subr.bf16.mxu1 %v10508_v25 }
 0x1c7   :  { %v849_v41 = vpop.f32.mrf.mxu0  ;;  %v8384_v60 = vpop.f32.mrf.mxu1 }
 0x1c8   :  { %v8393_v58 = vadd.f32 %v8164_v30, %v849_v41 }
 0x1c9   :  { %v5985_v56 = vpop.f32.mrf.mxu0  ;;  %v6065_v40 = vpop.f32.mrf.mxu1  ;;  %6273 = vmatpush3.bf16.msra.mxu1 %v6928_v5 }
 0x1ca   :  { %10528 = vst [vmem:[#allocation17_spill] sm:$0xff] %v8393_v58  ;;  %6476 = vmatprep.subr.bf16.mxu1 %v10508_v25  ;;  %v10532_v58 = vpack.c.bf16 %v7969_v54, %v7964_v7 }
 0x1cb   :  { %v854_v29 = vpop.f32.mrf.mxu0  ;;  %v8398_v15 = vpop.f32.mrf.mxu1  ;;  %6191 = vmatmul.mubr.msk.bf16.gmra.mxu0 %vm162_vm1, %v10529_v33 }
 0x1cc   :  { %6194 = vmatprep.mubr.msk.bf16.mxu0 %vm7182_vm0, %v10508_v25  ;;  %v8416_v55 = vadd.f32 %v8164_v30, %v854_v29 }
 0x1cd   :  { %v5988_v40 = vpop.f32.mrf.mxu0  ;;  %v6068_v56 = vpop.f32.mrf.mxu1 }
 0x1ce   :  { %10530 = vst [vmem:[#allocation18_spill] sm:$0xff] %v8416_v55 }
 0x1cf   :  { %v857_v41 = vpop.f32.mrf.mxu0  ;;  %v8410_v11 = vpop.f32.mrf.mxu1 }
 0x1d0   :  { %v8419_v33 = vadd.f32 %v8164_v30, %v857_v41 }
 0x1d1   :  { %v5989_v48 = vpop.f32.mrf.mxu0  ;;  %v6069_v31 = vpop.f32.mrf.mxu1 }
 0x1d2   :  { %10531 = vst [vmem:[#allocation19_spill] sm:$0xff] %v8419_v33 }
 0x1d3   :  { %v862_v40 = vpop.f32.mrf.mxu0  ;;  %v8424_v56 = vpop.f32.mrf.mxu1  ;;  %6195 = vmatmul.mubr.msk.bf16.gmra.mxu0 %vm162_vm1, %v10532_v58 }
 0x1d4   :  { %6198 = vmatprep.mubr.msk.bf16.mxu0 %vm7182_vm0, %v10508_v25  ;;  %v8435_v5 = vadd.f32 %v8164_v30, %v862_v40 }
 0x1d5   :  { %v5992_v29 = vpop.f32.mrf.mxu0  ;;  %v6072_v48 = vpop.f32.mrf.mxu1 }
 0x1d6   :  { %10533 = vst [vmem:[#allocation20_spill] sm:$0xff] %v8435_v5  ;;  %v10535_v29 = vpack.c.bf16 %v7989_v61, %v7984_v45 }
 0x1d7   :  { %v865_v31 = vpop.f32.mrf.mxu0  ;;  %v8432_v41 = vpop.f32.mrf.mxu1 }
 0x1d8   :  { %v8438_v42 = vadd.f32 %v8164_v30, %v865_v31 }
 0x1d9   :  { %v5993_v55 = vpop.f32.mrf.mxu0  ;;  %v6073_v33 = vpop.f32.mrf.mxu1 }
 0x1da   :  { %10534 = vst [vmem:[#allocation21_spill] sm:$0xff] %v8438_v42 }
 0x1db   :  { %v870_v54 = vpop.f32.mrf.mxu0  ;;  %v8442_v58 = vpop.f32.mrf.mxu1  ;;  %6199 = vmatmul.mubr.msk.bf16.gmra.mxu0 %vm162_vm1, %v10535_v29 }
 0x1dc   :  { %6202 = vmatprep.mubr.msk.bf16.mxu0 %vm7182_vm0, %v10508_v25  ;;  %v8453_v55 = vadd.f32 %v8164_v30, %v870_v54 }
 0x1dd   :  { %v5996_v40 = vpop.f32.mrf.mxu0  ;;  %v6076_v48 = vpop.f32.mrf.mxu1 }
 0x1de   :  { %10536 = vst [vmem:[#allocation22_spill] sm:$0xff] %v8453_v55  ;;  %v10538_v40 = vpack.c.bf16 %v8009_v0, %v8004_v10 }
 0x1df   :  { %v873_v31 = vpop.f32.mrf.mxu0  ;;  %v8450_v8 = vpop.f32.mrf.mxu1 }
 0x1e0   :  { %v8456_v33 = vadd.f32 %v8164_v30, %v873_v31 }
 0x1e1   :  { %v5997_v7 = vpop.f32.mrf.mxu0  ;;  %v6077_v5 = vpop.f32.mrf.mxu1 }
 0x1e2   :  { %10537 = vst [vmem:[#allocation23_spill] sm:$0xff] %v8456_v33 }
 0x1e3   :  { %v878_v61 = vpop.f32.mrf.mxu0  ;;  %v8460_v29 = vpop.f32.mrf.mxu1  ;;  %6203 = vmatmul.mubr.msk.bf16.gmra.mxu0 %vm162_vm1, %v10538_v40 }
 0x1e4   :  { %6206 = vmatprep.mubr.msk.bf16.mxu0 %vm7182_vm0, %v10508_v25  ;;  %v8471_v5 = vadd.f32 %v8164_v30, %v878_v61 }
 0x1e5   :  { %v6000_v54 = vpop.f32.mrf.mxu0  ;;  %v6080_v48 = vpop.f32.mrf.mxu1 }
 0x1e6   :  { %10539 = vst [vmem:[#allocation24_spill] sm:$0xff] %v8471_v5  ;;  %v10541_v54 = vpack.c.bf16 %v8029_v4, %v8024_v37 }
 0x1e7   :  { %v881_v31 = vpop.f32.mrf.mxu0  ;;  %v8468_v42 = vpop.f32.mrf.mxu1 }
 0x1e8   :  { %v8474_v7 = vadd.f32 %v8164_v30, %v881_v31 }
 0x1e9   :  { %v6001_v45 = vpop.f32.mrf.mxu0  ;;  %v6081_v55 = vpop.f32.mrf.mxu1 }
 0x1ea   :  { %10540 = vst [vmem:[#allocation25_spill] sm:$0xff] %v8474_v7 }
 0x1eb   :  { %v886_v0 = vpop.f32.mrf.mxu0  ;;  %v8478_v40 = vpop.f32.mrf.mxu1  ;;  %6207 = vmatmul.mubr.msk.bf16.gmra.mxu0 %vm162_vm1, %v10541_v54 }
 0x1ec   :  { %6210 = vmatprep.mubr.msk.bf16.mxu0 %vm7182_vm0, %v10508_v25  ;;  %v8489_v55 = vadd.f32 %v8164_v30, %v886_v0 }
 0x1ed   :  { %v6004_v61 = vpop.f32.mrf.mxu0  ;;  %v6084_v48 = vpop.f32.mrf.mxu1 }
 0x1ee   :  { %10542 = vst [vmem:[#allocation26_spill] sm:$0xff] %v8489_v55  ;;  %v10544_v61 = vpack.c.bf16 %v8049_v9, %v8044_v13 }
 0x1ef   :  { %v889_v31 = vpop.f32.mrf.mxu0  ;;  %v8486_v33 = vpop.f32.mrf.mxu1 }
 0x1f0   :  { %v8492_v45 = vadd.f32 %v8164_v30, %v889_v31 }
 0x1f1   :  { %v6005_v10 = vpop.f32.mrf.mxu0  ;;  %v6085_v5 = vpop.f32.mrf.mxu1 }
 0x1f2   :  { %10543 = vst [vmem:[#allocation27_spill] sm:$0xff] %v8492_v45 }
 0x1f3   :  { %v894_v4 = vpop.f32.mrf.mxu0  ;;  %v8496_v54 = vpop.f32.mrf.mxu1  ;;  %6211 = vmatmul.mubr.msk.bf16.gmra.mxu0 %vm162_vm1, %v10544_v61 }
 0x1f4   :  { %6214 = vmatprep.mubr.msk.bf16.mxu0 %vm7182_vm0, %v10508_v25  ;;  %v8507_v5 = vadd.f32 %v8164_v30, %v894_v4 }
 0x1f5   :  { %v6008_v0 = vpop.f32.mrf.mxu0  ;;  %v6088_v48 = vpop.f32.mrf.mxu1 }
 0x1f6   :  { %10545 = vst [vmem:[#allocation28_spill] sm:$0xff] %v8507_v5  ;;  %v10547_v0 = vpack.c.bf16 %v8069_v12, %v8064_v19 }
 0x1f7   :  { %v897_v31 = vpop.f32.mrf.mxu0  ;;  %v8504_v7 = vpop.f32.mrf.mxu1 }
 0x1f8   :  { %v8510_v10 = vadd.f32 %v8164_v30, %v897_v31 }
 0x1f9   :  { %v6009_v37 = vpop.f32.mrf.mxu0  ;;  %v6089_v55 = vpop.f32.mrf.mxu1 }
 0x1fa   :  { %10546 = vst [vmem:[#allocation29_spill] sm:$0xff] %v8510_v10 }
 0x1fb   :  { %v902_v9 = vpop.f32.mrf.mxu0  ;;  %v8514_v61 = vpop.f32.mrf.mxu1  ;;  %6215 = vmatmul.mubr.msk.bf16.gmra.mxu0 %vm162_vm1, %v10547_v0 }
 0x1fc   :  { %6218 = vmatprep.mubr.msk.bf16.mxu0 %vm7182_vm0, %v10508_v25  ;;  %v8525_v55 = vadd.f32 %v8164_v30, %v902_v9 }
 0x1fd   :  { %v6012_v4 = vpop.f32.mrf.mxu0  ;;  %v6092_v48 = vpop.f32.mrf.mxu1 }
 0x1fe   :  { %10548 = vst [vmem:[#allocation30_spill] sm:$0xff] %v8525_v55  ;;  %v10550_v4 = vpack.c.bf16 %v8089_v17, %v8084_v34 }
 0x1ff   :  { %v905_v31 = vpop.f32.mrf.mxu0  ;;  %v8522_v45 = vpop.f32.mrf.mxu1 }
 0x200   :  { %v8528_v37 = vadd.f32 %v8164_v30, %v905_v31 }
 0x201   :  { %v6013_v13 = vpop.f32.mrf.mxu0  ;;  %v6093_v5 = vpop.f32.mrf.mxu1 }
 0x202   :  { %10549 = vst [vmem:[#allocation31_spill] sm:$0xff] %v8528_v37 }
 0x203   :  { %v910_v12 = vpop.f32.mrf.mxu0  ;;  %v8532_v0 = vpop.f32.mrf.mxu1  ;;  %6219 = vmatmul.mubr.msk.bf16.gmra.mxu0 %vm162_vm1, %v10550_v4 }
 0x204   :  { %6222 = vmatprep.mubr.msk.bf16.mxu0 %vm7182_vm0, %v10508_v25  ;;  %v8543_v5 = vadd.f32 %v8164_v30, %v910_v12 }
 0x205   :  { %v6016_v9 = vpop.f32.mrf.mxu0  ;;  %v6096_v48 = vpop.f32.mrf.mxu1 }
 0x206   :  { %10551 = vst [vmem:[#allocation32_spill] sm:$0xff] %v8543_v5  ;;  %v10553_v9 = vpack.c.bf16 %v8109_v22, %v8104_v44 }
 0x207   :  { %v913_v31 = vpop.f32.mrf.mxu0  ;;  %v8540_v10 = vpop.f32.mrf.mxu1 }
 0x208   :  { %v8546_v13 = vadd.f32 %v8164_v30, %v913_v31 }
 0x209   :  { %v6017_v19 = vpop.f32.mrf.mxu0  ;;  %v6097_v55 = vpop.f32.mrf.mxu1 }
 0x20a   :  { %10552 = vst [vmem:[#allocation33_spill] sm:$0xff] %v8546_v13 }
 0x20b   :  { %v918_v17 = vpop.f32.mrf.mxu0  ;;  %v8550_v4 = vpop.f32.mrf.mxu1  ;;  %6223 = vmatmul.mubr.msk.bf16.gmra.mxu0 %vm162_vm1, %v10553_v9 }
 0x20c   :  { %6226 = vmatprep.mubr.msk.bf16.mxu0 %vm7182_vm0, %v10508_v25  ;;  %v8561_v55 = vadd.f32 %v8164_v30, %v918_v17 }
 0x20d   :  { %v6020_v12 = vpop.f32.mrf.mxu0  ;;  %v6100_v48 = vpop.f32.mrf.mxu1 }
 0x20e   :  { %10554 = vst [vmem:[#allocation34_spill] sm:$0xff] %v8561_v55  ;;  %v10556_v12 = vld [vmem:[#allocation5_spill] sm:$0xff] }
 0x20f   :  { %v921_v31 = vpop.f32.mrf.mxu0  ;;  %v8558_v37 = vpop.f32.mrf.mxu1  ;;  %v10557_v48 = vpack.c.bf16 %v8129_v26, %v10556_v12 }
 0x210   :  { %v8564_v19 = vadd.f32 %v8164_v30, %v921_v31 }
 0x211   :  { %v6021_v34 = vpop.f32.mrf.mxu0  ;;  %v6101_v5 = vpop.f32.mrf.mxu1 }
 0x212   :  { %10555 = vst [vmem:[#allocation35_spill] sm:$0xff] %v8564_v19  ;;  %v10560_v19 = vld [vmem:[#allocation7_spill] sm:$0xff] }
 0x213   :  { %v926_v22 = vpop.f32.mrf.mxu0  ;;  %v8568_v9 = vpop.f32.mrf.mxu1  ;;  %6227 = vmatmul.mubr.msk.bf16.gmra.mxu0 %vm162_vm1, %v10557_v48 }
 0x214   :  { %6230 = vmatprep.mubr.msk.bf16.mxu0 %vm7182_vm0, %v10508_v25  ;;  %v8579_v5 = vadd.f32 %v8164_v30, %v926_v22 }
 0x215   :  { %v6024_v17 = vpop.f32.mrf.mxu0  ;;  %v6104_v13 = vpop.f32.mrf.mxu1 }
 0x216   :  { %10558 = vst [vmem:[#allocation5_spill] sm:$0xff] %v8579_v5  ;;  %v10561_v17 = vld [vmem:[#allocation6_spill] sm:$0xff] }
 0x217   :  { %v929_v31 = vpop.f32.mrf.mxu0  ;;  %v8576_v53 = vpop.f32.mrf.mxu1  ;;  %v10562_v13 = vpack.c.bf16 %v10560_v19, %v10561_v17 }
 0x218   :  { %v8582_v34 = vadd.f32 %v8164_v30, %v929_v31 }
 0x219   :  { %v6025_v44 = vpop.f32.mrf.mxu0  ;;  %v6105_v55 = vpop.f32.mrf.mxu1 }
 0x21a   :  { %10559 = vst [vmem:[#allocation36_spill] sm:$0xff] %v8582_v34 }
 0x21b   :  { %v934_v12 = vpop.f32.mrf.mxu0  ;;  %v8586_v48 = vpop.f32.mrf.mxu1  ;;  %6231 = vmatmul.mubr.msk.bf16.gmra.mxu0 %vm162_vm1, %v10562_v13 }
 0x21c   :  { %6234 = vmatprep.mubr.msk.bf16.mxu0 %vm7182_vm0, %v10508_v25  ;;  %v8597_v55 = vadd.f32 %v8164_v30, %v934_v12 }
 0x21d   :  { %v6028_v22 = vpop.f32.mrf.mxu0  ;;  %v6108_v18 = vpop.f32.mrf.mxu1 }
 0x21e   :  { %10563 = vst [vmem:[#allocation7_spill] sm:$0xff] %v8597_v55  ;;  %v10565_v18 = vpack.c.bf16 %v8175_v2, %v8167_v57 }
 0x21f   :  { %v937_v31 = vpop.f32.mrf.mxu0  ;;  %v8594_v51 = vpop.f32.mrf.mxu1 }
 0x220   :  { %v8600_v44 = vadd.f32 %v8164_v30, %v937_v31 }
 0x221   :  { %v6029_v26 = vpop.f32.mrf.mxu0  ;;  %v6109_v5 = vpop.f32.mrf.mxu1 }
 0x222   :  { %10564 = vst [vmem:[#allocation6_spill] sm:$0xff] %v8600_v44 }
 0x223   :  { %v942_v17 = vpop.f32.mrf.mxu0  ;;  %v8604_v13 = vpop.f32.mrf.mxu1  ;;  %6235 = vmatmul.mubr.msk.bf16.gmra.mxu0 %vm162_vm1, %v10565_v18 }
 0x224   :  { %6238 = vmatprep.mubr.msk.bf16.mxu0 %vm7182_vm0, %v10508_v25  ;;  %v8615_v5 = vadd.f32 %v8164_v30, %v942_v17 }
 0x225   :  { %v6032_v12 = vpop.f32.mrf.mxu0  ;;  %v6112_v22 = vpop.f32.mrf.mxu1 }
 0x226   :  { %10566 = vst [vmem:[#allocation37_spill] sm:$0xff] %v8615_v5  ;;  %v10568_v12 = vpack.c.bf16 %v8203_v39, %v8195_v50 }
 0x227   :  { %v945_v31 = vpop.f32.mrf.mxu0  ;;  %v8612_v34 = vpop.f32.mrf.mxu1 }
 0x228   :  { %v8618_v26 = vadd.f32 %v8164_v30, %v945_v31 }
 0x229   :  { %v6033_v19 = vpop.f32.mrf.mxu0  ;;  %v6113_v55 = vpop.f32.mrf.mxu1 }
 0x22a   :  { %10567 = vst [vmem:[#allocation38_spill] sm:$0xff] %v8618_v26 }
 0x22b   :  { %v950_v2 = vpop.f32.mrf.mxu0  ;;  %v8622_v18 = vpop.f32.mrf.mxu1  ;;  %6239 = vmatmul.mubr.msk.bf16.gmra.mxu0 %vm162_vm1, %v10568_v12 }
 0x22c   :  { %6242 = vmatprep.mubr.msk.bf16.mxu0 %vm7182_vm0, %v10508_v25  ;;  %v8633_v55 = vadd.f32 %v8164_v30, %v950_v2 }
 0x22d   :  { %v6036_v17 = vpop.f32.mrf.mxu0  ;;  %v6116_v22 = vpop.f32.mrf.mxu1 }
 0x22e   :  { %10569 = vst [vmem:[#allocation39_spill] sm:$0xff] %v8633_v55  ;;  %v10571_v17 = vpack.c.bf16 %v8231_v16, %v8223_v14 }
 0x22f   :  { %v953_v31 = vpop.f32.mrf.mxu0  ;;  %v8630_v44 = vpop.f32.mrf.mxu1 }
 0x230   :  { %v8636_v19 = vadd.f32 %v8164_v30, %v953_v31 }
 0x231   :  { %v6037_v57 = vpop.f32.mrf.mxu0  ;;  %v6117_v5 = vpop.f32.mrf.mxu1 }
 0x232   :  { %10570 = vst [vmem:[#allocation40_spill] sm:$0xff] %v8636_v19 }
 0x233   :  { %v958_v39 = vpop.f32.mrf.mxu0  ;;  %v8640_v12 = vpop.f32.mrf.mxu1  ;;  %6243 = vmatmul.mubr.msk.bf16.gmra.mxu0 %vm162_vm1, %v10571_v17 }
 0x234   :  { %6246 = vmatprep.mubr.msk.bf16.mxu0 %vm7182_vm0, %v10508_v25  ;;  %v8651_v5 = vadd.f32 %v8164_v30, %v958_v39 }
 0x235   :  { %v6040_v2 = vpop.f32.mrf.mxu0  ;;  %v6120_v22 = vpop.f32.mrf.mxu1 }
 0x236   :  { %10572 = vst [vmem:[#allocation41_spill] sm:$0xff] %v8651_v5  ;;  %v10574_v2 = vpack.c.bf16 %v8256_v3, %v8250_v21 }
 0x237   :  { %v961_v31 = vpop.f32.mrf.mxu0  ;;  %v8648_v26 = vpop.f32.mrf.mxu1 }
 0x238   :  { %v8654_v57 = vadd.f32 %v8164_v30, %v961_v31 }
 0x239   :  { %v6041_v50 = vpop.f32.mrf.mxu0  ;;  %v6121_v55 = vpop.f32.mrf.mxu1 }
 0x23a   :  { %10573 = vst [vmem:[#allocation42_spill] sm:$0xff] %v8654_v57 }
 0x23b   :  { %v966_v16 = vpop.f32.mrf.mxu0  ;;  %v8658_v17 = vpop.f32.mrf.mxu1  ;;  %6247 = vmatmul.mubr.msk.bf16.gmra.mxu0 %vm162_vm1, %v10574_v2 }
 0x23c   :  { %6250 = vmatprep.mubr.msk.bf16.mxu0 %vm7182_vm0, %v10508_v25  ;;  %v8669_v55 = vadd.f32 %v8164_v30, %v966_v16 }
 0x23d   :  { %v6044_v39 = vpop.f32.mrf.mxu0  ;;  %v6124_v22 = vpop.f32.mrf.mxu1 }
 0x23e   :  { %10575 = vst [vmem:[#allocation43_spill] sm:$0xff] %v8669_v55  ;;  %v10578_v39 = vpack.c.bf16 %v8284_v28, %v8278_v47 }
 0x23f   :  { %v969_v31 = vpop.f32.mrf.mxu0  ;;  %v8666_v19 = vpop.f32.mrf.mxu1 }
 0x240   :  { %v8672_v50 = vadd.f32 %v8164_v30, %v969_v31  ;;  %v7155_v30 = vld [vmem:[%s10429_s5] ss:$0 sm:$0xff] }
 0x241   :  { %v6045_v14 = vpop.f32.mrf.mxu0  ;;  %v6125_v5 = vpop.f32.mrf.mxu1 }
 0x242   :  { %10576 = vst [vmem:[#allocation44_spill] sm:$0xff] %v8672_v50  ;;  %v720_v5 = vadd.f32 %v7155_v30, %v8293_v63 }
 0x243   :  { %v8676_v3 = vpop.f32.mrf.mxu0  ;;  %v8678_v2 = vpop.f32.mrf.mxu1  ;;  %6251 = vmatmul.mubr.msk.bf16.gmra.mxu0 %vm162_vm1, %v10578_v39 }
 0x244   :  { %10577 = vst [vmem:[#allocation45_spill] sm:$0xff] %v8676_v3  ;;  %6254 = vmatprep.mubr.msk.bf16.mxu0 %vm7182_vm0, %v10508_v25  ;;  %v1352_v21 = vpack.c.bf16 %v720_v5, %v720_v5 }
 0x245   :  { %v6048_v14 = vpop.f32.mrf.mxu0  ;;  %v6128_v16 = vpop.f32.mrf.mxu1 }
 0x247   :  { %v977_v22 = vpop.f32.mrf.mxu0  ;;  %v8690_v31 = vpop.f32.mrf.mxu1 }
 0x249   :  { %v6049_v3 = vpop.f32.mrf.mxu0  ;;  %v6129_v55 = vpop.f32.mrf.mxu1 }
 0x24b   :  { %v8692_v47 = vpop.f32.mrf.mxu1  ;;  %v1478_v28 = vpop.f32.mrf.mxu0  ;;  %6255 = vmatmul.mubr.msk.bf16.gmra.mxu0 %vm162_vm1, %v1352_v21 }
 0x24c   :  { %6376 = vmatprep.mubr.msk.bf16.mxu0 %vm7182_vm0, %v10508_v25  ;;  %v1676_v30 = vmul.f32 %v1478_v28, %v8320_v32 }
 0x24d   :  { %v6132_v39 = vpop.f32.mrf.mxu1  ;;  %v6160_v50 = vpop.f32.mrf.mxu0 }
 0x24f   :  { %v8697_v57 = vpop.f32.mrf.mxu1  ;;  %v1481_v63 = vpop.f32.mrf.mxu0 }
 0x250   :  { %v1677_v14 = vmul.f32 %v1481_v63, %v8332_v46 }
 0x251   :  { %v6133_v5 = vpop.f32.mrf.mxu1  ;;  %v6161_v3 = vpop.f32.mrf.mxu0 }
 0x252   :  { %v1725_v55 = vpack.c.bf16 %v1677_v14, %v1676_v30 }
 0x253   :  { %v8701_v16 = vpop.f32.mrf.mxu1  ;;  %v1486_v22 = vpop.f32.mrf.mxu0 }
 0x254   :  { %6275 = vmatmul.mubr.bf16.vlgmr.msra.gmra.mxu1 %v1725_v55  ;;  %v1678_v20 = vmul.f32 %v1486_v22, %v8346_v52 }
 0x255   :  { %v6136_v21 = vpop.f32.mrf.mxu1  ;;  %v6164_v6 = vpop.f32.mrf.mxu0  ;;  %6278 = vmatprep.mubr.msk.bf16.mxu1 %vm7182_vm0, %v10508_v25 }
 0x257   :  { %v8705_v50 = vpop.f32.mrf.mxu1  ;;  %v1489_v39 = vpop.f32.mrf.mxu0 }
 0x258   :  { %v1679_v32 = vmul.f32 %v1489_v39, %v8358_v27 }
 0x259   :  { %v6137_v46 = vpop.f32.mrf.mxu1  ;;  %v6165_v28 = vpop.f32.mrf.mxu0 }
 0x25a   :  { %v1726_v63 = vpack.c.bf16 %v1679_v32, %v1678_v20 }
 0x25b   :  { %v8709_v30 = vpop.f32.mrf.mxu1  ;;  %v1494_v14 = vpop.f32.mrf.mxu0 }
 0x25c   :  { %6279 = vmatmul.mubr.bf16.gmra.mxu1 %v1726_v63  ;;  %v1680_v21 = vmul.f32 %v1494_v14, %v8372_v43 }
 0x25d   :  { %v6140_v5 = vpop.f32.mrf.mxu1  ;;  %v6168_v3 = vpop.f32.mrf.mxu0  ;;  %6282 = vmatprep.mubr.msk.bf16.mxu1 %vm7182_vm0, %v10508_v25 }
 0x25f   :  { %v8713_v6 = vpop.f32.mrf.mxu1  ;;  %v1497_v55 = vpop.f32.mrf.mxu0 }
 0x260   :  { %v1681_v52 = vmul.f32 %v1497_v55, %v8384_v60 }
 0x261   :  { %v6141_v27 = vpop.f32.mrf.mxu1  ;;  %v6169_v22 = vpop.f32.mrf.mxu0 }
 0x262   :  { %v1727_v39 = vpack.c.bf16 %v1681_v52, %v1680_v21 }
 0x263   :  { %v8717_v20 = vpop.f32.mrf.mxu1  ;;  %v1502_v32 = vpop.f32.mrf.mxu0 }
 0x264   :  { %6283 = vmatmul.mubr.bf16.gmra.mxu1 %v1727_v39  ;;  %v1682_v3 = vmul.f32 %v1502_v32, %v8398_v15 }
 0x265   :  { %v6144_v46 = vpop.f32.mrf.mxu1  ;;  %v6172_v28 = vpop.f32.mrf.mxu0  ;;  %6286 = vmatprep.mubr.msk.bf16.mxu1 %vm7182_vm0, %v10508_v25 }
 0x267   :  { %v8721_v63 = vpop.f32.mrf.mxu1  ;;  %v1505_v5 = vpop.f32.mrf.mxu0 }
 0x268   :  { %v1683_v43 = vmul.f32 %v1505_v5, %v8410_v11 }
 0x269   :  { %v6145_v60 = vpop.f32.mrf.mxu1  ;;  %v6173_v14 = vpop.f32.mrf.mxu0 }
 0x26a   :  { %v1728_v55 = vpack.c.bf16 %v1683_v43, %v1682_v3 }
 0x26b   :  { %v8725_v21 = vpop.f32.mrf.mxu1  ;;  %v1510_v52 = vpop.f32.mrf.mxu0 }
 0x26c   :  { %6287 = vmatmul.mubr.bf16.gmra.mxu1 %v1728_v55  ;;  %v1684_v28 = vmul.f32 %v1510_v52, %v8424_v56 }
 0x26d   :  { %v6148_v27 = vpop.f32.mrf.mxu1  ;;  %v6176_v22 = vpop.f32.mrf.mxu0  ;;  %6290 = vmatprep.mubr.msk.bf16.mxu1 %vm7182_vm0, %v10508_v25 }
 0x26f   :  { %v8729_v39 = vpop.f32.mrf.mxu1  ;;  %v1513_v46 = vpop.f32.mrf.mxu0 }
 0x270   :  { %v1685_v15 = vmul.f32 %v1513_v46, %v8432_v41 }
 0x271   :  { %v6149_v11 = vpop.f32.mrf.mxu1  ;;  %v6177_v32 = vpop.f32.mrf.mxu0 }
 0x272   :  { %v1729_v5 = vpack.c.bf16 %v1685_v15, %v1684_v28 }
 0x273   :  { %v8733_v3 = vpop.f32.mrf.mxu1  ;;  %v1518_v43 = vpop.f32.mrf.mxu0 }
 0x274   :  { %6291 = vmatmul.mubr.bf16.gmra.mxu1 %v1729_v5  ;;  %v1686_v22 = vmul.f32 %v1518_v43, %v8442_v58 }
 0x275   :  { %v6152_v60 = vpop.f32.mrf.mxu1  ;;  %v6180_v14 = vpop.f32.mrf.mxu0  ;;  %6294 = vmatprep.mubr.msk.bf16.mxu1 %vm7182_vm0, %v10508_v25 }
 0x277   :  { %v1325_v55 = vpop.f32.mrf.mxu1  ;;  %v1521_v27 = vpop.f32.mrf.mxu0 }
 0x278   :  { %v1687_v56 = vmul.f32 %v1521_v27, %v8450_v8 }
 0x279   :  { %v6153_v52 = vpop.f32.mrf.mxu1  ;;  %v6181_v41 = vpop.f32.mrf.mxu0 }
 0x27a   :  { %v1730_v46 = vpack.c.bf16 %v1687_v56, %v1686_v22 }
 0x27b   :  { %v1526_v11 = vpop.f32.mrf.mxu0 }
 0x27c   :  { %6295 = vmatmul.mubr.bf16.gmra.mxu1 %v1730_v46  ;;  %v1688_v32 = vmul.f32 %v1526_v11, %v8460_v29 }
 0x27d   :  { %v6184_v28 = vpop.f32.mrf.mxu0  ;;  %6298 = vmatprep.mubr.msk.bf16.mxu1 %vm7182_vm0, %v10508_v25 }
 0x27f   :  { %v1529_v15 = vpop.f32.mrf.mxu0 }
 0x280   :  { %v1689_v5 = vmul.f32 %v1529_v15, %v8468_v42 }
 0x281   :  { %v6185_v60 = vpop.f32.mrf.mxu0 }
 0x282   :  { %v1731_v14 = vpack.c.bf16 %v1689_v5, %v1688_v32 }
 0x283   :  { %v1534_v55 = vpop.f32.mrf.mxu0 }
 0x284   :  { %6299 = vmatmul.mubr.bf16.gmra.mxu1 %v1731_v14  ;;  %v1690_v43 = vmul.f32 %v1534_v55, %v8478_v40 }
 0x285   :  { %v6188_v58 = vpop.f32.mrf.mxu0  ;;  %6302 = vmatprep.mubr.msk.bf16.mxu1 %vm7182_vm0, %v10508_v25 }
 0x287   :  { %v1537_v8 = vpop.f32.mrf.mxu0 }
 0x288   :  { %v1691_v27 = vmul.f32 %v1537_v8, %v8486_v33 }
 0x289   :  { %v6189_v22 = vpop.f32.mrf.mxu0 }
 0x28a   :  { %v1732_v56 = vpack.c.bf16 %v1691_v27, %v1690_v43 }
 0x28b   :  { %v1542_v52 = vpop.f32.mrf.mxu0 }
 0x28c   :  { %6303 = vmatmul.mubr.bf16.gmra.mxu1 %v1732_v56  ;;  %v1692_v41 = vmul.f32 %v1542_v52, %v8496_v54 }
 0x28d   :  { %v6192_v29 = vpop.f32.mrf.mxu0  ;;  %6306 = vmatprep.mubr.msk.bf16.mxu1 %vm7182_vm0, %v10508_v25 }
 0x28f   :  { %v1545_v42 = vpop.f32.mrf.mxu0 }
 0x290   :  { %v1693_v46 = vmul.f32 %v1545_v42, %v8504_v7 }
 0x291   :  { %v6193_v11 = vpop.f32.mrf.mxu0 }
 0x292   :  { %v1733_v28 = vpack.c.bf16 %v1693_v46, %v1692_v41 }
 0x293   :  { %v1550_v15 = vpop.f32.mrf.mxu0 }
 0x294   :  { %6307 = vmatmul.mubr.bf16.gmra.mxu1 %v1733_v28  ;;  %v1694_v32 = vmul.f32 %v1550_v15, %v8514_v61 }
 0x295   :  { %v6196_v40 = vpop.f32.mrf.mxu0  ;;  %6310 = vmatprep.mubr.msk.bf16.mxu1 %vm7182_vm0, %v10508_v25 }
 0x297   :  { %v1553_v33 = vpop.f32.mrf.mxu0 }
 0x298   :  { %v1695_v5 = vmul.f32 %v1553_v33, %v8522_v45 }
 0x299   :  { %v6197_v60 = vpop.f32.mrf.mxu0 }
 0x29a   :  { %v1734_v14 = vpack.c.bf16 %v1695_v5, %v1694_v32 }
 0x29b   :  { %v1558_v55 = vpop.f32.mrf.mxu0 }
 0x29c   :  { %6311 = vmatmul.mubr.bf16.gmra.mxu1 %v1734_v14  ;;  %v1696_v58 = vmul.f32 %v1558_v55, %v8532_v0 }
 0x29d   :  { %v6200_v54 = vpop.f32.mrf.mxu0  ;;  %6314 = vmatprep.mubr.msk.bf16.mxu1 %vm7182_vm0, %v10508_v25 }
 0x29f   :  { %v1561_v7 = vpop.f32.mrf.mxu0 }
 0x2a0   :  { %v1697_v8 = vmul.f32 %v1561_v7, %v8540_v10 }
 0x2a1   :  { %v6201_v43 = vpop.f32.mrf.mxu0 }
 0x2a2   :  { %v1735_v27 = vpack.c.bf16 %v1697_v8, %v1696_v58 }
 0x2a3   :  { %v1566_v22 = vpop.f32.mrf.mxu0 }
 0x2a4   :  { %6315 = vmatmul.mubr.bf16.gmra.mxu1 %v1735_v27  ;;  %v1698_v56 = vmul.f32 %v1566_v22, %v8550_v4 }
 0x2a5   :  { %v6204_v61 = vpop.f32.mrf.mxu0  ;;  %6318 = vmatprep.mubr.msk.bf16.mxu1 %vm7182_vm0, %v10508_v25 }
 0x2a7   :  { %v1569_v45 = vpop.f32.mrf.mxu0 }
 0x2a8   :  { %v1699_v52 = vmul.f32 %v1569_v45, %v8558_v37 }
 0x2a9   :  { %v6205_v29 = vpop.f32.mrf.mxu0 }
 0x2aa   :  { %v1736_v42 = vpack.c.bf16 %v1699_v52, %v1698_v56 }
 0x2ab   :  { %v1574_v41 = vpop.f32.mrf.mxu0 }
 0x2ac   :  { %6319 = vmatmul.mubr.bf16.gmra.mxu1 %v1736_v42  ;;  %v1700_v46 = vmul.f32 %v1574_v41, %v8568_v9 }
 0x2ad   :  { %v6208_v0 = vpop.f32.mrf.mxu0  ;;  %6322 = vmatprep.mubr.msk.bf16.mxu1 %vm7182_vm0, %v10508_v25 }
 0x2af   :  { %v1577_v10 = vpop.f32.mrf.mxu0 }
 0x2b0   :  { %v1701_v11 = vmul.f32 %v1577_v10, %v8576_v53 }
 0x2b1   :  { %v6209_v28 = vpop.f32.mrf.mxu0 }
 0x2b2   :  { %v1737_v15 = vpack.c.bf16 %v1701_v11, %v1700_v46 }
 0x2b3   :  { %v1582_v40 = vpop.f32.mrf.mxu0 }
 0x2b4   :  { %6323 = vmatmul.mubr.bf16.gmra.mxu1 %v1737_v15  ;;  %v1702_v33 = vmul.f32 %v1582_v40, %v8586_v48 }
 0x2b5   :  { %v6212_v4 = vpop.f32.mrf.mxu0  ;;  %6326 = vmatprep.mubr.msk.bf16.mxu1 %vm7182_vm0, %v10508_v25 }
 0x2b7   :  { %v1585_v37 = vpop.f32.mrf.mxu0 }
 0x2b8   :  { %v1703_v32 = vmul.f32 %v1585_v37, %v8594_v51 }
 0x2b9   :  { %v6213_v5 = vpop.f32.mrf.mxu0 }
 0x2ba   :  { %v1738_v60 = vpack.c.bf16 %v1703_v32, %v1702_v33 }
 0x2bb   :  { %v1590_v14 = vpop.f32.mrf.mxu0 }
 0x2bc   :  { %6327 = vmatmul.mubr.bf16.gmra.mxu1 %v1738_v60  ;;  %v1704_v55 = vmul.f32 %v1590_v14, %v8604_v13 }
 0x2bd   :  { %v6216_v9 = vpop.f32.mrf.mxu0  ;;  %6330 = vmatprep.mubr.msk.bf16.mxu1 %vm7182_vm0, %v10508_v25 }
 0x2bf   :  { %v1593_v53 = vpop.f32.mrf.mxu0 }
 0x2c0   :  { %v1705_v54 = vmul.f32 %v1593_v53, %v8612_v34 }
 0x2c1   :  { %v6217_v7 = vpop.f32.mrf.mxu0 }
 0x2c2   :  { %v1739_v58 = vpack.c.bf16 %v1705_v54, %v1704_v55 }
 0x2c3   :  { %v1598_v8 = vpop.f32.mrf.mxu0 }
 0x2c4   :  { %6331 = vmatmul.mubr.bf16.gmra.mxu1 %v1739_v58  ;;  %v1706_v43 = vmul.f32 %v1598_v8, %v8622_v18 }
 0x2c5   :  { %v6220_v48 = vpop.f32.mrf.mxu0  ;;  %6334 = vmatprep.mubr.msk.bf16.mxu1 %vm7182_vm0, %v10508_v25 }
 0x2c7   :  { %v1601_v51 = vpop.f32.mrf.mxu0 }
 0x2c8   :  { %v1707_v27 = vmul.f32 %v1601_v51, %v8630_v44 }
 0x2c9   :  { %v6221_v22 = vpop.f32.mrf.mxu0 }
 0x2ca   :  { %v1740_v61 = vpack.c.bf16 %v1707_v27, %v1706_v43 }
 0x2cb   :  { %v1606_v45 = vpop.f32.mrf.mxu0 }
 0x2cc   :  { %6335 = vmatmul.mubr.bf16.gmra.mxu1 %v1740_v61  ;;  %v1708_v56 = vmul.f32 %v1606_v45, %v8640_v12 }
 0x2cd   :  { %v6224_v13 = vpop.f32.mrf.mxu0  ;;  %6338 = vmatprep.mubr.msk.bf16.mxu1 %vm7182_vm0, %v10508_v25 }
 0x2cf   :  { %v1609_v34 = vpop.f32.mrf.mxu0 }
 0x2d0   :  { %v1709_v52 = vmul.f32 %v1609_v34, %v8648_v26 }
 0x2d1   :  { %v6225_v29 = vpop.f32.mrf.mxu0 }
 0x2d2   :  { %v1741_v42 = vpack.c.bf16 %v1709_v52, %v1708_v56 }
 0x2d3   :  { %v1614_v41 = vpop.f32.mrf.mxu0 }
 0x2d4   :  { %6339 = vmatmul.mubr.bf16.gmra.mxu1 %v1741_v42  ;;  %v1710_v0 = vmul.f32 %v1614_v41, %v8658_v17 }
 0x2d5   :  { %v6228_v18 = vpop.f32.mrf.mxu0  ;;  %6342 = vmatprep.mubr.msk.bf16.mxu1 %vm7182_vm0, %v10508_v25 }
 0x2d7   :  { %v1617_v44 = vpop.f32.mrf.mxu0 }
 0x2d8   :  { %v1711_v10 = vmul.f32 %v1617_v44, %v8666_v19 }
 0x2d9   :  { %v6229_v46 = vpop.f32.mrf.mxu0 }
 0x2da   :  { %v1742_v11 = vpack.c.bf16 %v1711_v10, %v1710_v0 }
 0x2db   :  { %v1622_v28 = vpop.f32.mrf.mxu0 }
 0x2dc   :  { %6343 = vmatmul.mubr.bf16.gmra.mxu1 %v1742_v11  ;;  %v1712_v15 = vmul.f32 %v1622_v28, %v8678_v2 }
 0x2dd   :  { %v6232_v12 = vpop.f32.mrf.mxu0  ;;  %6346 = vmatprep.mubr.msk.bf16.mxu1 %vm7182_vm0, %v10508_v25 }
 0x2df   :  { %v1625_v26 = vpop.f32.mrf.mxu0 }
 0x2e0   :  { %v1713_v40 = vmul.f32 %v1625_v26, %v8690_v31 }
 0x2e1   :  { %v6233_v4 = vpop.f32.mrf.mxu0 }
 0x2e2   :  { %v1743_v37 = vpack.c.bf16 %v1713_v40, %v1712_v15 }
 0x2e3   :  { %v1630_v33 = vpop.f32.mrf.mxu0 }
 0x2e4   :  { %6347 = vmatmul.mubr.bf16.gmra.mxu1 %v1743_v37  ;;  %v1714_v32 = vmul.f32 %v1630_v33, %v8692_v47 }
 0x2e5   :  { %v6236_v17 = vpop.f32.mrf.mxu0  ;;  %6350 = vmatprep.mubr.msk.bf16.mxu1 %vm7182_vm0, %v10508_v25 }
 0x2e7   :  { %v1633_v19 = vpop.f32.mrf.mxu0 }
 0x2e8   :  { %v1715_v5 = vmul.f32 %v1633_v19, %v8697_v57 }
 0x2e9   :  { %v6237_v60 = vpop.f32.mrf.mxu0 }
 0x2ea   :  { %v1744_v14 = vpack.c.bf16 %v1715_v5, %v1714_v32 }
 0x2eb   :  { %v1638_v9 = vpop.f32.mrf.mxu0 }
 0x2ec   :  { %6351 = vmatmul.mubr.bf16.gmra.mxu1 %v1744_v14  ;;  %v1716_v53 = vmul.f32 %v1638_v9, %v8701_v16 }
 0x2ed   :  { %v6240_v2 = vpop.f32.mrf.mxu0  ;;  %6354 = vmatprep.mubr.msk.bf16.mxu1 %vm7182_vm0, %v10508_v25 }
 0x2ef   :  { %v1641_v31 = vpop.f32.mrf.mxu0 }
 0x2f0   :  { %v1717_v55 = vmul.f32 %v1641_v31, %v8705_v50 }
 0x2f1   :  { %v6241_v54 = vpop.f32.mrf.mxu0 }
 0x2f2   :  { %v1745_v7 = vpack.c.bf16 %v1717_v55, %v1716_v53 }
 0x2f3   :  { %v1646_v58 = vpop.f32.mrf.mxu0 }
 0x2f4   :  { %6355 = vmatmul.mubr.bf16.gmra.mxu1 %v1745_v7  ;;  %v1718_v8 = vmul.f32 %v1646_v58, %v8709_v30 }
 0x2f5   :  { %v6244_v47 = vpop.f32.mrf.mxu0  ;;  %6358 = vmatprep.mubr.msk.bf16.mxu1 %vm7182_vm0, %v10508_v25 }
 0x2f7   :  { %v1649_v57 = vpop.f32.mrf.mxu0 }
 0x2f8   :  { %v1719_v48 = vmul.f32 %v1649_v57, %v8713_v6 }
 0x2f9   :  { %v6245_v51 = vpop.f32.mrf.mxu0 }
 0x2fa   :  { %v1746_v43 = vpack.c.bf16 %v1719_v48, %v1718_v8 }
 0x2fb   :  { %v1654_v27 = vpop.f32.mrf.mxu0 }
 0x2fc   :  { %6359 = vmatmul.mubr.bf16.gmra.mxu1 %v1746_v43  ;;  %v1720_v22 = vmul.f32 %v1654_v27, %v8717_v20 }
 0x2fd   :  { %v6248_v16 = vpop.f32.mrf.mxu0  ;;  %6362 = vmatprep.mubr.msk.bf16.mxu1 %vm7182_vm0, %v10508_v25 }
 0x2ff   :  { %v1657_v50 = vpop.f32.mrf.mxu0 }
 0x300   :  { %v1721_v61 = vmul.f32 %v1657_v50, %v8721_v63 }
 0x301   :  { %v6249_v45 = vpop.f32.mrf.mxu0 }
 0x302   :  { %v1747_v13 = vpack.c.bf16 %v1721_v61, %v1720_v22 }
 0x303   :  { %v1662_v34 = vpop.f32.mrf.mxu0 }
 0x304   :  { %6363 = vmatmul.mubr.bf16.gmra.mxu1 %v1747_v13  ;;  %v1722_v56 = vmul.f32 %v1662_v34, %v8725_v21 }
 0x305   :  { %v6252_v30 = vpop.f32.mrf.mxu0  ;;  %6366 = vmatprep.mubr.msk.bf16.mxu1 %vm7182_vm0, %v10508_v25 }
 0x307   :  { %v1665_v6 = vpop.f32.mrf.mxu0 }
 0x308   :  { %v1723_v52 = vmul.f32 %v1665_v6, %v8729_v39  ;;  %v6929_v39 = vld [vmem:[%s10436_s12] sm:$0xff]  }
 0x309   :  { %v6253_v29 = vpop.f32.mrf.mxu0  ;;  %6375 = vmatpush3.bf16.msra.mxu0 %v6929_v39 }
 0x30a   :  { %v1748_v42 = vpack.c.bf16 %v1723_v52, %v1722_v56  ;;  %6578 = vmatprep.subr.bf16.mxu0 %v10508_v25 }
 0x30b   :  { %v1670_v41 = vpop.f32.mrf.mxu0 }
 0x30c   :  { %6367 = vmatmul.mubr.bf16.gmra.mxu1 %v1748_v42  ;;  %v1724_v63 = vmul.f32 %v1670_v41, %v8733_v3 }
 0x30d   :  { %v6256_v20 = vpop.f32.mrf.mxu0  ;;  %6370 = vmatprep.mubr.msk.bf16.mxu1 %vm7182_vm0, %v10508_v25 }
 0x30e   :  { %v1749_v0 = vpack.c.bf16 %v1724_v63, %v1724_v63 }
 0x30f   :  { %v1673_v18 = vpop.f32.mrf.mxu0 }
 0x311   :  { %v6257_v44 = vpop.f32.mrf.mxu0 }
 0x314   :  { %v1848_v10 = vpop.f32.mrf.mxu1  ;;  %6371 = vmatmul.mubr.bf16.gmra.mxu1 %v1749_v0 }
 0x315   :  { %v8814_v46 = vmul.f32 0.35355338, %v1848_v10  ;;  %6478 = vmatprep.mubr.msk.bf16.mxu1 %vm7182_vm0, %v10508_v25 }
 0x316   :  { %v6276_v21 = vpop.f32.mrf.mxu1 }
 0x317   :  { %v2096_v11 = vsel %vm2095_vm2, %v8814_v46, -inf }
 0x318   :  { %2097 = vmax.xlane.f32.xlu0 %v2096_v11  ;;  %v1851_v3 = vpop.f32.mrf.mxu1 }
 0x319   :  { %v8823_v28 = vmul.f32 0.35355338, %v1851_v3 }
 0x31a   :  { %v6277_v12 = vpop.f32.mrf.mxu1 }
 0x31b   :  { %v2099_v26 = vsel %vm2095_vm2, %v8823_v28, -inf }
 0x31c   :  { %2100 = vmax.xlane.f32.xlu0 %v2099_v26  ;;  %v1856_v15 = vpop.f32.mrf.mxu1 }
 0x31d   :  { %v8828_v40 = vmul.f32 0.35355338, %v1856_v15 }
 0x31e   :  { %v6280_v4 = vpop.f32.mrf.mxu1 }
 0x31f   :  { %v2102_v37 = vsel %vm2095_vm2, %v8828_v40, -inf }
 0x320   :  { %2103 = vmax.xlane.f32.xlu1 %v2102_v37  ;;  %v1859_v33 = vpop.f32.mrf.mxu1 }
 0x321   :  { %v8832_v17 = vmul.f32 0.35355338, %v1859_v33 }
 0x322   :  { %v6281_v19 = vpop.f32.mrf.mxu1 }
 0x323   :  { %v2105_v32 = vsel %vm2095_vm2, %v8832_v17, -inf }
 0x324   :  { %2106 = vmax.xlane.f32.xlu1 %v2105_v32  ;;  %v1864_v5 = vpop.f32.mrf.mxu1 }
 0x325   :  { %v8836_v60 = vmul.f32 0.35355338, %v1864_v5 }
 0x326   :  { %v6284_v14 = vpop.f32.mrf.mxu1 }
 0x327   :  { %v2108_v9 = vsel %vm2095_vm2, %v8836_v60, -inf }
 0x328   :  { %2109 = vmax.xlane.f32.xlu0 %v2108_v9  ;;  %v1867_v2 = vpop.f32.mrf.mxu1 }
 0x329   :  { %v8840_v31 = vmul.f32 0.35355338, %v1867_v2 }
 0x32a   :  { %v6285_v53 = vpop.f32.mrf.mxu1 }
 0x32b   :  { %v2111_v55 = vsel %vm2095_vm2, %v8840_v31, -inf }
 0x32c   :  { %2112 = vmax.xlane.f32.xlu1 %v2111_v55  ;;  %v1872_v54 = vpop.f32.mrf.mxu1 }
 0x32d   :  { %v8844_v7 = vmul.f32 0.35355338, %v1872_v54 }
 0x32e   :  { %v6288_v58 = vpop.f32.mrf.mxu1 }
 0x32f   :  { %v2114_v47 = vsel %vm2095_vm2, %v8844_v7, -inf }
 0x330   :  { %2115 = vmax.xlane.f32.xlu0 %v2114_v47  ;;  %v1875_v57 = vpop.f32.mrf.mxu1 }
 0x331   :  { %v8848_v8 = vmul.f32 0.35355338, %v1875_v57 }
 0x332   :  { %v6289_v48 = vpop.f32.mrf.mxu1 }
 0x333   :  { %v2117_v51 = vsel %vm2095_vm2, %v8848_v8, -inf }
 0x334   :  { %2118 = vmax.xlane.f32.xlu1 %v2117_v51  ;;  %v1880_v43 = vpop.f32.mrf.mxu1 }
 0x335   :  { %v8852_v27 = vmul.f32 0.35355338, %v1880_v43 }
 0x336   :  { %v6292_v16 = vpop.f32.mrf.mxu1 }
 0x337   :  { %v2120_v50 = vsel %vm2095_vm2, %v8852_v27, -inf }
 0x338   :  { %2121 = vmax.xlane.f32.xlu0 %v2120_v50  ;;  %v1883_v22 = vpop.f32.mrf.mxu1 }
 0x339   :  { %v8856_v61 = vmul.f32 0.35355338, %v1883_v22 }
 0x33a   :  { %v6293_v45 = vpop.f32.mrf.mxu1 }
 0x33b   :  { %v2123_v13 = vsel %vm2095_vm2, %v8856_v61, -inf }
 0x33c   :  { %2124 = vmax.xlane.f32.xlu1 %v2123_v13  ;;  %v1888_v34 = vpop.f32.mrf.mxu1 }
 0x33d   :  { %v8860_v30 = vmul.f32 0.35355338, %v1888_v34 }
 0x33e   :  { %v6296_v6 = vpop.f32.mrf.mxu1 }
 0x33f   :  { %v2126_v56 = vsel %vm2095_vm2, %v8860_v30, -inf }
 0x340   :  { %2127 = vmax.xlane.f32.xlu0 %v2126_v56  ;;  %v1891_v52 = vpop.f32.mrf.mxu1 }
 0x341   :  { %v8864_v29 = vmul.f32 0.35355338, %v1891_v52 }
 0x342   :  { %v6297_v42 = vpop.f32.mrf.mxu1 }
 0x343   :  { %v2129_v41 = vsel %vm2095_vm2, %v8864_v29, -inf }
 0x344   :  { %2130 = vmax.xlane.f32.xlu1 %v2129_v41  ;;  %v1896_v20 = vpop.f32.mrf.mxu1 }
 0x345   :  { %v8868_v63 = vmul.f32 0.35355338, %v1896_v20 }
 0x346   :  { %v6300_v18 = vpop.f32.mrf.mxu1 }
 0x347   :  { %v2132_v44 = vsel %vm2095_vm2, %v8868_v63, -inf }
 0x348   :  { %2133 = vmax.xlane.f32.xlu0 %v2132_v44  ;;  %v1899_v0 = vpop.f32.mrf.mxu1 }
 0x349   :  { %v8872_v10 = vmul.f32 0.35355338, %v1899_v0 }
 0x34a   :  { %v6301_v21 = vpop.f32.mrf.mxu1 }
 0x34b   :  { %v2135_v39 = vsel %vm2095_vm2, %v8872_v10, -inf }
 0x34c   :  { %2136 = vmax.xlane.f32.xlu1 %v2135_v39  ;;  %v1904_v11 = vpop.f32.mrf.mxu1 }
 0x34d   :  { %v8876_v3 = vmul.f32 0.35355338, %v1904_v11 }
 0x34e   :  { %v6304_v12 = vpop.f32.mrf.mxu1 }
 0x34f   :  { %v2138_v26 = vsel %vm2095_vm2, %v8876_v3, -inf }
 0x350   :  { %2139 = vmax.xlane.f32.xlu0 %v2138_v26  ;;  %v1907_v15 = vpop.f32.mrf.mxu1 }
 0x351   :  { %v8880_v4 = vmul.f32 0.35355338, %v1907_v15 }
 0x352   :  { %v6305_v37 = vpop.f32.mrf.mxu1 }
 0x353   :  { %v2141_v33 = vsel %vm2095_vm2, %v8880_v4, -inf }
 0x354   :  { %2142 = vmax.xlane.f32.xlu1 %v2141_v33  ;;  %v1912_v19 = vpop.f32.mrf.mxu1 }
 0x355   :  { %v8884_v32 = vmul.f32 0.35355338, %v1912_v19 }
 0x356   :  { %v6308_v5 = vpop.f32.mrf.mxu1 }
 0x357   :  { %v2144_v14 = vsel %vm2095_vm2, %v8884_v32, -inf }
 0x358   :  { %2145 = vmax.xlane.f32.xlu0 %v2144_v14  ;;  %v1915_v9 = vpop.f32.mrf.mxu1 }
 0x359   :  { %v8888_v2 = vmul.f32 0.35355338, %v1915_v9 }
 0x35a   :  { %v6309_v53 = vpop.f32.mrf.mxu1 }
 0x35b   :  { %v2147_v55 = vsel %vm2095_vm2, %v8888_v2, -inf }
 0x35c   :  { %2148 = vmax.xlane.f32.xlu1 %v2147_v55  ;;  %v1920_v54 = vpop.f32.mrf.mxu1 }
 0x35d   :  { %v8892_v58 = vmul.f32 0.35355338, %v1920_v54 }
 0x35e   :  { %v6312_v47 = vpop.f32.mrf.mxu1 }
 0x35f   :  { %v2150_v57 = vsel %vm2095_vm2, %v8892_v58, -inf }
 0x360   :  { %2151 = vmax.xlane.f32.xlu0 %v2150_v57  ;;  %v1923_v48 = vpop.f32.mrf.mxu1 }
 0x361   :  { %v8896_v51 = vmul.f32 0.35355338, %v1923_v48 }
 0x362   :  { %v6313_v43 = vpop.f32.mrf.mxu1 }
 0x363   :  { %v2153_v16 = vsel %vm2095_vm2, %v8896_v51, -inf }
 0x364   :  { %2154 = vmax.xlane.f32.xlu1 %v2153_v16  ;;  %v1928_v50 = vpop.f32.mrf.mxu1 }
 0x365   :  { %v8900_v22 = vmul.f32 0.35355338, %v1928_v50 }
 0x366   :  { %v6316_v45 = vpop.f32.mrf.mxu1 }
 0x367   :  { %v2156_v13 = vsel %vm2095_vm2, %v8900_v22, -inf }
 0x368   :  { %2157 = vmax.xlane.f32.xlu0 %v2156_v13  ;;  %v1931_v34 = vpop.f32.mrf.mxu1 }
 0x369   :  { %v8904_v6 = vmul.f32 0.35355338, %v1931_v34 }
 0x36a   :  { %v6317_v56 = vpop.f32.mrf.mxu1 }
 0x36b   :  { %v2159_v52 = vsel %vm2095_vm2, %v8904_v6, -inf }
 0x36c   :  { %2160 = vmax.xlane.f32.xlu1 %v2159_v52  ;;  %v1936_v42 = vpop.f32.mrf.mxu1 }
 0x36d   :  { %v8908_v41 = vmul.f32 0.35355338, %v1936_v42 }
 0x36e   :  { %v6320_v20 = vpop.f32.mrf.mxu1 }
 0x36f   :  { %v2162_v18 = vsel %vm2095_vm2, %v8908_v41, -inf }
 0x370   :  { %2163 = vmax.xlane.f32.xlu0 %v2162_v18  ;;  %v1939_v44 = vpop.f32.mrf.mxu1 }
 0x371   :  { %v8912_v0 = vmul.f32 0.35355338, %v1939_v44 }
 0x372   :  { %v6321_v21 = vpop.f32.mrf.mxu1 }
 0x373   :  { %v2165_v39 = vsel %vm2095_vm2, %v8912_v0, -inf }
 0x374   :  { %2166 = vmax.xlane.f32.xlu1 %v2165_v39  ;;  %v1944_v11 = vpop.f32.mrf.mxu1 }
 0x375   :  { %v8916_v12 = vmul.f32 0.35355338, %v1944_v11 }
 0x376   :  { %v6324_v26 = vpop.f32.mrf.mxu1 }
 0x377   :  { %v2168_v15 = vsel %vm2095_vm2, %v8916_v12, -inf }
 0x378   :  { %2169 = vmax.xlane.f32.xlu0 %v2168_v15  ;;  %v1947_v37 = vpop.f32.mrf.mxu1 }
 0x379   :  { %v8920_v33 = vmul.f32 0.35355338, %v1947_v37 }
 0x37a   :  { %v6325_v19 = vpop.f32.mrf.mxu1 }
 0x37b   :  { %v2171_v5 = vsel %vm2095_vm2, %v8920_v33, -inf }
 0x37c   :  { %2172 = vmax.xlane.f32.xlu1 %v2171_v5  ;;  %v1952_v14 = vpop.f32.mrf.mxu1 }
 0x37d   :  { %v8924_v9 = vmul.f32 0.35355338, %v1952_v14 }
 0x37e   :  { %v6328_v53 = vpop.f32.mrf.mxu1 }
 0x37f   :  { %v2174_v55 = vsel %vm2095_vm2, %v8924_v9, -inf }
 0x380   :  { %2175 = vmax.xlane.f32.xlu0 %v2174_v55  ;;  %v1955_v54 = vpop.f32.mrf.mxu1 }
 0x381   :  { %v8928_v47 = vmul.f32 0.35355338, %v1955_v54 }
 0x382   :  { %v6329_v57 = vpop.f32.mrf.mxu1 }
 0x383   :  { %v2177_v48 = vsel %vm2095_vm2, %v8928_v47, -inf }
 0x384   :  { %2178 = vmax.xlane.f32.xlu1 %v2177_v48  ;;  %v1960_v43 = vpop.f32.mrf.mxu1 }
 0x385   :  { %v8932_v16 = vmul.f32 0.35355338, %v1960_v43 }
 0x386   :  { %v6332_v50 = vpop.f32.mrf.mxu1 }
 0x387   :  { %v2180_v45 = vsel %vm2095_vm2, %v8932_v16, -inf }
 0x388   :  { %2181 = vmax.xlane.f32.xlu0 %v2180_v45  ;;  %v1963_v13 = vpop.f32.mrf.mxu1 }
 0x389   :  { %v8936_v34 = vmul.f32 0.35355338, %v1963_v13 }
 0x38a   :  { %v6333_v56 = vpop.f32.mrf.mxu1 }
 0x38b   :  { %v2183_v52 = vsel %vm2095_vm2, %v8936_v34, -inf }
 0x38c   :  { %2184 = vmax.xlane.f32.xlu1 %v2183_v52  ;;  %v1968_v42 = vpop.f32.mrf.mxu1 }
 0x38d   :  { %v8940_v20 = vmul.f32 0.35355338, %v1968_v42 }
 0x38e   :  { %v6336_v18 = vpop.f32.mrf.mxu1 }
 0x38f   :  { %v2186_v44 = vsel %vm2095_vm2, %v8940_v20, -inf }
 0x390   :  { %2187 = vmax.xlane.f32.xlu0 %v2186_v44  ;;  %v1971_v21 = vpop.f32.mrf.mxu1 }
 0x391   :  { %v8944_v39 = vmul.f32 0.35355338, %v1971_v21 }
 0x392   :  { %v6337_v11 = vpop.f32.mrf.mxu1 }
 0x393   :  { %v2189_v26 = vsel %vm2095_vm2, %v8944_v39, -inf }
 0x394   :  { %2190 = vmax.xlane.f32.xlu1 %v2189_v26  ;;  %v1976_v15 = vpop.f32.mrf.mxu1 }
 0x395   :  { %v8948_v37 = vmul.f32 0.35355338, %v1976_v15 }
 0x396   :  { %v6340_v19 = vpop.f32.mrf.mxu1 }
 0x397   :  { %v2192_v5 = vsel %vm2095_vm2, %v8948_v37, -inf }
 0x398   :  { %2193 = vmax.xlane.f32.xlu0 %v2192_v5  ;;  %v1979_v14 = vpop.f32.mrf.mxu1 }
 0x399   :  { %v8952_v53 = vmul.f32 0.35355338, %v1979_v14 }
 0x39a   :  { %v6341_v55 = vpop.f32.mrf.mxu1 }
 0x39b   :  { %v2195_v54 = vsel %vm2095_vm2, %v8952_v53, -inf }
 0x39c   :  { %2196 = vmax.xlane.f32.xlu1 %v2195_v54  ;;  %v1984_v57 = vpop.f32.mrf.mxu1 }
 0x39d   :  { %v8956_v48 = vmul.f32 0.35355338, %v1984_v57 }
 0x39e   :  { %v6344_v43 = vpop.f32.mrf.mxu1 }
 0x39f   :  { %v2198_v50 = vsel %vm2095_vm2, %v8956_v48, -inf }
 0x3a0   :  { %2199 = vmax.xlane.f32.xlu0 %v2198_v50  ;;  %v1987_v45 = vpop.f32.mrf.mxu1 }
 0x3a1   :  { %v8960_v13 = vmul.f32 0.35355338, %v1987_v45  ;;  %v2098_v56 = vpop.xlane.xlu0 %2097 }
 0x3a2   :  { %v2243_v52 = vsub.f32 %v8814_v46, %v2098_v56  ;;  %v6345_v42 = vpop.f32.mrf.mxu1 }
 0x3a3   :  { %v2201_v18 = vsel %vm2095_vm2, %v8960_v13, -inf }
 0x3a4   :  { %2202 = vmax.xlane.f32.xlu1 %v2201_v18  ;;  %v1992_v44 = vpop.f32.mrf.mxu1  ;;  %v2292_v21 = vmul.f32 1.442695, %v2243_v52 }
 0x3a5   :  { %v8965_v11 = vmul.f32 0.35355338, %v1992_v44  ;;  %v2101_v26 = vpop.xlane.xlu0 %2100 }
 0x3a6   :  { %v2244_v15 = vsub.f32 %v8823_v28, %v2101_v26  ;;  %v6348_v19 = vpop.f32.mrf.mxu1  ;;  %6959 = vpow2.f32 %v2292_v21 }
 0x3a7   :  { %v2204_v5 = vsel %vm2095_vm2, %v8965_v11, -inf }
 0x3a8   :  { %v2294_v14 = vmul.f32 1.442695, %v2244_v15  ;;  %2205 = vmax.xlane.f32.xlu0 %v2204_v5  ;;  %v1995_v55 = vpop.f32.mrf.mxu1 }
 0x3a9   :  { %v8970_v46 = vmul.f32 0.35355338, %v1995_v55  ;;  %v2104_v54 = vpop.xlane.xlu1 %2103 }
 0x3aa   :  { %6961 = vpow2.f32 %v2294_v14  ;;  %v2245_v57 = vsub.f32 %v8828_v40, %v2104_v54  ;;  %v6349_v43 = vpop.f32.mrf.mxu1 }
 0x3ab   :  { %v2207_v50 = vsel %vm2095_vm2, %v8970_v46, -inf }
 0x3ac   :  { %2208 = vmax.xlane.f32.xlu1 %v2207_v50  ;;  %v2000_v28 = vpop.f32.mrf.mxu1  ;;  %v2296_v45 = vmul.f32 1.442695, %v2245_v57 }
 0x3ad   :  { %v8975_v56 = vmul.f32 0.35355338, %v2000_v28  ;;  %v2107_v52 = vpop.xlane.xlu1 %2106 }
 0x3ae   :  { %v2246_v42 = vsub.f32 %v8832_v17, %v2107_v52  ;;  %v6352_v18 = vpop.f32.mrf.mxu1  ;;  %6963 = vpow2.f32 %v2296_v45 }
 0x3af   :  { %v2210_v44 = vsel %vm2095_vm2, %v8975_v56, -inf }
 0x3b0   :  { %v2298_v21 = vmul.f32 1.442695, %v2246_v42  ;;  %2211 = vmax.xlane.f32.xlu0 %v2210_v44  ;;  %v2003_v26 = vpop.f32.mrf.mxu1 }
 0x3b1   :  { %v8980_v40 = vmul.f32 0.35355338, %v2003_v26  ;;  %v2110_v15 = vpop.xlane.xlu0 %2109 }
 0x3b2   :  { %6965 = vpow2.f32 %v2298_v21  ;;  %v2247_v19 = vsub.f32 %v8836_v60, %v2110_v15  ;;  %v6353_v5 = vpop.f32.mrf.mxu1 }
 0x3b3   :  { %v2213_v14 = vsel %vm2095_vm2, %v8980_v40, -inf  ;;  %v8987_v43 = vpop.eup %6959 }
 0x3b4   :  { %2214 = vmax.xlane.f32.xlu1 %v2213_v14  ;;  %v2008_v17 = vpop.f32.mrf.mxu1  ;;  %v2300_v55 = vmul.f32 1.442695, %v2247_v19  ;;  %v7156_v19 = vld [vmem:[%s10434_s10 + $0x8] sm:$0xff]  }
 0x3b5   :  { %v8985_v54 = vmul.f32 0.35355338, %v2008_v17  ;;  %v2113_v57 = vpop.xlane.xlu1 %2112 }
 0x3b6   :  { %v2248_v50 = vsub.f32 %v8840_v31, %v2113_v57  ;;  %v6356_v28 = vpop.f32.mrf.mxu1  ;;  %6967 = vpow2.f32 %v2300_v55 }
 0x3b7   :  { %v8990_v45 = vpop.eup %6961  ;;  %v2216_v60 = vsel %vm2095_vm2, %v8985_v54, -inf }
 0x3b8   :  { %v2390_v52 = vpack.c.bf16 %v8990_v45, %v8987_v43  ;;  %v2302_v42 = vmul.f32 1.442695, %v2248_v50  ;;  %2217 = vmax.xlane.f32.xlu0 %v2216_v60  ;;  %v2011_v18 = vpop.f32.mrf.mxu1 }
 0x3b9   :  { %v8996_v44 = vmul.f32 0.35355338, %v2011_v18  ;;  %v2116_v21 = vpop.xlane.xlu0 %2115 }
 0x3ba   :  { %6969 = vpow2.f32 %v2302_v42  ;;  %v2249_v26 = vsub.f32 %v8844_v7, %v2116_v21  ;;  %v6357_v31 = vpop.f32.mrf.mxu1  ;;  %6377 = vmatmul.mubr.msk.bf16.vlgmr.msra.gmra.mxu0 %vm2095_vm2, %v2390_v52  ;;  %v7157_v52 = vld [vmem:[%s10434_s10] sm:$0xff]  }
 0x3bb   :  { %v2219_v15 = vsel %vm2095_vm2, %v8996_v44, -inf  ;;  %6380 = vmatprep.mubr.msk.bf16.mxu0 %vm7182_vm0, %v10508_v25  ;;  %6579 = vmatpush3.bf16.msra.mxu0 %v7156_v19  ;;  %v9010_v55 = vpop.eup %6963 }
 0x3bc   :  { %2220 = vmax.xlane.f32.xlu1 %v2219_v15  ;;  %v2016_v5 = vpop.f32.mrf.mxu1  ;;  %6580 = vmatprep.subr.bf16.mxu0 %v10508_v25  ;;  %v2304_v14 = vmul.f32 1.442695, %v2249_v26 }
 0x3bd   :  { %v9008_v7 = vmul.f32 0.35355338, %v2016_v5  ;;  %v2119_v17 = vpop.xlane.xlu1 %2118 }
 0x3be   :  { %v2250_v57 = vsub.f32 %v8848_v8, %v2119_v17  ;;  %v6360_v50 = vpop.f32.mrf.mxu1  ;;  %6971 = vpow2.f32 %v2304_v14 }
 0x3bf   :  { %v9013_v28 = vpop.eup %6965  ;;  %v2222_v60 = vsel %vm2095_vm2, %v9008_v7, -inf  ;;  %6581 = vmatpush3.bf16.msra.mxu0 %v7157_v52 }
 0x3c0   :  { %v2306_v42 = vmul.f32 1.442695, %v2250_v57  ;;  %2223 = vmax.xlane.f32.xlu0 %v2222_v60  ;;  %v2019_v18 = vpop.f32.mrf.mxu1  ;;  %v2391_v21 = vpack.c.bf16 %v9013_v28, %v9010_v55  ;;  %6798 = vmatprep.subr.bf16.mxu0 %v10508_v25 }
 0x3c1   :  { %v9023_v8 = vmul.f32 0.35355338, %v2019_v18  ;;  %v2122_v26 = vpop.xlane.xlu0 %2121 }
 0x3c2   :  { %6973 = vpow2.f32 %v2306_v42  ;;  %v2251_v31 = vsub.f32 %v8852_v27, %v2122_v26  ;;  %v6361_v15 = vpop.f32.mrf.mxu1  ;;  %6381 = vmatmul.mubr.msk.bf16.gmra.mxu0 %vm2095_vm2, %v2391_v21 }
 0x3c3   :  { %v2225_v19 = vsel %vm2095_vm2, %v9023_v8, -inf  ;;  %6384 = vmatprep.mubr.msk.bf16.mxu0 %vm7182_vm0, %v10508_v25  ;;  %v9033_v50 = vpop.eup %6967 }
 0x3c4   :  { %2226 = vmax.xlane.f32.xlu1 %v2225_v19  ;;  %v2024_v5 = vpop.f32.mrf.mxu1  ;;  %v2308_v17 = vmul.f32 1.442695, %v2251_v31 }
 0x3c5   :  { %v9031_v57 = vmul.f32 0.35355338, %v2024_v5  ;;  %v2125_v14 = vpop.xlane.xlu1 %2124 }
 0x3c6   :  { %v2252_v60 = vsub.f32 %v8856_v61, %v2125_v14  ;;  %v6364_v27 = vpop.f32.mrf.mxu1  ;;  %6975 = vpow2.f32 %v2308_v17 }
 0x3c7   :  { %v9036_v52 = vpop.eup %6969  ;;  %v2228_v42 = vsel %vm2095_vm2, %v9031_v57, -inf }
 0x3c8   :  { %v2310_v18 = vmul.f32 1.442695, %v2252_v60  ;;  %2229 = vmax.xlane.f32.xlu0 %v2228_v42  ;;  %v2027_v21 = vpop.f32.mrf.mxu1  ;;  %v2392_v26 = vpack.c.bf16 %v9036_v52, %v9033_v50 }
 0x3c9   :  { %v9042_v31 = vmul.f32 0.35355338, %v2027_v21  ;;  %v2128_v15 = vpop.xlane.xlu0 %2127 }
 0x3ca   :  { %6977 = vpow2.f32 %v2310_v18  ;;  %v2253_v19 = vsub.f32 %v8860_v30, %v2128_v15  ;;  %v6365_v61 = vpop.f32.mrf.mxu1  ;;  %6385 = vmatmul.mubr.msk.bf16.gmra.mxu0 %vm2095_vm2, %v2392_v26 }
 0x3cb   :  { %v2231_v5 = vsel %vm2095_vm2, %v9042_v31, -inf  ;;  %6388 = vmatprep.mubr.msk.bf16.mxu0 %vm7182_vm0, %v10508_v25  ;;  %v9052_v42 = vpop.eup %6971 }
 0x3cc   :  { %2232 = vmax.xlane.f32.xlu1 %v2231_v5  ;;  %v2032_v14 = vpop.f32.mrf.mxu1  ;;  %v2312_v60 = vmul.f32 1.442695, %v2253_v19  ;;  %10579 = vst [vmem:[#allocation46_spill] sm:$0xff] %v9052_v42 }
 0x3cd   :  { %v9050_v27 = vmul.f32 0.35355338, %v2032_v14  ;;  %v2131_v17 = vpop.xlane.xlu1 %2130 }
 0x3ce   :  { %v2254_v18 = vsub.f32 %v8864_v29, %v2131_v17  ;;  %v6368_v30 = vpop.f32.mrf.mxu1  ;;  %6979 = vpow2.f32 %v2312_v60 }
 0x3cf   :  { %v9055_v21 = vpop.eup %6973  ;;  %v2234_v26 = vsel %vm2095_vm2, %v9050_v27, -inf }
 0x3d0   :  { %10580 = vst [vmem:[#allocation47_spill] sm:$0xff] %v9055_v21  ;;  %v2314_v15 = vmul.f32 1.442695, %v2254_v18  ;;  %2235 = vmax.xlane.f32.xlu0 %v2234_v26  ;;  %v2035_v61 = vpop.f32.mrf.mxu1  ;;  %v2393_v5 = vpack.c.bf16 %v9055_v21, %v9052_v42 }
 0x3d1   :  { %v9061_v19 = vmul.f32 0.35355338, %v2035_v61  ;;  %v2134_v14 = vpop.xlane.xlu0 %2133 }
 0x3d2   :  { %6981 = vpow2.f32 %v2314_v15  ;;  %v2255_v49 = vsub.f32 %v8868_v63, %v2134_v14  ;;  %v6369_v29 = vpop.f32.mrf.mxu1  ;;  %6389 = vmatmul.mubr.msk.bf16.gmra.mxu0 %vm2095_vm2, %v2393_v5 }
 0x3d3   :  { %v2237_v17 = vsel %vm2095_vm2, %v9061_v19, -inf  ;;  %6392 = vmatprep.mubr.msk.bf16.mxu0 %vm7182_vm0, %v10508_v25  ;;  %v9071_v61 = vpop.eup %6975 }
 0x3d4   :  { %2238 = vmax.xlane.f32.xlu1 %v2237_v17  ;;  %v2040_v18 = vpop.f32.mrf.mxu1  ;;  %v2316_v30 = vmul.f32 1.442695, %v2255_v49 }
 0x3d5   :  { %v9069_v26 = vmul.f32 0.35355338, %v2040_v18  ;;  %v2137_v60 = vpop.xlane.xlu1 %2136 }
 0x3d6   :  { %v2256_v15 = vsub.f32 %v8872_v10, %v2137_v60  ;;  %v6372_v63 = vpop.f32.mrf.mxu1  ;;  %6983 = vpow2.f32 %v2316_v30 }
 0x3d7   :  { %v9074_v14 = vpop.eup %6977  ;;  %v2240_v5 = vsel %vm2095_vm2, %v9069_v26, -inf }
 0x3d8   :  { %v2318_v29 = vmul.f32 1.442695, %v2256_v15  ;;  %2241 = vmax.xlane.f32.xlu0 %v2240_v5  ;;  %v2043_v21 = vpop.f32.mrf.mxu1  ;;  %v2394_v17 = vpack.c.bf16 %v9074_v14, %v9071_v61 }
 0x3d9   :  { %v2140_v49 = vpop.xlane.xlu0 %2139 }
 0x3da   :  { %6985 = vpow2.f32 %v2318_v29  ;;  %v2257_v18 = vsub.f32 %v8876_v3, %v2140_v49  ;;  %v6373_v42 = vpop.f32.mrf.mxu1  ;;  %6393 = vmatmul.mubr.msk.bf16.gmra.mxu0 %vm2095_vm2, %v2394_v17 }
 0x3db   :  { %6396 = vmatprep.mubr.msk.bf16.mxu0 %vm7182_vm0, %v10508_v25  ;;  %v9084_v63 = vpop.eup %6979 }
 0x3dc   :  { %v2320_v10 = vmul.f32 1.442695, %v2257_v18 }
 0x3dd   :  { %v2143_v60 = vpop.xlane.xlu1 %2142 }
 0x3de   :  { %v2258_v21 = vsub.f32 %v8880_v4, %v2143_v60  ;;  %6987 = vpow2.f32 %v2320_v10 }
 0x3df   :  { %v9087_v15 = vpop.eup %6981 }
 0x3e0   :  { %v2322_v5 = vmul.f32 1.442695, %v2258_v21  ;;  %v2395_v30 = vpack.c.bf16 %v9087_v15, %v9084_v63 }
 0x3e1   :  { %v2146_v3 = vpop.xlane.xlu0 %2145 }
 0x3e2   :  { %6989 = vpow2.f32 %v2322_v5  ;;  %v2259_v42 = vsub.f32 %v8884_v32, %v2146_v3  ;;  %6397 = vmatmul.mubr.msk.bf16.gmra.mxu0 %vm2095_vm2, %v2395_v30  ;;  %v6930_v5 = vld [vmem:[%s10437_s13] sm:$0xff]  }
 0x3e3   :  { %6400 = vmatprep.mubr.msk.bf16.mxu0 %vm7182_vm0, %v10508_v25  ;;  %v9095_v49 = vpop.eup %6983  ;;  %6477 = vmatpush3.bf16.msra.mxu1 %v6930_v5 }
 0x3e4   :  { %v2324_v29 = vmul.f32 1.442695, %v2259_v42  ;;  %6682 = vmatprep.subr.bf16.mxu1 %v10508_v25 }
 0x3e5   :  { %v2149_v17 = vpop.xlane.xlu1 %2148 }
 0x3e6   :  { %v2260_v4 = vsub.f32 %v8888_v2, %v2149_v17  ;;  %6991 = vpow2.f32 %v2324_v29 }
 0x3e7   :  { %v9098_v18 = vpop.eup %6985 }
 0x3e8   :  { %v2326_v60 = vmul.f32 1.442695, %v2260_v4  ;;  %v2396_v10 = vpack.c.bf16 %v9098_v18, %v9095_v49 }
 0x3e9   :  { %v2152_v21 = vpop.xlane.xlu0 %2151 }
 0x3ea   :  { %6993 = vpow2.f32 %v2326_v60  ;;  %v2261_v32 = vsub.f32 %v8892_v58, %v2152_v21  ;;  %6401 = vmatmul.mubr.msk.bf16.gmra.mxu0 %vm2095_vm2, %v2396_v10 }
 0x3eb   :  { %6404 = vmatprep.mubr.msk.bf16.mxu0 %vm7182_vm0, %v10508_v25  ;;  %v9110_v3 = vpop.eup %6987 }
 0x3ec   :  { %v2328_v2 = vmul.f32 1.442695, %v2261_v32 }
 0x3ed   :  { %v2155_v30 = vpop.xlane.xlu1 %2154 }
 0x3ee   :  { %v2262_v42 = vsub.f32 %v8896_v51, %v2155_v30  ;;  %6995 = vpow2.f32 %v2328_v2 }
 0x3ef   :  { %v9113_v29 = vpop.eup %6989 }
 0x3f0   :  { %v2330_v58 = vmul.f32 1.442695, %v2262_v42  ;;  %v2397_v17 = vpack.c.bf16 %v9113_v29, %v9110_v3 }
 0x3f1   :  { %v2158_v4 = vpop.xlane.xlu0 %2157 }
 0x3f2   :  { %6997 = vpow2.f32 %v2330_v58  ;;  %v2263_v60 = vsub.f32 %v8900_v22, %v2158_v4  ;;  %6405 = vmatmul.mubr.msk.bf16.gmra.mxu0 %vm2095_vm2, %v2397_v17 }
 0x3f3   :  { %6408 = vmatprep.mubr.msk.bf16.mxu0 %vm7182_vm0, %v10508_v25  ;;  %v9121_v32 = vpop.eup %6991 }
 0x3f4   :  { %v2332_v10 = vmul.f32 1.442695, %v2263_v60 }
 0x3f5   :  { %v2161_v21 = vpop.xlane.xlu1 %2160 }
 0x3f6   :  { %v2264_v51 = vsub.f32 %v8904_v6, %v2161_v21  ;;  %6999 = vpow2.f32 %v2332_v10 }
 0x3f7   :  { %v9124_v5 = vpop.eup %6993 }
 0x3f8   :  { %v2334_v30 = vmul.f32 1.442695, %v2264_v51  ;;  %v2398_v2 = vpack.c.bf16 %v9124_v5, %v9121_v32 }
 0x3f9   :  { %v2164_v42 = vpop.xlane.xlu0 %2163 }
 0x3fa   :  { %7001 = vpow2.f32 %v2334_v30  ;;  %v2265_v22 = vsub.f32 %v8908_v41, %v2164_v42  ;;  %6409 = vmatmul.mubr.msk.bf16.gmra.mxu0 %vm2095_vm2, %v2398_v2 }
 0x3fb   :  { %6412 = vmatprep.mubr.msk.bf16.mxu0 %vm7182_vm0, %v10508_v25  ;;  %v9132_v4 = vpop.eup %6995 }
 0x3fc   :  { %v2336_v58 = vmul.f32 1.442695, %v2265_v22 }
 0x3fd   :  { %v2167_v17 = vpop.xlane.xlu1 %2166 }
 0x3fe   :  { %v2266_v6 = vsub.f32 %v8912_v0, %v2167_v17  ;;  %7003 = vpow2.f32 %v2336_v58 }
 0x3ff   :  { %v9135_v60 = vpop.eup %6997 }
 0x400   :  { %v2338_v21 = vmul.f32 1.442695, %v2266_v6  ;;  %v2399_v10 = vpack.c.bf16 %v9135_v60, %v9132_v4 }
 0x401   :  { %v2170_v51 = vpop.xlane.xlu0 %2169 }
 0x402   :  { %7005 = vpow2.f32 %v2338_v21  ;;  %v2267_v41 = vsub.f32 %v8916_v12, %v2170_v51  ;;  %6413 = vmatmul.mubr.msk.bf16.gmra.mxu0 %vm2095_vm2, %v2399_v10 }
 0x403   :  { %6416 = vmatprep.mubr.msk.bf16.mxu0 %vm7182_vm0, %v10508_v25  ;;  %v9143_v42 = vpop.eup %6999 }
 0x404   :  { %v2340_v30 = vmul.f32 1.442695, %v2267_v41 }
 0x405   :  { %v2173_v2 = vpop.xlane.xlu1 %2172 }
 0x406   :  { %v2268_v0 = vsub.f32 %v8920_v33, %v2173_v2  ;;  %7007 = vpow2.f32 %v2340_v30 }
 0x407   :  { %v9146_v22 = vpop.eup %7001 }
 0x408   :  { %v2342_v17 = vmul.f32 1.442695, %v2268_v0  ;;  %v2400_v58 = vpack.c.bf16 %v9146_v22, %v9143_v42 }
 0x409   :  { %v2176_v6 = vpop.xlane.xlu0 %2175 }
 0x40a   :  { %7009 = vpow2.f32 %v2342_v17  ;;  %v2269_v12 = vsub.f32 %v8924_v9, %v2176_v6  ;;  %6417 = vmatmul.mubr.msk.bf16.gmra.mxu0 %vm2095_vm2, %v2400_v58 }
 0x40b   :  { %6420 = vmatprep.mubr.msk.bf16.mxu0 %vm7182_vm0, %v10508_v25  ;;  %v9154_v51 = vpop.eup %7003 }
 0x40c   :  { %v2344_v21 = vmul.f32 1.442695, %v2269_v12 }
 0x40d   :  { %v2179_v10 = vpop.xlane.xlu1 %2178 }
 0x40e   :  { %v2270_v33 = vsub.f32 %v8928_v47, %v2179_v10  ;;  %7011 = vpow2.f32 %v2344_v21 }
 0x40f   :  { %v9157_v41 = vpop.eup %7005 }
 0x410   :  { %v2346_v2 = vmul.f32 1.442695, %v2270_v33  ;;  %v2401_v30 = vpack.c.bf16 %v9157_v41, %v9154_v51 }
 0x411   :  { %v2182_v0 = vpop.xlane.xlu0 %2181 }
 0x412   :  { %7013 = vpow2.f32 %v2346_v2  ;;  %v2271_v9 = vsub.f32 %v8932_v16, %v2182_v0  ;;  %6421 = vmatmul.mubr.msk.bf16.gmra.mxu0 %vm2095_vm2, %v2401_v30 }
 0x413   :  { %6424 = vmatprep.mubr.msk.bf16.mxu0 %vm7182_vm0, %v10508_v25  ;;  %v9165_v6 = vpop.eup %7007 }
 0x414   :  { %v2348_v17 = vmul.f32 1.442695, %v2271_v9 }
 0x415   :  { %v2185_v58 = vpop.xlane.xlu1 %2184 }
 0x416   :  { %v2272_v47 = vsub.f32 %v8936_v34, %v2185_v58  ;;  %7015 = vpow2.f32 %v2348_v17 }
 0x417   :  { %v9168_v12 = vpop.eup %7009 }
 0x418   :  { %v2350_v10 = vmul.f32 1.442695, %v2272_v47  ;;  %v2402_v21 = vpack.c.bf16 %v9168_v12, %v9165_v6 }
 0x419   :  { %v2188_v33 = vpop.xlane.xlu0 %2187 }
 0x41a   :  { %7017 = vpow2.f32 %v2350_v10  ;;  %v2273_v16 = vsub.f32 %v8940_v20, %v2188_v33  ;;  %6425 = vmatmul.mubr.msk.bf16.gmra.mxu0 %vm2095_vm2, %v2402_v21 }
 0x41b   :  { %6428 = vmatprep.mubr.msk.bf16.mxu0 %vm7182_vm0, %v10508_v25  ;;  %v9176_v0 = vpop.eup %7011 }
 0x41c   :  { %v2352_v2 = vmul.f32 1.442695, %v2273_v16 }
 0x41d   :  { %v2191_v30 = vpop.xlane.xlu1 %2190 }
 0x41e   :  { %v2274_v34 = vsub.f32 %v8944_v39, %v2191_v30  ;;  %7019 = vpow2.f32 %v2352_v2 }
 0x41f   :  { %v9179_v9 = vpop.eup %7013 }
 0x420   :  { %v2354_v58 = vmul.f32 1.442695, %v2274_v34  ;;  %v2403_v17 = vpack.c.bf16 %v9179_v9, %v9176_v0 }
 0x421   :  { %v2194_v47 = vpop.xlane.xlu0 %2193 }
 0x422   :  { %7021 = vpow2.f32 %v2354_v58  ;;  %v2275_v20 = vsub.f32 %v8948_v37, %v2194_v47  ;;  %6429 = vmatmul.mubr.msk.bf16.gmra.mxu0 %vm2095_vm2, %v2403_v17 }
 0x423   :  { %6432 = vmatprep.mubr.msk.bf16.mxu0 %vm7182_vm0, %v10508_v25  ;;  %v9187_v33 = vpop.eup %7015 }
 0x424   :  { %v2356_v10 = vmul.f32 1.442695, %v2275_v20 }
 0x425   :  { %v2197_v21 = vpop.xlane.xlu1 %2196 }
 0x426   :  { %v2276_v39 = vsub.f32 %v8952_v53, %v2197_v21  ;;  %7023 = vpow2.f32 %v2356_v10 }
 0x427   :  { %v9190_v16 = vpop.eup %7017 }
 0x428   :  { %v2358_v30 = vmul.f32 1.442695, %v2276_v39  ;;  %v2404_v2 = vpack.c.bf16 %v9190_v16, %v9187_v33 }
 0x429   :  { %v2200_v34 = vpop.xlane.xlu0 %2199 }
 0x42a   :  { %7025 = vpow2.f32 %v2358_v30  ;;  %v2277_v37 = vsub.f32 %v8956_v48, %v2200_v34  ;;  %6433 = vmatmul.mubr.msk.bf16.gmra.mxu0 %vm2095_vm2, %v2404_v2 }
 0x42b   :  { %6436 = vmatprep.mubr.msk.bf16.mxu0 %vm7182_vm0, %v10508_v25  ;;  %v9198_v47 = vpop.eup %7019 }
 0x42c   :  { %v2360_v58 = vmul.f32 1.442695, %v2277_v37 }
 0x42d   :  { %v2203_v17 = vpop.xlane.xlu1 %2202 }
 0x42e   :  { %v2278_v53 = vsub.f32 %v8960_v13, %v2203_v17  ;;  %7027 = vpow2.f32 %v2360_v58 }
 0x42f   :  { %v9201_v20 = vpop.eup %7021 }
 0x430   :  { %v2362_v21 = vmul.f32 1.442695, %v2278_v53  ;;  %v2405_v10 = vpack.c.bf16 %v9201_v20, %v9198_v47 }
 0x431   :  { %v2206_v39 = vpop.xlane.xlu0 %2205 }
 0x432   :  { %7029 = vpow2.f32 %v2362_v21  ;;  %v2279_v48 = vsub.f32 %v8965_v11, %v2206_v39  ;;  %6437 = vmatmul.mubr.msk.bf16.gmra.mxu0 %vm2095_vm2, %v2405_v10 }
 0x433   :  { %6440 = vmatprep.mubr.msk.bf16.mxu0 %vm7182_vm0, %v10508_v25  ;;  %v9209_v34 = vpop.eup %7023 }
 0x434   :  { %v2364_v30 = vmul.f32 1.442695, %v2279_v48 }
 0x435   :  { %v2209_v2 = vpop.xlane.xlu1 %2208 }
 0x436   :  { %v2280_v13 = vsub.f32 %v8970_v46, %v2209_v2  ;;  %7031 = vpow2.f32 %v2364_v30 }
 0x437   :  { %v9212_v37 = vpop.eup %7025 }
 0x438   :  { %v2366_v17 = vmul.f32 1.442695, %v2280_v13  ;;  %v2406_v58 = vpack.c.bf16 %v9212_v37, %v9209_v34 }
 0x439   :  { %v2212_v53 = vpop.xlane.xlu0 %2211 }
 0x43a   :  { %7033 = vpow2.f32 %v2366_v17  ;;  %v2281_v11 = vsub.f32 %v8975_v56, %v2212_v53  ;;  %6441 = vmatmul.mubr.msk.bf16.gmra.mxu0 %vm2095_vm2, %v2406_v58 }
 0x43b   :  { %6444 = vmatprep.mubr.msk.bf16.mxu0 %vm7182_vm0, %v10508_v25  ;;  %v9220_v39 = vpop.eup %7027 }
 0x43c   :  { %v2368_v21 = vmul.f32 1.442695, %v2281_v11 }
 0x43d   :  { %v2215_v10 = vpop.xlane.xlu1 %2214 }
 0x43e   :  { %v2282_v46 = vsub.f32 %v8980_v40, %v2215_v10  ;;  %7035 = vpow2.f32 %v2368_v21 }
 0x43f   :  { %v9223_v48 = vpop.eup %7029 }
 0x440   :  { %v2370_v2 = vmul.f32 1.442695, %v2282_v46  ;;  %v2407_v30 = vpack.c.bf16 %v9223_v48, %v9220_v39 }
 0x441   :  { %v2218_v13 = vpop.xlane.xlu0 %2217 }
 0x442   :  { %7037 = vpow2.f32 %v2370_v2  ;;  %v2283_v56 = vsub.f32 %v8985_v54, %v2218_v13  ;;  %6445 = vmatmul.mubr.msk.bf16.gmra.mxu0 %vm2095_vm2, %v2407_v30 }
 0x443   :  { %6448 = vmatprep.mubr.msk.bf16.mxu0 %vm7182_vm0, %v10508_v25  ;;  %v9231_v53 = vpop.eup %7031 }
 0x444   :  { %v2372_v17 = vmul.f32 1.442695, %v2283_v56 }
 0x445   :  { %v2221_v58 = vpop.xlane.xlu1 %2220 }
 0x446   :  { %v2284_v40 = vsub.f32 %v8996_v44, %v2221_v58  ;;  %7039 = vpow2.f32 %v2372_v17 }
 0x447   :  { %v9234_v11 = vpop.eup %7033 }
 0x448   :  { %v2374_v10 = vmul.f32 1.442695, %v2284_v40  ;;  %v2408_v21 = vpack.c.bf16 %v9234_v11, %v9231_v53 }
 0x449   :  { %v2224_v46 = vpop.xlane.xlu0 %2223 }
 0x44a   :  { %7041 = vpow2.f32 %v2374_v10  ;;  %v2285_v54 = vsub.f32 %v9008_v7, %v2224_v46  ;;  %6449 = vmatmul.mubr.msk.bf16.gmra.mxu0 %vm2095_vm2, %v2408_v21 }
 0x44b   :  { %6452 = vmatprep.mubr.msk.bf16.mxu0 %vm7182_vm0, %v10508_v25  ;;  %v9242_v13 = vpop.eup %7035 }
 0x44c   :  { %v2376_v2 = vmul.f32 1.442695, %v2285_v54 }
 0x44d   :  { %v2227_v30 = vpop.xlane.xlu1 %2226 }
 0x44e   :  { %v2286_v44 = vsub.f32 %v9023_v8, %v2227_v30  ;;  %7043 = vpow2.f32 %v2376_v2 }
 0x44f   :  { %v9245_v56 = vpop.eup %7037 }
 0x450   :  { %v2378_v58 = vmul.f32 1.442695, %v2286_v44  ;;  %v2409_v17 = vpack.c.bf16 %v9245_v56, %v9242_v13 }
 0x451   :  { %v2230_v40 = vpop.xlane.xlu0 %2229 }
 0x452   :  { %7045 = vpow2.f32 %v2378_v58  ;;  %v2287_v7 = vsub.f32 %v9031_v57, %v2230_v40  ;;  %6453 = vmatmul.mubr.msk.bf16.gmra.mxu0 %vm2095_vm2, %v2409_v17 }
 0x453   :  { %6456 = vmatprep.mubr.msk.bf16.mxu0 %vm7182_vm0, %v10508_v25  ;;  %v9253_v46 = vpop.eup %7039 }
 0x454   :  { %v2380_v10 = vmul.f32 1.442695, %v2287_v7 }
 0x455   :  { %v2233_v21 = vpop.xlane.xlu1 %2232 }
 0x456   :  { %v2288_v8 = vsub.f32 %v9042_v31, %v2233_v21  ;;  %7047 = vpow2.f32 %v2380_v10 }
 0x457   :  { %v9256_v54 = vpop.eup %7041 }
 0x458   :  { %v2382_v30 = vmul.f32 1.442695, %v2288_v8  ;;  %v2410_v2 = vpack.c.bf16 %v9256_v54, %v9253_v46 }
 0x459   :  { %v2236_v44 = vpop.xlane.xlu0 %2235 }
 0x45a   :  { %7049 = vpow2.f32 %v2382_v30  ;;  %v2289_v57 = vsub.f32 %v9050_v27, %v2236_v44  ;;  %6457 = vmatmul.mubr.msk.bf16.gmra.mxu0 %vm2095_vm2, %v2410_v2 }
 0x45b   :  { %6460 = vmatprep.mubr.msk.bf16.mxu0 %vm7182_vm0, %v10508_v25  ;;  %v9264_v40 = vpop.eup %7043 }
 0x45c   :  { %v2384_v58 = vmul.f32 1.442695, %v2289_v57 }
 0x45d   :  { %v2239_v17 = vpop.xlane.xlu1 %2238 }
 0x45e   :  { %v2290_v31 = vsub.f32 %v9061_v19, %v2239_v17  ;;  %7051 = vpow2.f32 %v2384_v58 }
 0x45f   :  { %v9267_v7 = vpop.eup %7045 }
 0x460   :  { %v2386_v21 = vmul.f32 1.442695, %v2290_v31  ;;  %v2411_v10 = vpack.c.bf16 %v9267_v7, %v9264_v40 }
 0x461   :  { %v2242_v8 = vpop.xlane.xlu0 %2241 }
 0x462   :  { %7053 = vpow2.f32 %v2386_v21  ;;  %v2291_v27 = vsub.f32 %v9069_v26, %v2242_v8  ;;  %6461 = vmatmul.mubr.msk.bf16.gmra.mxu0 %vm2095_vm2, %v2411_v10 }
 0x463   :  { %6464 = vmatprep.mubr.msk.bf16.mxu0 %vm7182_vm0, %v10508_v25  ;;  %v9275_v2 = vpop.eup %7047 }
 0x464   :  { %v2388_v30 = vmul.f32 1.442695, %v2291_v27 }
 0x466   :  { %7055 = vpow2.f32 %v2388_v30 }
 0x467   :  { %v9277_v19 = vpop.eup %7049 }
 0x468   :  { %v2412_v44 = vpack.c.bf16 %v9277_v19, %v9275_v2 }
 0x46a   :  { %6465 = vmatmul.mubr.msk.bf16.gmra.mxu0 %vm2095_vm2, %v2412_v44  ;;  %v10583_v44 = vpack.c.bf16 %v8178_v1, %v8172_v36 }
 0x46b   :  { %6468 = vmatprep.mubr.msk.bf16.mxu0 %vm7182_vm0, %v10508_v25  ;;  %v9284_v26 = vpop.eup %7051 }
 0x46f   :  { %v9286_v57 = vpop.eup %7053 }
 0x470   :  { %10581 = vst [vmem:[#allocation48_spill] sm:$0xff] %v9286_v57  ;;  %v2413_v58 = vpack.c.bf16 %v9286_v57, %v9284_v26 }
 0x472   :  { %6469 = vmatmul.mubr.msk.bf16.gmra.mxu0 %vm2095_vm2, %v2413_v58 }
 0x473   :  { %6472 = vmatprep.mubr.msk.bf16.mxu0 %vm7182_vm0, %v10508_v25  ;;  %v9293_v17 = vpop.eup %7055 }
 0x474   :  { %10582 = vst [vmem:[#allocation49_spill] sm:$0xff] %v9293_v17  ;;  %v2414_v31 = vpack.c.bf16 %v9293_v17, %v9293_v17 }
 0x47a   :  { %v2532_v21 = vpop.f32.mrf.mxu0  ;;  %6473 = vmatmul.mubr.msk.bf16.gmra.mxu0 %vm2095_vm2, %v2414_v31 }
 0x47b   :  { %6582 = vmatprep.mubr.msk.bf16.mxu0 %vm7182_vm0, %v10508_v25  ;;  %7057 = vrcp.f32 %v2532_v21  ;;  %v10584_v21 = vpack.c.bf16 %v8206_v59, %v8200_v23  ;;  %v10585_v59 = vpack.c.bf16 %v8234_v62, %v8228_v35 }
 0x47c   :  { %v6378_v10 = vpop.f32.mrf.mxu0 }
 0x47e   :  { %v2535_v8 = vpop.f32.mrf.mxu0 }
 0x47f   :  { %7059 = vrcp.f32 %v2535_v8 }
 0x480   :  { %v6379_v27 = vpop.f32.mrf.mxu0 }
 0x482   :  { %v2540_v30 = vpop.f32.mrf.mxu0  ;;  %6583 = vmatmul.mubr.msk.bf16.vlgmr.msra.gmra.mxu0 %vm162_vm1, %v10583_v44 }
 0x483   :  { %6586 = vmatprep.mubr.msk.bf16.mxu0 %vm7182_vm0, %v10508_v25  ;;  %7061 = vrcp.f32 %v2540_v30 }
 0x484   :  { %v6382_v58 = vpop.f32.mrf.mxu0 }
 0x486   :  { %v2543_v31 = vpop.f32.mrf.mxu0 }
 0x487   :  { %7063 = vrcp.f32 %v2543_v31 }
 0x488   :  { %v6383_v17 = vpop.f32.mrf.mxu0  ;;  %v7058_v57 = vpop.eup %7057 }
 0x489   :  { %v2779_v8 = vmul.f32 %v7058_v57, %v8987_v43 }
 0x48a   :  { %v2548_v10 = vpop.f32.mrf.mxu0  ;;  %6587 = vmatmul.mubr.msk.bf16.gmra.mxu0 %vm162_vm1, %v10584_v21 }
 0x48b   :  { %6590 = vmatprep.mubr.msk.bf16.mxu0 %vm7182_vm0, %v10508_v25  ;;  %7065 = vrcp.f32 %v2548_v10 }
 0x48c   :  { %v7060_v1 = vpop.eup %7059  ;;  %v6386_v36 = vpop.f32.mrf.mxu0 }
 0x48d   :  { %v2780_v27 = vmul.f32 %v7060_v1, %v8990_v45  ;;  %v10586_v36 = vpack.c.bf16 %v8259_v38, %v8253_v24 }
 0x48e   :  { %v2551_v30 = vpop.f32.mrf.mxu0 }
 0x48f   :  { %v2828_v44 = vpack.c.bf16 %v2780_v27, %v2779_v8  ;;  %7067 = vrcp.f32 %v2551_v30 }
 0x490   :  { %v6387_v17 = vpop.f32.mrf.mxu0  ;;  %v7062_v58 = vpop.eup %7061 }
 0x491   :  { %6479 = vmatmul.mubr.msk.bf16.vlgmr.msra.gmra.mxu1 %vm2095_vm2, %v2828_v44  ;;  %v2781_v57 = vmul.f32 %v7062_v58, %v9010_v55  ;;  %v10587_v58 = vld [vmem:[#allocation9_spill] sm:$0xff] }
 0x492   :  { %v2556_v23 = vpop.f32.mrf.mxu0  ;;  %6591 = vmatmul.mubr.msk.bf16.gmra.mxu0 %vm162_vm1, %v10585_v59  ;;  %6482 = vmatprep.mubr.msk.bf16.mxu1 %vm7182_vm0, %v10508_v25 }
 0x493   :  { %6594 = vmatprep.mubr.msk.bf16.mxu0 %vm7182_vm0, %v10508_v25  ;;  %7069 = vrcp.f32 %v2556_v23  ;;  %v10588_v23 = vld [vmem:[#allocation8_spill] sm:$0xff] }
 0x494   :  { %v7064_v43 = vpop.eup %7063  ;;  %v6390_v45 = vpop.f32.mrf.mxu0  ;;  %v10589_v59 = vpack.c.bf16 %v10587_v58, %v10588_v23 }
 0x495   :  { %v2782_v31 = vmul.f32 %v7064_v43, %v9013_v28  ;;  %v10590_v43 = vld [vmem:[#allocation46_spill] sm:$0xff] }
 0x496   :  { %v2559_v10 = vpop.f32.mrf.mxu0 }
 0x497   :  { %7071 = vrcp.f32 %v2559_v10  ;;  %v2829_v21 = vpack.c.bf16 %v2782_v31, %v2781_v57  ;;  %v10591_v57 = vld [vmem:[#allocation47_spill] sm:$0xff] }
 0x498   :  { %v6391_v1 = vpop.f32.mrf.mxu0  ;;  %v7066_v35 = vpop.eup %7065 }
 0x499   :  { %6483 = vmatmul.mubr.msk.bf16.gmra.mxu1 %vm2095_vm2, %v2829_v21  ;;  %v2783_v8 = vmul.f32 %v7066_v35, %v9033_v50 }
 0x49a   :  { %v2564_v62 = vpop.f32.mrf.mxu0  ;;  %6595 = vmatmul.mubr.msk.bf16.gmra.mxu0 %vm162_vm1, %v10586_v36  ;;  %6486 = vmatprep.mubr.msk.bf16.mxu1 %vm7182_vm0, %v10508_v25  ;;  %v10592_v36 = vld [vmem:[#allocation11_spill] sm:$0xff] }
 0x49b   :  { %6598 = vmatprep.mubr.msk.bf16.mxu0 %vm7182_vm0, %v10508_v25  ;;  %7073 = vrcp.f32 %v2564_v62 }
 0x49c   :  { %v7068_v55 = vpop.eup %7067  ;;  %v6394_v28 = vpop.f32.mrf.mxu0 }
 0x49d   :  { %v2784_v27 = vmul.f32 %v7068_v55, %v9036_v52  ;;  %v10593_v55 = vld [vmem:[#allocation10_spill] sm:$0xff] }
 0x49e   :  { %v2567_v30 = vpop.f32.mrf.mxu0  ;;  %v10594_v28 = vpack.c.bf16 %v10592_v36, %v10593_v55  ;;  %v10599_v36 = vld [vmem:[#allocation14_spill] sm:$0xff] }
 0x49f   :  { %7075 = vrcp.f32 %v2567_v30  ;;  %v2830_v44 = vpack.c.bf16 %v2784_v27, %v2783_v8 }
 0x4a0   :  { %v6395_v17 = vpop.f32.mrf.mxu0  ;;  %v7070_v24 = vpop.eup %7069 }
 0x4a1   :  { %6487 = vmatmul.mubr.msk.bf16.gmra.mxu1 %vm2095_vm2, %v2830_v44  ;;  %v2785_v45 = vmul.f32 %v7070_v24, %v10590_v43 }
 0x4a2   :  { %v2572_v38 = vpop.f32.mrf.mxu0  ;;  %6599 = vmatmul.mubr.msk.bf16.gmra.mxu0 %vm162_vm1, %v10589_v59  ;;  %6490 = vmatprep.mubr.msk.bf16.mxu1 %vm7182_vm0, %v10508_v25  ;;  %v10595_v59 = vld [vmem:[#allocation13_spill] sm:$0xff] }
 0x4a3   :  { %6602 = vmatprep.mubr.msk.bf16.mxu0 %vm7182_vm0, %v10508_v25  ;;  %7077 = vrcp.f32 %v2572_v38 }
 0x4a4   :  { %v7072_v50 = vpop.eup %7071  ;;  %v6398_v52 = vpop.f32.mrf.mxu0 }
 0x4a5   :  { %v2786_v31 = vmul.f32 %v7072_v50, %v10591_v57  ;;  %v10596_v50 = vld [vmem:[#allocation12_spill] sm:$0xff] }
 0x4a6   :  { %v2575_v10 = vpop.f32.mrf.mxu0  ;;  %v10597_v52 = vpack.c.bf16 %v10595_v59, %v10596_v50 }
 0x4a7   :  { %7079 = vrcp.f32 %v2575_v10  ;;  %v2831_v21 = vpack.c.bf16 %v2786_v31, %v2785_v45  ;;  %v6931_v10 = vld [vmem:[%s10438_s14 + $0x38] sm:$0xff]  }
 0x4a8   :  { %v6399_v1 = vpop.f32.mrf.mxu0  ;;  %v7074_v35 = vpop.eup %7073  ;;  %6683 = vmatpush3.bf16.msra.mxu1 %v6931_v10 }
 0x4a9   :  { %6491 = vmatmul.mubr.msk.bf16.gmra.mxu1 %vm2095_vm2, %v2831_v21  ;;  %v2787_v30 = vmul.f32 %v7074_v35, %v9071_v61  ;;  %6684 = vmatprep.subr.bf16.mxu1 %v10508_v25 }
 0x4aa   :  { %v2580_v62 = vpop.f32.mrf.mxu0  ;;  %6603 = vmatmul.mubr.msk.bf16.gmra.mxu0 %vm162_vm1, %v10594_v28  ;;  %6494 = vmatprep.mubr.msk.bf16.mxu1 %vm7182_vm0, %v10508_v25 }
 0x4ab   :  { %6606 = vmatprep.mubr.msk.bf16.mxu0 %vm7182_vm0, %v10508_v25  ;;  %7081 = vrcp.f32 %v2580_v62  ;;  %v10598_v62 = vld [vmem:[#allocation15_spill] sm:$0xff] }
 0x4ac   :  { %v7076_v8 = vpop.eup %7075  ;;  %v6402_v27 = vpop.f32.mrf.mxu0  ;;  %v10600_v55 = vpack.c.bf16 %v10598_v62, %v10599_v36 }
 0x4ad   :  { %v2788_v44 = vmul.f32 %v7076_v8, %v9074_v14  ;;  %v6932_v27 = vld [vmem:[%s10438_s14 + $0x30] sm:$0xff]  }
 0x4ae   :  { %v2583_v17 = vpop.f32.mrf.mxu0  ;;  %6685 = vmatpush3.bf16.msra.mxu1 %v6932_v27  ;;  %v6937_v27 = vld [vmem:[%s10438_s14 + $0x8] sm:$0xff]  }
 0x4af   :  { %7083 = vrcp.f32 %v2583_v17  ;;  %v2832_v24 = vpack.c.bf16 %v2788_v44, %v2787_v30  ;;  %6686 = vmatprep.subr.bf16.mxu1 %v10508_v25 }
 0x4b0   :  { %v6403_v38 = vpop.f32.mrf.mxu0  ;;  %v7078_v58 = vpop.eup %7077 }
 0x4b1   :  { %6495 = vmatmul.mubr.msk.bf16.gmra.mxu1 %vm2095_vm2, %v2832_v24  ;;  %v2789_v43 = vmul.f32 %v7078_v58, %v9084_v63  ;;  %v6933_v24 = vld [vmem:[%s10438_s14 + $0x28] sm:$0xff]   ;;  %v10602_v58 = vld [vmem:[#allocation16_spill] sm:$0xff] }
 0x4b2   :  { %v2588_v23 = vpop.f32.mrf.mxu0  ;;  %6607 = vmatmul.mubr.msk.bf16.gmra.mxu0 %vm162_vm1, %v10597_v52  ;;  %6498 = vmatprep.mubr.msk.bf16.mxu1 %vm7182_vm0, %v10508_v25 }
 0x4b3   :  { %6610 = vmatprep.mubr.msk.bf16.mxu0 %vm7182_vm0, %v10508_v25  ;;  %7085 = vrcp.f32 %v2588_v23  ;;  %6687 = vmatpush3.bf16.msra.mxu1 %v6933_v24 }
 0x4b4   :  { %v7080_v61 = vpop.eup %7079  ;;  %v6406_v14 = vpop.f32.mrf.mxu0  ;;  %6688 = vmatprep.subr.bf16.mxu1 %v10508_v25 }
 0x4b5   :  { %v2790_v45 = vmul.f32 %v7080_v61, %v9087_v15  ;;  %v6934_v14 = vld [vmem:[%s10438_s14 + $0x20] sm:$0xff]  }
 0x4b6   :  { %v2591_v57 = vpop.f32.mrf.mxu0 }
 0x4b7   :  { %7087 = vrcp.f32 %v2591_v57  ;;  %v2833_v31 = vpack.c.bf16 %v2790_v45, %v2789_v43  ;;  %6689 = vmatpush3.bf16.msra.mxu1 %v6934_v14  ;;  %v10610_v14 = vld [vmem:[#allocation23_spill] sm:$0xff] }
 0x4b8   :  { %v6407_v21 = vpop.f32.mrf.mxu0  ;;  %v7082_v1 = vpop.eup %7081  ;;  %6690 = vmatprep.subr.bf16.mxu1 %v10508_v25 }
 0x4b9   :  { %6499 = vmatmul.mubr.msk.bf16.gmra.mxu1 %vm2095_vm2, %v2833_v31  ;;  %v2791_v28 = vmul.f32 %v7082_v1, %v9095_v49  ;;  %v6935_v31 = vld [vmem:[%s10438_s14 + $0x18] sm:$0xff]   ;;  %v10605_v21 = vld [vmem:[#allocation18_spill] sm:$0xff] }
 0x4ba   :  { %v2596_v35 = vpop.f32.mrf.mxu0  ;;  %6611 = vmatmul.mubr.msk.bf16.gmra.mxu0 %vm162_vm1, %v10600_v55  ;;  %6502 = vmatprep.mubr.msk.bf16.mxu1 %vm7182_vm0, %v10508_v25 }
 0x4bb   :  { %6614 = vmatprep.mubr.msk.bf16.mxu0 %vm7182_vm0, %v10508_v25  ;;  %7089 = vrcp.f32 %v2596_v35  ;;  %6691 = vmatpush3.bf16.msra.mxu1 %v6935_v31 }
 0x4bc   :  { %v7084_v63 = vpop.eup %7083  ;;  %v6410_v15 = vpop.f32.mrf.mxu0  ;;  %6692 = vmatprep.subr.bf16.mxu1 %v10508_v25 }
 0x4bd   :  { %v2792_v8 = vmul.f32 %v7084_v63, %v9098_v18  ;;  %v10601_v18 = vld [vmem:[#allocation17_spill] sm:$0xff]  ;;  %v6936_v63 = vld [vmem:[%s10438_s14 + $0x10] sm:$0xff]  }
 0x4be   :  { %v2599_v30 = vpop.f32.mrf.mxu0  ;;  %v10603_v23 = vpack.c.bf16 %v10601_v18, %v10602_v58  ;;  %v6938_v58 = vld [vmem:[%s10438_s14] sm:$0xff]  }
 0x4bf   :  { %7091 = vrcp.f32 %v2599_v30  ;;  %v2834_v44 = vpack.c.bf16 %v2792_v8, %v2791_v28  ;;  %6693 = vmatpush3.bf16.msra.mxu1 %v6936_v63 }
 0x4c0   :  { %v6411_v17 = vpop.f32.mrf.mxu0  ;;  %v7086_v49 = vpop.eup %7085  ;;  %6694 = vmatprep.subr.bf16.mxu1 %v10508_v25 }
 0x4c1   :  { %6503 = vmatmul.mubr.msk.bf16.gmra.mxu1 %vm2095_vm2, %v2834_v44  ;;  %v2793_v52 = vmul.f32 %v7086_v49, %v9110_v3  ;;  %v10608_v44 = vld [vmem:[#allocation20_spill] sm:$0xff] }
 0x4c2   :  { %v2604_v38 = vpop.f32.mrf.mxu0  ;;  %6615 = vmatmul.mubr.msk.bf16.gmra.mxu0 %vm162_vm1, %v10603_v23  ;;  %6506 = vmatprep.mubr.msk.bf16.mxu1 %vm7182_vm0, %v10508_v25 }
 0x4c3   :  { %6618 = vmatprep.mubr.msk.bf16.mxu0 %vm7182_vm0, %v10508_v25  ;;  %7093 = vrcp.f32 %v2604_v38  ;;  %6695 = vmatpush3.bf16.msra.mxu1 %v6937_v27 }
 0x4c4   :  { %v7088_v59 = vpop.eup %7087  ;;  %v6414_v50 = vpop.f32.mrf.mxu0  ;;  %6696 = vmatprep.subr.bf16.mxu1 %v10508_v25 }
 0x4c5   :  { %v2794_v61 = vmul.f32 %v7088_v59, %v9113_v29  ;;  %v10604_v29 = vld [vmem:[#allocation19_spill] sm:$0xff] }
 0x4c6   :  { %v2607_v43 = vpop.f32.mrf.mxu0  ;;  %v10606_v1 = vpack.c.bf16 %v10604_v29, %v10605_v21 }
 0x4c7   :  { %7095 = vrcp.f32 %v2607_v43  ;;  %v2835_v45 = vpack.c.bf16 %v2794_v61, %v2793_v52  ;;  %6697 = vmatpush3.bf16.msra.mxu1 %v6938_v58  ;;  %v10611_v43 = vld [vmem:[#allocation22_spill] sm:$0xff] }
 0x4c8   :  { %v6415_v57 = vpop.f32.mrf.mxu0  ;;  %v7090_v3 = vpop.eup %7089 }
 0x4c9   :  { %6507 = vmatmul.mubr.msk.bf16.gmra.mxu1 %vm2095_vm2, %v2835_v45  ;;  %v2795_v36 = vmul.f32 %v7090_v3, %v9121_v32  ;;  %v10612_v45 = vpack.c.bf16 %v10610_v14, %v10611_v43 }
 0x4ca   :  { %v2612_v10 = vpop.f32.mrf.mxu0  ;;  %6619 = vmatmul.mubr.msk.bf16.gmra.mxu0 %vm162_vm1, %v10606_v1  ;;  %6510 = vmatprep.mubr.msk.bf16.mxu1 %vm7182_vm0, %v10508_v25 }
 0x4cb   :  { %6622 = vmatprep.mubr.msk.bf16.mxu0 %vm7182_vm0, %v10508_v25  ;;  %7097 = vrcp.f32 %v2612_v10 }
 0x4cc   :  { %v7092_v35 = vpop.eup %7091  ;;  %v6418_v62 = vpop.f32.mrf.mxu0 }
 0x4cd   :  { %v2796_v55 = vmul.f32 %v7092_v35, %v9124_v5  ;;  %v10607_v5 = vld [vmem:[#allocation21_spill] sm:$0xff]  ;;  %v10614_v62 = vld [vmem:[#allocation24_spill] sm:$0xff] }
 0x4ce   :  { %v2615_v15 = vpop.f32.mrf.mxu0  ;;  %v10609_v17 = vpack.c.bf16 %v10607_v5, %v10608_v44  ;;  %v10613_v35 = vld [vmem:[#allocation25_spill] sm:$0xff]  ;;  %v10617_v5 = vld [vmem:[#allocation26_spill] sm:$0xff] }
 0x4cf   :  { %7099 = vrcp.f32 %v2615_v15  ;;  %v2836_v28 = vpack.c.bf16 %v2796_v55, %v2795_v36  ;;  %v10615_v36 = vpack.c.bf16 %v10613_v35, %v10614_v62 }
 0x4d0   :  { %v6419_v8 = vpop.f32.mrf.mxu0  ;;  %v7094_v32 = vpop.eup %7093 }
 0x4d1   :  { %6511 = vmatmul.mubr.msk.bf16.gmra.mxu1 %vm2095_vm2, %v2836_v28  ;;  %v2797_v38 = vmul.f32 %v7094_v32, %v9132_v4 }
 0x4d2   :  { %v2620_v30 = vpop.f32.mrf.mxu0  ;;  %6623 = vmatmul.mubr.msk.bf16.gmra.mxu0 %vm162_vm1, %v10609_v17  ;;  %6514 = vmatprep.mubr.msk.bf16.mxu1 %vm7182_vm0, %v10508_v25 }
 0x4d3   :  { %6626 = vmatprep.mubr.msk.bf16.mxu0 %vm7182_vm0, %v10508_v25  ;;  %7101 = vrcp.f32 %v2620_v30  ;;  %v10616_v30 = vld [vmem:[#allocation27_spill] sm:$0xff] }
 0x4d4   :  { %v7096_v24 = vpop.eup %7095  ;;  %v6422_v49 = vpop.f32.mrf.mxu0  ;;  %v10618_v44 = vpack.c.bf16 %v10616_v30, %v10617_v5 }
 0x4d5   :  { %v2798_v18 = vmul.f32 %v7096_v24, %v9135_v60 }
 0x4d6   :  { %v2623_v23 = vpop.f32.mrf.mxu0 }
 0x4d7   :  { %7103 = vrcp.f32 %v2623_v23  ;;  %v2837_v59 = vpack.c.bf16 %v2798_v18, %v2797_v38 }
 0x4d8   :  { %v6423_v50 = vpop.f32.mrf.mxu0  ;;  %v7098_v52 = vpop.eup %7097 }
 0x4d9   :  { %6515 = vmatmul.mubr.msk.bf16.gmra.mxu1 %vm2095_vm2, %v2837_v59  ;;  %v2799_v57 = vmul.f32 %v7098_v52, %v9143_v42  ;;  %v10619_v59 = vld [vmem:[#allocation29_spill] sm:$0xff]  ;;  %v10620_v50 = vld [vmem:[#allocation28_spill] sm:$0xff] }
 0x4da   :  { %v2628_v61 = vpop.f32.mrf.mxu0  ;;  %6627 = vmatmul.mubr.msk.bf16.gmra.mxu0 %vm162_vm1, %v10612_v45  ;;  %6518 = vmatprep.mubr.msk.bf16.mxu1 %vm7182_vm0, %v10508_v25  ;;  %v10621_v52 = vpack.c.bf16 %v10619_v59, %v10620_v50  ;;  %v10631_v59 = vld [vmem:[#allocation36_spill] sm:$0xff]  ;;  %v10632_v50 = vld [vmem:[#allocation5_spill] sm:$0xff] }
 0x4db   :  { %6630 = vmatprep.mubr.msk.bf16.mxu0 %vm7182_vm0, %v10508_v25  ;;  %7105 = vrcp.f32 %v2628_v61 }
 0x4dc   :  { %v7100_v4 = vpop.eup %7099  ;;  %v6426_v60 = vpop.f32.mrf.mxu0 }
 0x4dd   :  { %v2800_v31 = vmul.f32 %v7100_v4, %v9146_v22 }
 0x4de   :  { %v2631_v3 = vpop.f32.mrf.mxu0 }
 0x4df   :  { %7107 = vrcp.f32 %v2631_v3  ;;  %v2838_v10 = vpack.c.bf16 %v2800_v31, %v2799_v57  ;;  %v10622_v31 = vld [vmem:[#allocation31_spill] sm:$0xff]  ;;  %v10623_v3 = vld [vmem:[#allocation30_spill] sm:$0xff] }
 0x4e0   :  { %v6427_v29 = vpop.f32.mrf.mxu0  ;;  %v7102_v21 = vpop.eup %7101 }
 0x4e1   :  { %6519 = vmatmul.mubr.msk.bf16.gmra.mxu1 %vm2095_vm2, %v2838_v10  ;;  %v2801_v55 = vmul.f32 %v7102_v21, %v9154_v51  ;;  %v10624_v10 = vpack.c.bf16 %v10622_v31, %v10623_v3 }
 0x4e2   :  { %v2636_v1 = vpop.f32.mrf.mxu0  ;;  %6631 = vmatmul.mubr.msk.bf16.gmra.mxu0 %vm162_vm1, %v10615_v36  ;;  %6522 = vmatprep.mubr.msk.bf16.mxu1 %vm7182_vm0, %v10508_v25 }
 0x4e3   :  { %6634 = vmatprep.mubr.msk.bf16.mxu0 %vm7182_vm0, %v10508_v25  ;;  %7109 = vrcp.f32 %v2636_v1 }
 0x4e4   :  { %v7104_v42 = vpop.eup %7103  ;;  %v6430_v22 = vpop.f32.mrf.mxu0 }
 0x4e5   :  { %v2802_v63 = vmul.f32 %v7104_v42, %v9157_v41  ;;  %v10625_v22 = vld [vmem:[#allocation33_spill] sm:$0xff] }
 0x4e6   :  { %v2639_v15 = vpop.f32.mrf.mxu0 }
 0x4e7   :  { %7111 = vrcp.f32 %v2639_v15  ;;  %v2839_v28 = vpack.c.bf16 %v2802_v63, %v2801_v55  ;;  %v10626_v55 = vld [vmem:[#allocation32_spill] sm:$0xff] }
 0x4e8   :  { %v6431_v8 = vpop.f32.mrf.mxu0  ;;  %v7106_v27 = vpop.eup %7105  ;;  %v10627_v63 = vpack.c.bf16 %v10625_v22, %v10626_v55 }
 0x4e9   :  { %6523 = vmatmul.mubr.msk.bf16.gmra.mxu1 %vm2095_vm2, %v2839_v28  ;;  %v2803_v17 = vmul.f32 %v7106_v27, %v9165_v6 }
 0x4ea   :  { %v2644_v32 = vpop.f32.mrf.mxu0  ;;  %6635 = vmatmul.mubr.msk.bf16.gmra.mxu0 %vm162_vm1, %v10618_v44  ;;  %6526 = vmatprep.mubr.msk.bf16.mxu1 %vm7182_vm0, %v10508_v25  ;;  %v10628_v44 = vld [vmem:[#allocation35_spill] sm:$0xff] }
 0x4eb   :  { %6638 = vmatprep.mubr.msk.bf16.mxu0 %vm7182_vm0, %v10508_v25  ;;  %7113 = vrcp.f32 %v2644_v32 }
 0x4ec   :  { %v7108_v51 = vpop.eup %7107  ;;  %v6434_v41 = vpop.f32.mrf.mxu0 }
 0x4ed   :  { %v2804_v24 = vmul.f32 %v7108_v51, %v9168_v12  ;;  %v10629_v51 = vld [vmem:[#allocation34_spill] sm:$0xff] }
 0x4ee   :  { %v2647_v49 = vpop.f32.mrf.mxu0  ;;  %v10630_v41 = vpack.c.bf16 %v10628_v44, %v10629_v51 }
 0x4ef   :  { %7115 = vrcp.f32 %v2647_v49  ;;  %v2840_v38 = vpack.c.bf16 %v2804_v24, %v2803_v17 }
 0x4f0   :  { %v6435_v18 = vpop.f32.mrf.mxu0  ;;  %v7110_v58 = vpop.eup %7109 }
 0x4f1   :  { %6527 = vmatmul.mubr.msk.bf16.gmra.mxu1 %vm2095_vm2, %v2840_v38  ;;  %v2805_v61 = vmul.f32 %v7110_v58, %v9176_v0 }
 0x4f2   :  { %v2652_v23 = vpop.f32.mrf.mxu0  ;;  %6639 = vmatmul.mubr.msk.bf16.gmra.mxu0 %vm162_vm1, %v10621_v52  ;;  %6530 = vmatprep.mubr.msk.bf16.mxu1 %vm7182_vm0, %v10508_v25  ;;  %v10633_v52 = vpack.c.bf16 %v10631_v59, %v10632_v50 }
 0x4f3   :  { %6642 = vmatprep.mubr.msk.bf16.mxu0 %vm7182_vm0, %v10508_v25  ;;  %7117 = vrcp.f32 %v2652_v23 }
 0x4f4   :  { %v7112_v6 = vpop.eup %7111  ;;  %v6438_v12 = vpop.f32.mrf.mxu0 }
 0x4f5   :  { %v2806_v14 = vmul.f32 %v7112_v6, %v9179_v9 }
 0x4f6   :  { %v2655_v43 = vpop.f32.mrf.mxu0 }
 0x4f7   :  { %7119 = vrcp.f32 %v2655_v43  ;;  %v2841_v45 = vpack.c.bf16 %v2806_v14, %v2805_v61 }
 0x4f8   :  { %v6439_v4 = vpop.f32.mrf.mxu0  ;;  %v7114_v60 = vpop.eup %7113 }
 0x4f9   :  { %6531 = vmatmul.mubr.msk.bf16.gmra.mxu1 %vm2095_vm2, %v2841_v45  ;;  %v2807_v29 = vmul.f32 %v7114_v60, %v9187_v33  ;;  %v10634_v60 = vld [vmem:[#allocation6_spill] sm:$0xff] }
 0x4fa   :  { %v2660_v57 = vpop.f32.mrf.mxu0  ;;  %6643 = vmatmul.mubr.msk.bf16.gmra.mxu0 %vm162_vm1, %v10624_v10  ;;  %6534 = vmatprep.mubr.msk.bf16.mxu1 %vm7182_vm0, %v10508_v25 }
 0x4fb   :  { %6646 = vmatprep.mubr.msk.bf16.mxu0 %vm7182_vm0, %v10508_v25  ;;  %7121 = vrcp.f32 %v2660_v57  ;;  %v10635_v57 = vld [vmem:[#allocation7_spill] sm:$0xff] }
 0x4fc   :  { %v7116_v0 = vpop.eup %7115  ;;  %v6442_v9 = vpop.f32.mrf.mxu0  ;;  %v10636_v31 = vpack.c.bf16 %v10634_v60, %v10635_v57 }
 0x4fd   :  { %v2808_v21 = vmul.f32 %v7116_v0, %v9190_v16 }
 0x4fe   :  { %v2663_v1 = vpop.f32.mrf.mxu0 }
 0x4ff   :  { %7123 = vrcp.f32 %v2663_v1  ;;  %v2842_v35 = vpack.c.bf16 %v2808_v21, %v2807_v29 }
 0x500   :  { %v6443_v62 = vpop.f32.mrf.mxu0  ;;  %v7118_v36 = vpop.eup %7117 }
 0x501   :  { %6535 = vmatmul.mubr.msk.bf16.gmra.mxu1 %vm2095_vm2, %v2842_v35  ;;  %v2809_v15 = vmul.f32 %v7118_v36, %v9198_v47  ;;  %v10637_v35 = vld [vmem:[#allocation38_spill] sm:$0xff]  ;;  %v10638_v62 = vld [vmem:[#allocation37_spill] sm:$0xff] }
 0x502   :  { %v2668_v42 = vpop.f32.mrf.mxu0  ;;  %6647 = vmatmul.mubr.msk.bf16.gmra.mxu0 %vm162_vm1, %v10627_v63  ;;  %6538 = vmatprep.mubr.msk.bf16.mxu1 %vm7182_vm0, %v10508_v25  ;;  %v10639_v36 = vpack.c.bf16 %v10637_v35, %v10638_v62  ;;  %v10651_v35 = vld [vmem:[#allocation49_spill] sm:$0xff] }
 0x503   :  { %6650 = vmatprep.mubr.msk.bf16.mxu0 %vm7182_vm0, %v10508_v25  ;;  %7125 = vrcp.f32 %v2668_v42 }
 0x504   :  { %v7120_v33 = vpop.eup %7119  ;;  %v6446_v16 = vpop.f32.mrf.mxu0 }
 0x505   :  { %v2810_v28 = vmul.f32 %v7120_v33, %v9201_v20 }
 0x506   :  { %v2671_v8 = vpop.f32.mrf.mxu0 }
 0x507   :  { %7127 = vrcp.f32 %v2671_v8  ;;  %v2843_v27 = vpack.c.bf16 %v2810_v28, %v2809_v15  ;;  %v10640_v28 = vld [vmem:[#allocation40_spill] sm:$0xff]  ;;  %v10641_v8 = vld [vmem:[#allocation39_spill] sm:$0xff] }
 0x508   :  { %v6447_v32 = vpop.f32.mrf.mxu0  ;;  %v7122_v30 = vpop.eup %7121 }
 0x509   :  { %6539 = vmatmul.mubr.msk.bf16.gmra.mxu1 %vm2095_vm2, %v2843_v27  ;;  %v2811_v17 = vmul.f32 %v7122_v30, %v9209_v34  ;;  %v10642_v27 = vpack.c.bf16 %v10640_v28, %v10641_v8 }
 0x50a   :  { %v2676_v5 = vpop.f32.mrf.mxu0  ;;  %6651 = vmatmul.mubr.msk.bf16.gmra.mxu0 %vm162_vm1, %v10630_v41  ;;  %6542 = vmatprep.mubr.msk.bf16.mxu1 %vm7182_vm0, %v10508_v25 }
 0x50b   :  { %6654 = vmatprep.mubr.msk.bf16.mxu0 %vm7182_vm0, %v10508_v25  ;;  %7129 = vrcp.f32 %v2676_v5 }
 0x50c   :  { %v7124_v47 = vpop.eup %7123  ;;  %v6450_v20 = vpop.f32.mrf.mxu0 }
 0x50d   :  { %v2812_v24 = vmul.f32 %v7124_v47, %v9212_v37  ;;  %v10643_v20 = vld [vmem:[#allocation42_spill] sm:$0xff] }
 0x50e   :  { %v2679_v49 = vpop.f32.mrf.mxu0 }
 0x50f   :  { %7131 = vrcp.f32 %v2679_v49  ;;  %v2844_v38 = vpack.c.bf16 %v2812_v24, %v2811_v17  ;;  %v10644_v17 = vld [vmem:[#allocation41_spill] sm:$0xff] }
 0x510   :  { %v6451_v18 = vpop.f32.mrf.mxu0  ;;  %v7126_v58 = vpop.eup %7125  ;;  %v10645_v24 = vpack.c.bf16 %v10643_v20, %v10644_v17 }
 0x511   :  { %6543 = vmatmul.mubr.msk.bf16.gmra.mxu1 %vm2095_vm2, %v2844_v38  ;;  %v2813_v6 = vmul.f32 %v7126_v58, %v9220_v39 }
 0x512   :  { %v2684_v23 = vpop.f32.mrf.mxu0  ;;  %6655 = vmatmul.mubr.msk.bf16.gmra.mxu0 %vm162_vm1, %v10633_v52  ;;  %6546 = vmatprep.mubr.msk.bf16.mxu1 %vm7182_vm0, %v10508_v25  ;;  %v10646_v52 = vld [vmem:[#allocation44_spill] sm:$0xff] }
 0x513   :  { %6658 = vmatprep.mubr.msk.bf16.mxu0 %vm7182_vm0, %v10508_v25  ;;  %7133 = vrcp.f32 %v2684_v23 }
 0x514   :  { %v7128_v34 = vpop.eup %7127  ;;  %v6454_v37 = vpop.f32.mrf.mxu0 }
 0x515   :  { %v2814_v12 = vmul.f32 %v7128_v34, %v9223_v48  ;;  %v10647_v34 = vld [vmem:[#allocation43_spill] sm:$0xff] }
 0x516   :  { %v2687_v61 = vpop.f32.mrf.mxu0  ;;  %v10648_v37 = vpack.c.bf16 %v10646_v52, %v10647_v34 }
 0x517   :  { %7135 = vrcp.f32 %v2687_v61  ;;  %v2845_v14 = vpack.c.bf16 %v2814_v12, %v2813_v6  ;;  %v10649_v6 = vld [vmem:[#allocation45_spill] sm:$0xff] }
 0x518   :  { %v6455_v43 = vpop.f32.mrf.mxu0  ;;  %v7130_v45 = vpop.eup %7129 }
 0x519   :  { %6547 = vmatmul.mubr.msk.bf16.gmra.mxu1 %vm2095_vm2, %v2845_v14  ;;  %v2815_v3 = vmul.f32 %v7130_v45, %v9231_v53 }
 0x51a   :  { %v2692_v4 = vpop.f32.mrf.mxu0  ;;  %6659 = vmatmul.mubr.msk.bf16.gmra.mxu0 %vm162_vm1, %v10636_v31  ;;  %6550 = vmatprep.mubr.msk.bf16.mxu1 %vm7182_vm0, %v10508_v25 }
 0x51b   :  { %6662 = vmatprep.mubr.msk.bf16.mxu0 %vm7182_vm0, %v10508_v25  ;;  %7137 = vrcp.f32 %v2692_v4 }
 0x51c   :  { %v7132_v39 = vpop.eup %7131  ;;  %v6458_v48 = vpop.f32.mrf.mxu0 }
 0x51d   :  { %v2816_v10 = vmul.f32 %v7132_v39, %v9234_v11 }
 0x51e   :  { %v2695_v0 = vpop.f32.mrf.mxu0 }
 0x51f   :  { %7139 = vrcp.f32 %v2695_v0  ;;  %v2846_v9 = vpack.c.bf16 %v2816_v10, %v2815_v3  ;;  %v10650_v3 = vld [vmem:[#allocation48_spill] sm:$0xff] }
 0x520   :  { %v6459_v29 = vpop.f32.mrf.mxu0  ;;  %v7134_v21 = vpop.eup %7133 }
 0x521   :  { %6551 = vmatmul.mubr.msk.bf16.gmra.mxu1 %vm2095_vm2, %v2846_v9  ;;  %v2817_v42 = vmul.f32 %v7134_v21, %v9242_v13 }
 0x522   :  { %v2700_v1 = vpop.f32.mrf.mxu0  ;;  %6663 = vmatmul.mubr.msk.bf16.gmra.mxu0 %vm162_vm1, %v10639_v36  ;;  %6554 = vmatprep.mubr.msk.bf16.mxu1 %vm7182_vm0, %v10508_v25 }
 0x523   :  { %6666 = vmatprep.mubr.msk.bf16.mxu0 %vm7182_vm0, %v10508_v25  ;;  %7141 = vrcp.f32 %v2700_v1 }
 0x524   :  { %v7136_v53 = vpop.eup %7135  ;;  %v6462_v11 = vpop.f32.mrf.mxu0 }
 0x525   :  { %v2818_v22 = vmul.f32 %v7136_v53, %v9245_v56 }
 0x526   :  { %v2703_v55 = vpop.f32.mrf.mxu0 }
 0x527   :  { %7143 = vrcp.f32 %v2703_v55  ;;  %v2847_v63 = vpack.c.bf16 %v2818_v22, %v2817_v42 }
 0x528   :  { %v6463_v33 = vpop.f32.mrf.mxu0  ;;  %v7138_v16 = vpop.eup %7137 }
 0x529   :  { %6555 = vmatmul.mubr.msk.bf16.gmra.mxu1 %vm2095_vm2, %v2847_v63  ;;  %v2819_v32 = vmul.f32 %v7138_v16, %v9253_v46 }
 0x52a   :  { %v2708_v15 = vpop.f32.mrf.mxu0  ;;  %6667 = vmatmul.mubr.msk.bf16.gmra.mxu0 %vm162_vm1, %v10642_v27  ;;  %6558 = vmatprep.mubr.msk.bf16.mxu1 %vm7182_vm0, %v10508_v25 }
 0x52b   :  { %6670 = vmatprep.mubr.msk.bf16.mxu0 %vm7182_vm0, %v10508_v25  ;;  %7145 = vrcp.f32 %v2708_v15 }
 0x52c   :  { %v7140_v13 = vpop.eup %7139  ;;  %v6466_v56 = vpop.f32.mrf.mxu0 }
 0x52d   :  { %v2820_v30 = vmul.f32 %v7140_v13, %v9256_v54 }
 0x52e   :  { %v2711_v5 = vpop.f32.mrf.mxu0 }
 0x52f   :  { %7147 = vrcp.f32 %v2711_v5  ;;  %v2848_v44 = vpack.c.bf16 %v2820_v30, %v2819_v32 }
 0x530   :  { %v6467_v51 = vpop.f32.mrf.mxu0  ;;  %v7142_v41 = vpop.eup %7141 }
 0x531   :  { %6559 = vmatmul.mubr.msk.bf16.gmra.mxu1 %vm2095_vm2, %v2848_v44  ;;  %v2821_v49 = vmul.f32 %v7142_v41, %v9264_v40 }
 0x532   :  { %v2716_v47 = vpop.f32.mrf.mxu0  ;;  %6671 = vmatmul.mubr.msk.bf16.gmra.mxu0 %vm162_vm1, %v10645_v24  ;;  %6562 = vmatprep.mubr.msk.bf16.mxu1 %vm7182_vm0, %v10508_v25 }
 0x533   :  { %6674 = vmatprep.mubr.msk.bf16.mxu0 %vm7182_vm0, %v10508_v25  ;;  %7149 = vrcp.f32 %v2716_v47 }
 0x534   :  { %v7144_v46 = vpop.eup %7143  ;;  %v6470_v54 = vpop.f32.mrf.mxu0 }
 0x535   :  { %v2822_v38 = vmul.f32 %v7144_v46, %v9267_v7  ;;  %v7158_v7 = vld [vmem:[%s10430_s6] ss:$0 sm:$0xff] }
 0x536   :  { %v2719_v18 = vpop.f32.mrf.mxu0  ;;  %v975_v12 = vadd.f32 %v7158_v7, %v10649_v6 }
 0x537   :  { %7151 = vrcp.f32 %v2719_v18  ;;  %v2849_v58 = vpack.c.bf16 %v2822_v38, %v2821_v49 }
 0x538   :  { %v6471_v23 = vpop.f32.mrf.mxu0  ;;  %v7146_v59 = vpop.eup %7145  ;;  %v3192_v60 = vpack.c.bf16 %v975_v12, %v975_v12 }
 0x539   :  { %6563 = vmatmul.mubr.msk.bf16.gmra.mxu1 %vm2095_vm2, %v2849_v58  ;;  %v2823_v14 = vmul.f32 %v7146_v59, %v9275_v2 }
 0x53a   :  { %v2724_v50 = vpop.f32.mrf.mxu0  ;;  %6675 = vmatmul.mubr.msk.bf16.gmra.mxu0 %vm162_vm1, %v10648_v37  ;;  %6566 = vmatprep.mubr.msk.bf16.mxu1 %vm7182_vm0, %v10508_v25 }
 0x53b   :  { %7153 = vrcp.f32 %v2724_v50  ;;  %6678 = vmatprep.mubr.msk.bf16.mxu0 %vm7182_vm0, %v10508_v25 }
 0x53c   :  { %v7148_v40 = vpop.eup %7147  ;;  %v6474_v61 = vpop.f32.mrf.mxu0 }
 0x53d   :  { %v2824_v43 = vmul.f32 %v7148_v40, %v9277_v19 }
 0x53e   :  { %v2727_v45 = vpop.f32.mrf.mxu0 }
 0x53f   :  { %v2850_v4 = vpack.c.bf16 %v2824_v43, %v2823_v14 }
 0x540   :  { %v6475_v57 = vpop.f32.mrf.mxu0  ;;  %v7150_v31 = vpop.eup %7149 }
 0x541   :  { %6567 = vmatmul.mubr.msk.bf16.gmra.mxu1 %vm2095_vm2, %v2850_v4  ;;  %v2825_v19 = vmul.f32 %v7150_v31, %v9284_v26 }
 0x542   :  { %v3302_v39 = vpop.f32.mrf.mxu0  ;;  %6679 = vmatmul.mubr.msk.bf16.gmra.mxu0 %vm162_vm1, %v3192_v60  ;;  %6570 = vmatprep.mubr.msk.bf16.mxu1 %vm7182_vm0, %v10508_v25 }
 0x543   :  { %6802 = vmatprep.mubr.msk.bf16.mxu0 %vm7182_vm0, %v10508_v25 }
 0x544   :  { %v7152_v48 = vpop.eup %7151  ;;  %v6584_v2 = vpop.f32.mrf.mxu0 }
 0x545   :  { %v2826_v10 = vmul.f32 %v7152_v48, %v10650_v3 }
 0x546   :  { %v3305_v0 = vpop.f32.mrf.mxu0 }
 0x547   :  { %v2851_v9 = vpack.c.bf16 %v2826_v10, %v2825_v19 }
 0x548   :  { %v7154_v29 = vpop.eup %7153  ;;  %v6585_v21 = vpop.f32.mrf.mxu0 }
 0x549   :  { %6571 = vmatmul.mubr.msk.bf16.gmra.mxu1 %vm2095_vm2, %v2851_v9  ;;  %v2827_v62 = vmul.f32 %v7154_v29, %v10651_v35 }
 0x54a   :  { %v3310_v1 = vpop.f32.mrf.mxu0  ;;  %6574 = vmatprep.mubr.msk.bf16.mxu1 %vm7182_vm0, %v10508_v25 }
 0x54b   :  { %v2852_v11 = vpack.c.bf16 %v2827_v62, %v2827_v62 }
 0x54c   :  { %v6588_v36 = vpop.f32.mrf.mxu0 }
 0x54e   :  { %v3313_v53 = vpop.f32.mrf.mxu0 }
 0x550   :  { %v6589_v42 = vpop.f32.mrf.mxu0 }
 0x551   :  { %v2970_v22 = vpop.f32.mrf.mxu1  ;;  %6575 = vmatmul.mubr.msk.bf16.gmra.mxu1 %vm2095_vm2, %v2852_v11 }
 0x552   :  { %v3318_v26 = vpop.f32.mrf.mxu0  ;;  %6698 = vmatprep.mubr.msk.bf16.mxu1 %vm7182_vm0, %v10508_v25  ;;  %v3500_v16 = vmul.f32 %v3302_v39, %v2970_v22 }
 0x553   :  { %v6480_v55 = vpop.f32.mrf.mxu1 }
 0x554   :  { %v6592_v63 = vpop.f32.mrf.mxu0 }
 0x555   :  { %v2973_v33 = vpop.f32.mrf.mxu1  ;;  %v6939_v63 = vld [vmem:[%s10431_s7 + $0x8] sm:$0xff]  }
 0x556   :  { %v3501_v15 = vmul.f32 %v3305_v0, %v2973_v33  ;;  %v3321_v28 = vpop.f32.mrf.mxu0  ;;  %6799 = vmatpush3.bf16.msra.mxu0 %v6939_v63 }
 0x557   :  { %v6481_v8 = vpop.f32.mrf.mxu1  ;;  %6800 = vmatprep.subr.bf16.mxu0 %v10508_v25 }
 0x558   :  { %v3549_v27 = vpack.c.bf16 %v3501_v15, %v3500_v16  ;;  %v6593_v13 = vpop.f32.mrf.mxu0 }
 0x559   :  { %v2978_v56 = vpop.f32.mrf.mxu1 }
 0x55a   :  { %v3326_v32 = vpop.f32.mrf.mxu0  ;;  %6699 = vmatmul.mubr.bf16.vlgmr.msra.gmra.mxu1 %v3549_v27  ;;  %v3502_v51 = vmul.f32 %v3310_v1, %v2978_v56 }
 0x55b   :  { %v6484_v30 = vpop.f32.mrf.mxu1  ;;  %6702 = vmatprep.mubr.msk.bf16.mxu1 %vm7182_vm0, %v10508_v25 }
 0x55c   :  { %v6596_v5 = vpop.f32.mrf.mxu0 }
 0x55d   :  { %v2981_v44 = vpop.f32.mrf.mxu1 }
 0x55e   :  { %v3503_v41 = vmul.f32 %v3313_v53, %v2981_v44  ;;  %v3329_v47 = vpop.f32.mrf.mxu0 }
 0x55f   :  { %v6485_v20 = vpop.f32.mrf.mxu1 }
 0x560   :  { %v3550_v17 = vpack.c.bf16 %v3503_v41, %v3502_v51  ;;  %v6597_v24 = vpop.f32.mrf.mxu0 }
 0x561   :  { %v2986_v46 = vpop.f32.mrf.mxu1 }
 0x562   :  { %v3334_v54 = vpop.f32.mrf.mxu0  ;;  %6703 = vmatmul.mubr.bf16.gmra.mxu1 %v3550_v17  ;;  %v3504_v58 = vmul.f32 %v3318_v26, %v2986_v46 }
 0x563   :  { %v6488_v49 = vpop.f32.mrf.mxu1  ;;  %6706 = vmatprep.mubr.msk.bf16.mxu1 %vm7182_vm0, %v10508_v25 }
 0x564   :  { %v6600_v38 = vpop.f32.mrf.mxu0 }
 0x565   :  { %v2989_v18 = vpop.f32.mrf.mxu1 }
 0x566   :  { %v3505_v23 = vmul.f32 %v3321_v28, %v2989_v18  ;;  %v3337_v59 = vpop.f32.mrf.mxu0 }
 0x567   :  { %v6489_v50 = vpop.f32.mrf.mxu1 }
 0x568   :  { %v3551_v52 = vpack.c.bf16 %v3505_v23, %v3504_v58  ;;  %v6601_v34 = vpop.f32.mrf.mxu0 }
 0x569   :  { %v2994_v37 = vpop.f32.mrf.mxu1 }
 0x56a   :  { %v3342_v40 = vpop.f32.mrf.mxu0  ;;  %6707 = vmatmul.mubr.bf16.gmra.mxu1 %v3551_v52  ;;  %v3506_v61 = vmul.f32 %v3326_v32, %v2994_v37 }
 0x56b   :  { %v6492_v7 = vpop.f32.mrf.mxu1  ;;  %6710 = vmatprep.mubr.msk.bf16.mxu1 %vm7182_vm0, %v10508_v25 }
 0x56c   :  { %v6604_v6 = vpop.f32.mrf.mxu0 }
 0x56d   :  { %v2997_v12 = vpop.f32.mrf.mxu1 }
 0x56e   :  { %v3507_v14 = vmul.f32 %v3329_v47, %v2997_v12  ;;  %v3345_v43 = vpop.f32.mrf.mxu0 }
 0x56f   :  { %v6493_v45 = vpop.f32.mrf.mxu1 }
 0x570   :  { %v3552_v4 = vpack.c.bf16 %v3507_v14, %v3506_v61  ;;  %v6605_v60 = vpop.f32.mrf.mxu0  ;;  %v6940_v45 = vld [vmem:[%s10431_s7] sm:$0xff]  }
 0x571   :  { %v3002_v57 = vpop.f32.mrf.mxu1  ;;  %6801 = vmatpush3.bf16.msra.mxu0 %v6940_v45 }
 0x572   :  { %v3350_v31 = vpop.f32.mrf.mxu0  ;;  %6711 = vmatmul.mubr.bf16.gmra.mxu1 %v3552_v4  ;;  %v3508_v19 = vmul.f32 %v3334_v54, %v3002_v57 }
 0x573   :  { %v6496_v39 = vpop.f32.mrf.mxu1  ;;  %6714 = vmatprep.mubr.msk.bf16.mxu1 %vm7182_vm0, %v10508_v25 }
 0x574   :  { %v6608_v48 = vpop.f32.mrf.mxu0 }
 0x575   :  { %v3005_v2 = vpop.f32.mrf.mxu1 }
 0x576   :  { %v3509_v3 = vmul.f32 %v3337_v59, %v3005_v2  ;;  %v3353_v10 = vpop.f32.mrf.mxu0 }
 0x577   :  { %v6497_v0 = vpop.f32.mrf.mxu1 }
 0x578   :  { %v3553_v9 = vpack.c.bf16 %v3509_v3, %v3508_v19  ;;  %v6609_v29 = vpop.f32.mrf.mxu0 }
 0x579   :  { %v3010_v21 = vpop.f32.mrf.mxu1 }
 0x57a   :  { %v3358_v1 = vpop.f32.mrf.mxu0  ;;  %6715 = vmatmul.mubr.bf16.gmra.mxu1 %v3553_v9  ;;  %v3510_v53 = vmul.f32 %v3342_v40, %v3010_v21 }
 0x57b   :  { %v6500_v35 = vpop.f32.mrf.mxu1  ;;  %6718 = vmatprep.mubr.msk.bf16.mxu1 %vm7182_vm0, %v10508_v25 }
 0x57c   :  { %v6612_v62 = vpop.f32.mrf.mxu0 }
 0x57d   :  { %v3013_v36 = vpop.f32.mrf.mxu1 }
 0x57e   :  { %v3511_v11 = vmul.f32 %v3345_v43, %v3013_v36  ;;  %v3361_v42 = vpop.f32.mrf.mxu0 }
 0x57f   :  { %v6501_v22 = vpop.f32.mrf.mxu1 }
 0x580   :  { %v3554_v26 = vpack.c.bf16 %v3511_v11, %v3510_v53  ;;  %v6613_v55 = vpop.f32.mrf.mxu0 }
 0x581   :  { %v3018_v33 = vpop.f32.mrf.mxu1 }
 0x582   :  { %v3366_v16 = vpop.f32.mrf.mxu0  ;;  %6719 = vmatmul.mubr.bf16.gmra.mxu1 %v3554_v26  ;;  %v3512_v27 = vmul.f32 %v3350_v31, %v3018_v33 }
 0x583   :  { %v6504_v15 = vpop.f32.mrf.mxu1  ;;  %6722 = vmatprep.mubr.msk.bf16.mxu1 %vm7182_vm0, %v10508_v25 }
 0x584   :  { %v6616_v28 = vpop.f32.mrf.mxu0 }
 0x585   :  { %v3021_v8 = vpop.f32.mrf.mxu1 }
 0x586   :  { %v3513_v13 = vmul.f32 %v3353_v10, %v3021_v8  ;;  %v3369_v56 = vpop.f32.mrf.mxu0 }
 0x587   :  { %v6505_v32 = vpop.f32.mrf.mxu1 }
 0x588   :  { %v3555_v30 = vpack.c.bf16 %v3513_v13, %v3512_v27  ;;  %v6617_v5 = vpop.f32.mrf.mxu0 }
 0x589   :  { %v3026_v44 = vpop.f32.mrf.mxu1 }
 0x58a   :  { %v3374_v51 = vpop.f32.mrf.mxu0  ;;  %6723 = vmatmul.mubr.bf16.gmra.mxu1 %v3555_v30  ;;  %v3514_v17 = vmul.f32 %v3358_v1, %v3026_v44 }
 0x58b   :  { %v6508_v41 = vpop.f32.mrf.mxu1  ;;  %6726 = vmatprep.mubr.msk.bf16.mxu1 %vm7182_vm0, %v10508_v25 }
 0x58c   :  { %v6620_v47 = vpop.f32.mrf.mxu0 }
 0x58d   :  { %v3029_v20 = vpop.f32.mrf.mxu1 }
 0x58e   :  { %v3515_v24 = vmul.f32 %v3361_v42, %v3029_v20  ;;  %v3377_v46 = vpop.f32.mrf.mxu0 }
 0x58f   :  { %v6509_v54 = vpop.f32.mrf.mxu1 }
 0x590   :  { %v3556_v49 = vpack.c.bf16 %v3515_v24, %v3514_v17  ;;  %v6621_v38 = vpop.f32.mrf.mxu0 }
 0x591   :  { %v3034_v18 = vpop.f32.mrf.mxu1 }
 0x592   :  { %v3382_v58 = vpop.f32.mrf.mxu0  ;;  %6727 = vmatmul.mubr.bf16.gmra.mxu1 %v3556_v49  ;;  %v3516_v52 = vmul.f32 %v3366_v16, %v3034_v18 }
 0x593   :  { %v6512_v23 = vpop.f32.mrf.mxu1  ;;  %6730 = vmatprep.mubr.msk.bf16.mxu1 %vm7182_vm0, %v10508_v25 }
 0x594   :  { %v6624_v59 = vpop.f32.mrf.mxu0 }
 0x595   :  { %v3037_v50 = vpop.f32.mrf.mxu1 }
 0x596   :  { %v3517_v34 = vmul.f32 %v3369_v56, %v3037_v50  ;;  %v3385_v37 = vpop.f32.mrf.mxu0 }
 0x597   :  { %v6513_v40 = vpop.f32.mrf.mxu1 }
 0x598   :  { %v3557_v7 = vpack.c.bf16 %v3517_v34, %v3516_v52  ;;  %v6625_v6 = vpop.f32.mrf.mxu0 }
 0x599   :  { %v3042_v12 = vpop.f32.mrf.mxu1 }
 0x59a   :  { %v3390_v61 = vpop.f32.mrf.mxu0  ;;  %6731 = vmatmul.mubr.bf16.gmra.mxu1 %v3557_v7  ;;  %v3518_v60 = vmul.f32 %v3374_v51, %v3042_v12 }
 0x59b   :  { %v6516_v14 = vpop.f32.mrf.mxu1  ;;  %6734 = vmatprep.mubr.msk.bf16.mxu1 %vm7182_vm0, %v10508_v25 }
 0x59c   :  { %v6628_v43 = vpop.f32.mrf.mxu0 }
 0x59d   :  { %v3045_v4 = vpop.f32.mrf.mxu1 }
 0x59e   :  { %v3519_v57 = vmul.f32 %v3377_v46, %v3045_v4  ;;  %v3393_v31 = vpop.f32.mrf.mxu0 }
 0x59f   :  { %v6517_v39 = vpop.f32.mrf.mxu1 }
 0x5a0   :  { %v3558_v48 = vpack.c.bf16 %v3519_v57, %v3518_v60  ;;  %v6629_v2 = vpop.f32.mrf.mxu0 }
 0x5a1   :  { %v3050_v19 = vpop.f32.mrf.mxu1 }
 0x5a2   :  { %v3398_v3 = vpop.f32.mrf.mxu0  ;;  %6735 = vmatmul.mubr.bf16.gmra.mxu1 %v3558_v48  ;;  %v3520_v29 = vmul.f32 %v3382_v58, %v3050_v19 }
 0x5a3   :  { %v6520_v10 = vpop.f32.mrf.mxu1  ;;  %6738 = vmatprep.mubr.msk.bf16.mxu1 %vm7182_vm0, %v10508_v25 }
 0x5a4   :  { %v6632_v0 = vpop.f32.mrf.mxu0 }
 0x5a5   :  { %v3053_v9 = vpop.f32.mrf.mxu1 }
 0x5a6   :  { %v3521_v21 = vmul.f32 %v3385_v37, %v3053_v9  ;;  %v3401_v1 = vpop.f32.mrf.mxu0 }
 0x5a7   :  { %v6521_v35 = vpop.f32.mrf.mxu1 }
 0x5a8   :  { %v3559_v62 = vpack.c.bf16 %v3521_v21, %v3520_v29  ;;  %v6633_v36 = vpop.f32.mrf.mxu0 }
 0x5a9   :  { %v3058_v53 = vpop.f32.mrf.mxu1 }
 0x5aa   :  { %v3406_v11 = vpop.f32.mrf.mxu0  ;;  %6739 = vmatmul.mubr.bf16.gmra.mxu1 %v3559_v62  ;;  %v3522_v55 = vmul.f32 %v3390_v61, %v3058_v53 }
 0x5ab   :  { %v6524_v42 = vpop.f32.mrf.mxu1  ;;  %6742 = vmatprep.mubr.msk.bf16.mxu1 %vm7182_vm0, %v10508_v25 }
 0x5ac   :  { %v6636_v22 = vpop.f32.mrf.mxu0 }
 0x5ad   :  { %v3061_v26 = vpop.f32.mrf.mxu1 }
 0x5ae   :  { %v3523_v63 = vmul.f32 %v3393_v31, %v3061_v26  ;;  %v3409_v33 = vpop.f32.mrf.mxu0 }
 0x5af   :  { %v6525_v16 = vpop.f32.mrf.mxu1 }
 0x5b0   :  { %v3560_v15 = vpack.c.bf16 %v3523_v63, %v3522_v55  ;;  %v6637_v28 = vpop.f32.mrf.mxu0 }
 0x5b1   :  { %v3066_v8 = vpop.f32.mrf.mxu1 }
 0x5b2   :  { %v3414_v27 = vpop.f32.mrf.mxu0  ;;  %6743 = vmatmul.mubr.bf16.gmra.mxu1 %v3560_v15  ;;  %v3524_v30 = vmul.f32 %v3398_v3, %v3066_v8 }
 0x5b3   :  { %v6528_v13 = vpop.f32.mrf.mxu1  ;;  %6746 = vmatprep.mubr.msk.bf16.mxu1 %vm7182_vm0, %v10508_v25 }
 0x5b4   :  { %v6640_v56 = vpop.f32.mrf.mxu0 }
 0x5b5   :  { %v3069_v32 = vpop.f32.mrf.mxu1 }
 0x5b6   :  { %v3525_v5 = vmul.f32 %v3401_v1, %v3069_v32  ;;  %v3417_v44 = vpop.f32.mrf.mxu0 }
 0x5b7   :  { %v6529_v51 = vpop.f32.mrf.mxu1 }
 0x5b8   :  { %v3561_v41 = vpack.c.bf16 %v3525_v5, %v3524_v30  ;;  %v6641_v47 = vpop.f32.mrf.mxu0 }
 0x5b9   :  { %v3074_v20 = vpop.f32.mrf.mxu1 }
 0x5ba   :  { %v3422_v17 = vpop.f32.mrf.mxu0  ;;  %6747 = vmatmul.mubr.bf16.gmra.mxu1 %v3561_v41  ;;  %v3526_v49 = vmul.f32 %v3406_v11, %v3074_v20 }
 0x5bb   :  { %v6532_v24 = vpop.f32.mrf.mxu1  ;;  %6750 = vmatprep.mubr.msk.bf16.mxu1 %vm7182_vm0, %v10508_v25 }
 0x5bc   :  { %v6644_v46 = vpop.f32.mrf.mxu0 }
 0x5bd   :  { %v3077_v54 = vpop.f32.mrf.mxu1 }
 0x5be   :  { %v3527_v38 = vmul.f32 %v3409_v33, %v3077_v54  ;;  %v3425_v18 = vpop.f32.mrf.mxu0 }
 0x5bf   :  { %v6533_v58 = vpop.f32.mrf.mxu1 }
 0x5c0   :  { %v3562_v23 = vpack.c.bf16 %v3527_v38, %v3526_v49  ;;  %v6645_v59 = vpop.f32.mrf.mxu0 }
 0x5c1   :  { %v3082_v50 = vpop.f32.mrf.mxu1 }
 0x5c2   :  { %v3430_v52 = vpop.f32.mrf.mxu0  ;;  %6751 = vmatmul.mubr.bf16.gmra.mxu1 %v3562_v23  ;;  %v3528_v7 = vmul.f32 %v3414_v27, %v3082_v50 }
 0x5c3   :  { %v6536_v34 = vpop.f32.mrf.mxu1  ;;  %6754 = vmatprep.mubr.msk.bf16.mxu1 %vm7182_vm0, %v10508_v25 }
 0x5c4   :  { %v6648_v37 = vpop.f32.mrf.mxu0 }
 0x5c5   :  { %v3085_v40 = vpop.f32.mrf.mxu1 }
 0x5c6   :  { %v3529_v6 = vmul.f32 %v3417_v44, %v3085_v40  ;;  %v3433_v12 = vpop.f32.mrf.mxu0 }
 0x5c7   :  { %v6537_v61 = vpop.f32.mrf.mxu1 }
 0x5c8   :  { %v3563_v14 = vpack.c.bf16 %v3529_v6, %v3528_v7  ;;  %v6649_v43 = vpop.f32.mrf.mxu0 }
 0x5c9   :  { %v3090_v45 = vpop.f32.mrf.mxu1 }
 0x5ca   :  { %v3438_v4 = vpop.f32.mrf.mxu0  ;;  %6755 = vmatmul.mubr.bf16.gmra.mxu1 %v3563_v14  ;;  %v3530_v39 = vmul.f32 %v3422_v17, %v3090_v45 }
 0x5cb   :  { %v6540_v60 = vpop.f32.mrf.mxu1  ;;  %6758 = vmatprep.mubr.msk.bf16.mxu1 %vm7182_vm0, %v10508_v25 }
 0x5cc   :  { %v6652_v57 = vpop.f32.mrf.mxu0 }
 0x5cd   :  { %v3093_v31 = vpop.f32.mrf.mxu1 }
 0x5ce   :  { %v3531_v48 = vmul.f32 %v3425_v18, %v3093_v31  ;;  %v3441_v2 = vpop.f32.mrf.mxu0 }
 0x5cf   :  { %v6541_v19 = vpop.f32.mrf.mxu1 }
 0x5d0   :  { %v3564_v3 = vpack.c.bf16 %v3531_v48, %v3530_v39  ;;  %v6653_v10 = vpop.f32.mrf.mxu0 }
 0x5d1   :  { %v3098_v0 = vpop.f32.mrf.mxu1 }
 0x5d2   :  { %v3446_v9 = vpop.f32.mrf.mxu0  ;;  %6759 = vmatmul.mubr.bf16.gmra.mxu1 %v3564_v3  ;;  %v3532_v35 = vmul.f32 %v3430_v52, %v3098_v0 }
 0x5d3   :  { %v6544_v29 = vpop.f32.mrf.mxu1  ;;  %6762 = vmatprep.mubr.msk.bf16.mxu1 %vm7182_vm0, %v10508_v25 }
 0x5d4   :  { %v6656_v21 = vpop.f32.mrf.mxu0 }
 0x5d5   :  { %v3101_v1 = vpop.f32.mrf.mxu1 }
 0x5d6   :  { %v3533_v62 = vmul.f32 %v3433_v12, %v3101_v1  ;;  %v3449_v36 = vpop.f32.mrf.mxu0 }
 0x5d7   :  { %v6545_v53 = vpop.f32.mrf.mxu1 }
 0x5d8   :  { %v3565_v11 = vpack.c.bf16 %v3533_v62, %v3532_v35  ;;  %v6657_v42 = vpop.f32.mrf.mxu0 }
 0x5d9   :  { %v3106_v22 = vpop.f32.mrf.mxu1 }
 0x5da   :  { %v3454_v26 = vpop.f32.mrf.mxu0  ;;  %6763 = vmatmul.mubr.bf16.gmra.mxu1 %v3565_v11  ;;  %v3534_v16 = vmul.f32 %v3438_v4, %v3106_v22 }
 0x5db   :  { %v6548_v55 = vpop.f32.mrf.mxu1  ;;  %6766 = vmatprep.mubr.msk.bf16.mxu1 %vm7182_vm0, %v10508_v25 }
 0x5dc   :  { %v6660_v63 = vpop.f32.mrf.mxu0 }
 0x5dd   :  { %v3109_v33 = vpop.f32.mrf.mxu1 }
 0x5de   :  { %v3535_v15 = vmul.f32 %v3441_v2, %v3109_v33  ;;  %v3457_v28 = vpop.f32.mrf.mxu0 }
 0x5df   :  { %v6549_v8 = vpop.f32.mrf.mxu1 }
 0x5e0   :  { %v3566_v27 = vpack.c.bf16 %v3535_v15, %v3534_v16  ;;  %v6661_v13 = vpop.f32.mrf.mxu0 }
 0x5e1   :  { %v3114_v56 = vpop.f32.mrf.mxu1 }
 0x5e2   :  { %v3462_v32 = vpop.f32.mrf.mxu0  ;;  %6767 = vmatmul.mubr.bf16.gmra.mxu1 %v3566_v27  ;;  %v3536_v51 = vmul.f32 %v3446_v9, %v3114_v56 }
 0x5e3   :  { %v6552_v30 = vpop.f32.mrf.mxu1  ;;  %6770 = vmatprep.mubr.msk.bf16.mxu1 %vm7182_vm0, %v10508_v25 }
 0x5e4   :  { %v6664_v5 = vpop.f32.mrf.mxu0 }
 0x5e5   :  { %v3117_v44 = vpop.f32.mrf.mxu1 }
 0x5e6   :  { %v3537_v41 = vmul.f32 %v3449_v36, %v3117_v44  ;;  %v3465_v47 = vpop.f32.mrf.mxu0 }
 0x5e7   :  { %v6553_v20 = vpop.f32.mrf.mxu1 }
 0x5e8   :  { %v3567_v17 = vpack.c.bf16 %v3537_v41, %v3536_v51  ;;  %v6665_v24 = vpop.f32.mrf.mxu0 }
 0x5e9   :  { %v3122_v46 = vpop.f32.mrf.mxu1 }
 0x5ea   :  { %v3470_v54 = vpop.f32.mrf.mxu0  ;;  %6771 = vmatmul.mubr.bf16.gmra.mxu1 %v3567_v17  ;;  %v3538_v58 = vmul.f32 %v3454_v26, %v3122_v46 }
 0x5eb   :  { %v6556_v49 = vpop.f32.mrf.mxu1  ;;  %6774 = vmatprep.mubr.msk.bf16.mxu1 %vm7182_vm0, %v10508_v25 }
 0x5ec   :  { %v6668_v38 = vpop.f32.mrf.mxu0 }
 0x5ed   :  { %v3125_v18 = vpop.f32.mrf.mxu1 }
 0x5ee   :  { %v3539_v23 = vmul.f32 %v3457_v28, %v3125_v18  ;;  %v3473_v59 = vpop.f32.mrf.mxu0 }
 0x5ef   :  { %v6557_v50 = vpop.f32.mrf.mxu1 }
 0x5f0   :  { %v3568_v52 = vpack.c.bf16 %v3539_v23, %v3538_v58  ;;  %v6669_v34 = vpop.f32.mrf.mxu0 }
 0x5f1   :  { %v3130_v37 = vpop.f32.mrf.mxu1 }
 0x5f2   :  { %v3478_v40 = vpop.f32.mrf.mxu0  ;;  %6775 = vmatmul.mubr.bf16.gmra.mxu1 %v3568_v52  ;;  %v3540_v61 = vmul.f32 %v3462_v32, %v3130_v37 }
 0x5f3   :  { %v6560_v7 = vpop.f32.mrf.mxu1  ;;  %6778 = vmatprep.mubr.msk.bf16.mxu1 %vm7182_vm0, %v10508_v25 }
 0x5f4   :  { %v6672_v6 = vpop.f32.mrf.mxu0 }
 0x5f5   :  { %v3133_v12 = vpop.f32.mrf.mxu1 }
 0x5f6   :  { %v3541_v14 = vmul.f32 %v3465_v47, %v3133_v12  ;;  %v3481_v43 = vpop.f32.mrf.mxu0 }
 0x5f7   :  { %v6561_v45 = vpop.f32.mrf.mxu1 }
 0x5f8   :  { %v3569_v4 = vpack.c.bf16 %v3541_v14, %v3540_v61  ;;  %v6673_v60 = vpop.f32.mrf.mxu0 }
 0x5f9   :  { %v3138_v57 = vpop.f32.mrf.mxu1 }
 0x5fa   :  { %v3486_v31 = vpop.f32.mrf.mxu0  ;;  %6779 = vmatmul.mubr.bf16.gmra.mxu1 %v3569_v4  ;;  %v3542_v19 = vmul.f32 %v3470_v54, %v3138_v57 }
 0x5fb   :  { %v6564_v39 = vpop.f32.mrf.mxu1  ;;  %6782 = vmatprep.mubr.msk.bf16.mxu1 %vm7182_vm0, %v10508_v25 }
 0x5fc   :  { %v6676_v48 = vpop.f32.mrf.mxu0  ;;  %v6943_v39 = vld [vmem:[%s10439_s15 + $0x14] ss:$8 sps:$4 sm:$0xff]  }
 0x5fd   :  { %v3141_v2 = vpop.f32.mrf.mxu1  ;;  %4361 = vmatprep.subr.bf16.mxu1 %v6943_v39 }
 0x5fe   :  { %v3543_v3 = vmul.f32 %v3473_v59, %v3141_v2  ;;  %v3489_v10 = vpop.f32.mrf.mxu0 }
 0x5ff   :  { %v6565_v0 = vpop.f32.mrf.mxu1 }
 0x600   :  { %v3570_v9 = vpack.c.bf16 %v3543_v3, %v3542_v19  ;;  %v6677_v29 = vpop.f32.mrf.mxu0 }
 0x601   :  { %v3146_v21 = vpop.f32.mrf.mxu1 }
 0x602   :  { %v3494_v1 = vpop.f32.mrf.mxu0  ;;  %6783 = vmatmul.mubr.bf16.gmra.mxu1 %v3570_v9  ;;  %v3544_v53 = vmul.f32 %v3478_v40, %v3146_v21 }
 0x603   :  { %v6568_v35 = vpop.f32.mrf.mxu1  ;;  %6786 = vmatprep.mubr.msk.bf16.mxu1 %vm7182_vm0, %v10508_v25 }
 0x604   :  { %v6680_v62 = vpop.f32.mrf.mxu0 }
 0x605   :  { %v3149_v36 = vpop.f32.mrf.mxu1 }
 0x606   :  { %v3545_v11 = vmul.f32 %v3481_v43, %v3149_v36  ;;  %v3497_v42 = vpop.f32.mrf.mxu0 }
 0x607   :  { %v6569_v22 = vpop.f32.mrf.mxu1 }
 0x608   :  { %v3571_v26 = vpack.c.bf16 %v3545_v11, %v3544_v53  ;;  %v6681_v55 = vpop.f32.mrf.mxu0 }
 0x609   :  { %v3154_v63 = vpop.f32.mrf.mxu1  ;;  %v6946_v55 = vld [vmem:[%s10439_s15 + $0x4] ss:$8 sps:$4 sm:$0xff]  }
 0x60a   :  { %6787 = vmatmul.mubr.bf16.gmra.mxu1 %v3571_v26  ;;  %v3546_v15 = vmul.f32 %v3486_v31, %v3154_v63  ;;  %v6941_v31 = vld [vmem:[%s10439_s15 + $0x10] ss:$8 sps:$4 sm:$0xff]   ;;  %v6944_v63 = vld [vmem:[%s10439_s15] ss:$8 sps:$4 sm:$0xff]  }
 0x60b   :  { %v6572_v33 = vpop.f32.mrf.mxu1  ;;  %6790 = vmatprep.mubr.msk.bf16.mxu1 %vm7182_vm0, %v10508_v25  ;;  %4362 = vmatpush1.bf16.msra.mxu1 %v6941_v31 }
 0x60c   :  { %4363 = vmatprep.subr.bf16.mxu1 %v6946_v55 }
 0x60d   :  { %v3157_v16 = vpop.f32.mrf.mxu1 }
 0x60e   :  { %v3547_v28 = vmul.f32 %v3489_v10, %v3157_v16 }
 0x60f   :  { %v6573_v8 = vpop.f32.mrf.mxu1  ;;  %4364 = vmatpush1.bf16.msra.mxu1 %v6944_v63 }
 0x610   :  { %v3572_v27 = vpack.c.bf16 %v3547_v28, %v3546_v15  ;;  %v7183_v28 = vmov 0  }
 0x611   :  { %v3162_v13 = vpop.f32.mrf.mxu1 }
 0x612   :  { %6791 = vmatmul.mubr.bf16.gmra.mxu1 %v3572_v27  ;;  %v3548_v32 = vmul.f32 %v3494_v1, %v3162_v13 }
 0x613   :  { %v6576_v56 = vpop.f32.mrf.mxu1  ;;  %6794 = vmatprep.mubr.msk.bf16.mxu1 %vm7182_vm0, %v10508_v25 }
 0x614   :  { %v3573_v44 = vpack.c.bf16 %v3548_v32, %v3548_v32 }
 0x615   :  { %v3165_v30 = vpop.f32.mrf.mxu1 }
 0x617   :  { %v6577_v5 = vpop.f32.mrf.mxu1 }
 0x61a   :  { %v3672_v51 = vpop.f32.mrf.mxu1  ;;  %6795 = vmatmul.mubr.bf16.gmra.mxu1 %v3573_v44 }
 0x61b   :  { %4381 = vmatprep.mubr.bf16.mxu1 %v7183_v28 }
 0x61c   :  { %v6700_v41 = vpop.f32.mrf.mxu1 }
 0x61e   :  { %v3675_v47 = vpop.f32.mrf.mxu1 }
 0x61f   :  { %v3870_v20 = vpack.c.bf16 %v3675_v47, %v3672_v51 }
 0x620   :  { %v6701_v17 = vpop.f32.mrf.mxu1 }
 0x621   :  { %6803 = vmatmul.mubr.msk.bf16.vlgmr.msra.gmra.mxu0 %vm162_vm1, %v3870_v20 }
 0x622   :  { %v3680_v24 = vpop.f32.mrf.mxu1  ;;  %6806 = vmatprep.mubr.msk.bf16.mxu0 %vm7182_vm0, %v10508_v25 }
 0x624   :  { %v6704_v46 = vpop.f32.mrf.mxu1 }
 0x626   :  { %v3683_v54 = vpop.f32.mrf.mxu1 }
 0x627   :  { %v3871_v49 = vpack.c.bf16 %v3683_v54, %v3680_v24 }
 0x628   :  { %v6705_v38 = vpop.f32.mrf.mxu1 }
 0x629   :  { %6807 = vmatmul.mubr.msk.bf16.gmra.mxu0 %vm162_vm1, %v3871_v49 }
 0x62a   :  { %v3688_v18 = vpop.f32.mrf.mxu1  ;;  %6810 = vmatprep.mubr.msk.bf16.mxu0 %vm7182_vm0, %v10508_v25 }
 0x62c   :  { %v6708_v58 = vpop.f32.mrf.mxu1 }
 0x62e   :  { %v3691_v23 = vpop.f32.mrf.mxu1 }
 0x62f   :  { %v3872_v59 = vpack.c.bf16 %v3691_v23, %v3688_v18 }
 0x630   :  { %v6709_v50 = vpop.f32.mrf.mxu1 }
 0x631   :  { %6811 = vmatmul.mubr.msk.bf16.gmra.mxu0 %vm162_vm1, %v3872_v59 }
 0x632   :  { %v3696_v52 = vpop.f32.mrf.mxu1  ;;  %6814 = vmatprep.mubr.msk.bf16.mxu0 %vm7182_vm0, %v10508_v25 }
 0x634   :  { %v6712_v34 = vpop.f32.mrf.mxu1 }
 0x636   :  { %v3699_v37 = vpop.f32.mrf.mxu1 }
 0x637   :  { %v3873_v40 = vpack.c.bf16 %v3699_v37, %v3696_v52 }
 0x638   :  { %v6713_v7 = vpop.f32.mrf.mxu1 }
 0x639   :  { %6815 = vmatmul.mubr.msk.bf16.gmra.mxu0 %vm162_vm1, %v3873_v40 }
 0x63a   :  { %v3704_v6 = vpop.f32.mrf.mxu1  ;;  %6818 = vmatprep.mubr.msk.bf16.mxu0 %vm7182_vm0, %v10508_v25 }
 0x63c   :  { %v6716_v12 = vpop.f32.mrf.mxu1 }
 0x63e   :  { %v3707_v61 = vpop.f32.mrf.mxu1 }
 0x63f   :  { %v3874_v14 = vpack.c.bf16 %v3707_v61, %v3704_v6 }
 0x640   :  { %v6717_v43 = vpop.f32.mrf.mxu1 }
 0x641   :  { %6819 = vmatmul.mubr.msk.bf16.gmra.mxu0 %vm162_vm1, %v3874_v14 }
 0x642   :  { %v3712_v45 = vpop.f32.mrf.mxu1  ;;  %6822 = vmatprep.mubr.msk.bf16.mxu0 %vm7182_vm0, %v10508_v25 }
 0x644   :  { %v6720_v4 = vpop.f32.mrf.mxu1 }
 0x646   :  { %v3715_v60 = vpop.f32.mrf.mxu1 }
 0x647   :  { %v3875_v57 = vpack.c.bf16 %v3715_v60, %v3712_v45 }
 0x648   :  { %v6721_v48 = vpop.f32.mrf.mxu1 }
 0x649   :  { %6823 = vmatmul.mubr.msk.bf16.gmra.mxu0 %vm162_vm1, %v3875_v57 }
 0x64a   :  { %v3720_v2 = vpop.f32.mrf.mxu1  ;;  %6826 = vmatprep.mubr.msk.bf16.mxu0 %vm7182_vm0, %v10508_v25 }
 0x64c   :  { %v6724_v19 = vpop.f32.mrf.mxu1 }
 0x64e   :  { %v3723_v3 = vpop.f32.mrf.mxu1 }
 0x64f   :  { %v3876_v10 = vpack.c.bf16 %v3723_v3, %v3720_v2 }
 0x650   :  { %v6725_v0 = vpop.f32.mrf.mxu1 }
 0x651   :  { %6827 = vmatmul.mubr.msk.bf16.gmra.mxu0 %vm162_vm1, %v3876_v10 }
 0x652   :  { %v3728_v9 = vpop.f32.mrf.mxu1  ;;  %6830 = vmatprep.mubr.msk.bf16.mxu0 %vm7182_vm0, %v10508_v25 }
 0x654   :  { %v6728_v29 = vpop.f32.mrf.mxu1 }
 0x656   :  { %v3731_v21 = vpop.f32.mrf.mxu1 }
 0x657   :  { %v3877_v1 = vpack.c.bf16 %v3731_v21, %v3728_v9 }
 0x658   :  { %v6729_v35 = vpop.f32.mrf.mxu1 }
 0x659   :  { %6831 = vmatmul.mubr.msk.bf16.gmra.mxu0 %vm162_vm1, %v3877_v1 }
 0x65a   :  { %v3736_v62 = vpop.f32.mrf.mxu1  ;;  %6834 = vmatprep.mubr.msk.bf16.mxu0 %vm7182_vm0, %v10508_v25 }
 0x65c   :  { %v6732_v36 = vpop.f32.mrf.mxu1 }
 0x65e   :  { %v3739_v53 = vpop.f32.mrf.mxu1 }
 0x65f   :  { %v3878_v11 = vpack.c.bf16 %v3739_v53, %v3736_v62 }
 0x660   :  { %v6733_v42 = vpop.f32.mrf.mxu1 }
 0x661   :  { %6835 = vmatmul.mubr.msk.bf16.gmra.mxu0 %vm162_vm1, %v3878_v11 }
 0x662   :  { %v3744_v22 = vpop.f32.mrf.mxu1  ;;  %6838 = vmatprep.mubr.msk.bf16.mxu0 %vm7182_vm0, %v10508_v25 }
 0x664   :  { %v6736_v26 = vpop.f32.mrf.mxu1 }
 0x666   :  { %v3747_v33 = vpop.f32.mrf.mxu1 }
 0x667   :  { %v3879_v16 = vpack.c.bf16 %v3747_v33, %v3744_v22 }
 0x668   :  { %v6737_v15 = vpop.f32.mrf.mxu1 }
 0x669   :  { %6839 = vmatmul.mubr.msk.bf16.gmra.mxu0 %vm162_vm1, %v3879_v16 }
 0x66a   :  { %v3752_v8 = vpop.f32.mrf.mxu1  ;;  %6842 = vmatprep.mubr.msk.bf16.mxu0 %vm7182_vm0, %v10508_v25 }
 0x66c   :  { %v6740_v27 = vpop.f32.mrf.mxu1 }
 0x66e   :  { %v3755_v13 = vpop.f32.mrf.mxu1 }
 0x66f   :  { %v3880_v56 = vpack.c.bf16 %v3755_v13, %v3752_v8 }
 0x670   :  { %v6741_v32 = vpop.f32.mrf.mxu1 }
 0x671   :  { %6843 = vmatmul.mubr.msk.bf16.gmra.mxu0 %vm162_vm1, %v3880_v56 }
 0x672   :  { %v3760_v30 = vpop.f32.mrf.mxu1  ;;  %6846 = vmatprep.mubr.msk.bf16.mxu0 %vm7182_vm0, %v10508_v25 }
 0x674   :  { %v6744_v5 = vpop.f32.mrf.mxu1 }
 0x676   :  { %v3763_v44 = vpop.f32.mrf.mxu1 }
 0x677   :  { %v3881_v51 = vpack.c.bf16 %v3763_v44, %v3760_v30 }
 0x678   :  { %v6745_v41 = vpop.f32.mrf.mxu1 }
 0x679   :  { %6847 = vmatmul.mubr.msk.bf16.gmra.mxu0 %vm162_vm1, %v3881_v51 }
 0x67a   :  { %v3768_v47 = vpop.f32.mrf.mxu1  ;;  %6850 = vmatprep.mubr.msk.bf16.mxu0 %vm7182_vm0, %v10508_v25 }
 0x67c   :  { %v6748_v20 = vpop.f32.mrf.mxu1 }
 0x67e   :  { %v3771_v17 = vpop.f32.mrf.mxu1 }
 0x67f   :  { %v3882_v24 = vpack.c.bf16 %v3771_v17, %v3768_v47 }
 0x680   :  { %v6749_v46 = vpop.f32.mrf.mxu1 }
 0x681   :  { %6851 = vmatmul.mubr.msk.bf16.gmra.mxu0 %vm162_vm1, %v3882_v24  ;;  %v9750_v46 = vld [vmem:[%s10432_s8] ss:$0 sm:$0xff] }
 0x682   :  { %v3776_v54 = vpop.f32.mrf.mxu1  ;;  %6854 = vmatprep.mubr.msk.bf16.mxu0 %vm7182_vm0, %v10508_v25 }
 0x684   :  { %v6752_v49 = vpop.f32.mrf.mxu1 }
 0x686   :  { %v3779_v38 = vpop.f32.mrf.mxu1 }
 0x687   :  { %v3883_v18 = vpack.c.bf16 %v3779_v38, %v3776_v54 }
 0x688   :  { %v6753_v58 = vpop.f32.mrf.mxu1 }
 0x689   :  { %6855 = vmatmul.mubr.msk.bf16.gmra.mxu0 %vm162_vm1, %v3883_v18 }
 0x68a   :  { %v3784_v23 = vpop.f32.mrf.mxu1  ;;  %6858 = vmatprep.mubr.msk.bf16.mxu0 %vm7182_vm0, %v10508_v25 }
 0x68c   :  { %v6756_v59 = vpop.f32.mrf.mxu1 }
 0x68e   :  { %v3787_v50 = vpop.f32.mrf.mxu1 }
 0x68f   :  { %v3884_v52 = vpack.c.bf16 %v3787_v50, %v3784_v23 }
 0x690   :  { %v6757_v34 = vpop.f32.mrf.mxu1 }
 0x691   :  { %6859 = vmatmul.mubr.msk.bf16.gmra.mxu0 %vm162_vm1, %v3884_v52 }
 0x692   :  { %v3792_v37 = vpop.f32.mrf.mxu1  ;;  %6862 = vmatprep.mubr.msk.bf16.mxu0 %vm7182_vm0, %v10508_v25 }
 0x694   :  { %v6760_v40 = vpop.f32.mrf.mxu1 }
 0x696   :  { %v3795_v7 = vpop.f32.mrf.mxu1 }
 0x697   :  { %v3885_v6 = vpack.c.bf16 %v3795_v7, %v3792_v37 }
 0x698   :  { %v6761_v12 = vpop.f32.mrf.mxu1 }
 0x699   :  { %6863 = vmatmul.mubr.msk.bf16.gmra.mxu0 %vm162_vm1, %v3885_v6 }
 0x69a   :  { %v3800_v61 = vpop.f32.mrf.mxu1  ;;  %6866 = vmatprep.mubr.msk.bf16.mxu0 %vm7182_vm0, %v10508_v25 }
 0x69c   :  { %v6764_v14 = vpop.f32.mrf.mxu1 }
 0x69e   :  { %v3803_v43 = vpop.f32.mrf.mxu1 }
 0x69f   :  { %v3886_v45 = vpack.c.bf16 %v3803_v43, %v3800_v61 }
 0x6a0   :  { %v6765_v4 = vpop.f32.mrf.mxu1 }
 0x6a1   :  { %6867 = vmatmul.mubr.msk.bf16.gmra.mxu0 %vm162_vm1, %v3886_v45 }
 0x6a2   :  { %v3808_v60 = vpop.f32.mrf.mxu1  ;;  %6870 = vmatprep.mubr.msk.bf16.mxu0 %vm7182_vm0, %v10508_v25 }
 0x6a4   :  { %v6768_v57 = vpop.f32.mrf.mxu1 }
 0x6a6   :  { %v3811_v31 = vpop.f32.mrf.mxu1 }
 0x6a7   :  { %v3887_v39 = vpack.c.bf16 %v3811_v31, %v3808_v60 }
 0x6a8   :  { %v6769_v48 = vpop.f32.mrf.mxu1 }
 0x6a9   :  { %6871 = vmatmul.mubr.msk.bf16.gmra.mxu0 %vm162_vm1, %v3887_v39 }
 0x6aa   :  { %v3816_v2 = vpop.f32.mrf.mxu1  ;;  %6874 = vmatprep.mubr.msk.bf16.mxu0 %vm7182_vm0, %v10508_v25 }
 0x6ac   :  { %v6772_v19 = vpop.f32.mrf.mxu1 }
 0x6ae   :  { %v3819_v3 = vpop.f32.mrf.mxu1 }
 0x6af   :  { %v3888_v10 = vpack.c.bf16 %v3819_v3, %v3816_v2 }
 0x6b0   :  { %v6773_v0 = vpop.f32.mrf.mxu1 }
 0x6b1   :  { %6875 = vmatmul.mubr.msk.bf16.gmra.mxu0 %vm162_vm1, %v3888_v10 }
 0x6b2   :  { %v3824_v9 = vpop.f32.mrf.mxu1  ;;  %6878 = vmatprep.mubr.msk.bf16.mxu0 %vm7182_vm0, %v10508_v25 }
 0x6b4   :  { %v6776_v29 = vpop.f32.mrf.mxu1 }
 0x6b6   :  { %v3827_v21 = vpop.f32.mrf.mxu1 }
 0x6b7   :  { %v3889_v1 = vpack.c.bf16 %v3827_v21, %v3824_v9 }
 0x6b8   :  { %v6777_v35 = vpop.f32.mrf.mxu1 }
 0x6b9   :  { %6879 = vmatmul.mubr.msk.bf16.gmra.mxu0 %vm162_vm1, %v3889_v1 }
 0x6ba   :  { %v3832_v62 = vpop.f32.mrf.mxu1  ;;  %6882 = vmatprep.mubr.msk.bf16.mxu0 %vm7182_vm0, %v10508_v25 }
 0x6bc   :  { %v6780_v36 = vpop.f32.mrf.mxu1 }
 0x6be   :  { %v3835_v53 = vpop.f32.mrf.mxu1 }
 0x6bf   :  { %v3890_v11 = vpack.c.bf16 %v3835_v53, %v3832_v62 }
 0x6c0   :  { %v6781_v42 = vpop.f32.mrf.mxu1 }
 0x6c1   :  { %6883 = vmatmul.mubr.msk.bf16.gmra.mxu0 %vm162_vm1, %v3890_v11 }
 0x6c2   :  { %v3840_v22 = vpop.f32.mrf.mxu1  ;;  %6886 = vmatprep.mubr.msk.bf16.mxu0 %vm7182_vm0, %v10508_v25 }
 0x6c4   :  { %v6784_v26 = vpop.f32.mrf.mxu1 }
 0x6c6   :  { %v3843_v55 = vpop.f32.mrf.mxu1 }
 0x6c7   :  { %v3891_v63 = vpack.c.bf16 %v3843_v55, %v3840_v22 }
 0x6c8   :  { %v6785_v33 = vpop.f32.mrf.mxu1 }
 0x6c9   :  { %6887 = vmatmul.mubr.msk.bf16.gmra.mxu0 %vm162_vm1, %v3891_v63 }
 0x6ca   :  { %v3848_v16 = vpop.f32.mrf.mxu1  ;;  %6890 = vmatprep.mubr.msk.bf16.mxu0 %vm7182_vm0, %v10508_v25 }
 0x6cc   :  { %v6788_v15 = vpop.f32.mrf.mxu1 }
 0x6ce   :  { %v3851_v8 = vpop.f32.mrf.mxu1 }
 0x6cf   :  { %v3892_v27 = vpack.c.bf16 %v3851_v8, %v3848_v16 }
 0x6d0   :  { %v6789_v13 = vpop.f32.mrf.mxu1 }
 0x6d1   :  { %6891 = vmatmul.mubr.msk.bf16.gmra.mxu0 %vm162_vm1, %v3892_v27 }
 0x6d2   :  { %v3856_v56 = vpop.f32.mrf.mxu1  ;;  %6894 = vmatprep.mubr.msk.bf16.mxu0 %vm7182_vm0, %v10508_v25 }
 0x6d4   :  { %v6792_v32 = vpop.f32.mrf.mxu1 }
 0x6d6   :  { %v3859_v30 = vpop.f32.mrf.mxu1 }
 0x6d7   :  { %v3893_v5 = vpack.c.bf16 %v3859_v30, %v3856_v56 }
 0x6d8   :  { %v6793_v44 = vpop.f32.mrf.mxu1 }
 0x6d9   :  { %6895 = vmatmul.mubr.msk.bf16.gmra.mxu0 %vm162_vm1, %v3893_v5 }
 0x6da   :  { %v3864_v51 = vpop.f32.mrf.mxu1  ;;  %6898 = vmatprep.mubr.msk.bf16.mxu0 %vm7182_vm0, %v10508_v25 }
 0x6db   :  { %v3894_v20 = vpack.c.bf16 %v3864_v51, %v3864_v51 }
 0x6dc   :  { %v6796_v41 = vpop.f32.mrf.mxu1 }
 0x6de   :  { %v3867_v47 = vpop.f32.mrf.mxu1 }
 0x6e0   :  { %v6797_v17 = vpop.f32.mrf.mxu1 }
 0x6e1   :  { %v4027_v24 = vpop.f32.mrf.mxu0  ;;  %6899 = vmatmul.mubr.msk.bf16.gmra.mxu0 %vm162_vm1, %v3894_v20 }
 0x6e2   :  { %v4028_v38 = vadd.f32 %v9750_v46, %v4027_v24 }
 0x6e3   :  { %v6804_v54 = vpop.f32.mrf.mxu0 }
 0x6e5   :  { %v4030_v49 = vpop.f32.mrf.mxu0 }
 0x6e6   :  { %v4031_v18 = vadd.f32 %v9750_v46, %v4030_v49 }
 0x6e7   :  { %v6805_v58 = vpop.f32.mrf.mxu0 }
 0x6e8   :  { %v4225_v25 = vpack.c.bf16 %v4031_v18, %v4028_v38 }
 0x6e9   :  { %v4035_v23 = vpop.f32.mrf.mxu0 }
 0x6ea   :  { %5391 = vmatmul.mubr.msk.bf16.vlgmr.msra.gmra.mxu1 %vm162_vm1, %v4225_v25  ;;  %v4036_v52 = vadd.f32 %v9750_v46, %v4035_v23 }
 0x6eb   :  { %v6808_v59 = vpop.f32.mrf.mxu0  ;;  %4391 = vmatprep.mubr.bf16.mxu1 %v7183_v28 }
 0x6ed   :  { %v4038_v50 = vpop.f32.mrf.mxu0 }
 0x6ee   :  { %v4039_v34 = vadd.f32 %v9750_v46, %v4038_v50 }
 0x6ef   :  { %v6809_v37 = vpop.f32.mrf.mxu0 }
 0x6f0   :  { %v4226_v40 = vpack.c.bf16 %v4039_v34, %v4036_v52 }
 0x6f1   :  { %v4043_v7 = vpop.f32.mrf.mxu0 }
 0x6f2   :  { %5392 = vmatmul.mubr.msk.bf16.gmra.mxu1 %vm162_vm1, %v4226_v40  ;;  %v4044_v61 = vadd.f32 %v9750_v46, %v4043_v7 }
 0x6f3   :  { %v6812_v6 = vpop.f32.mrf.mxu0  ;;  %4401 = vmatprep.mubr.bf16.mxu1 %v7183_v28 }
 0x6f5   :  { %v4046_v12 = vpop.f32.mrf.mxu0 }
 0x6f6   :  { %v4047_v14 = vadd.f32 %v9750_v46, %v4046_v12 }
 0x6f7   :  { %v6813_v43 = vpop.f32.mrf.mxu0 }
 0x6f8   :  { %v4227_v45 = vpack.c.bf16 %v4047_v14, %v4044_v61 }
 0x6f9   :  { %v4051_v4 = vpop.f32.mrf.mxu0 }
 0x6fa   :  { %5393 = vmatmul.mubr.msk.bf16.gmra.mxu1 %vm162_vm1, %v4227_v45  ;;  %v4052_v31 = vadd.f32 %v9750_v46, %v4051_v4 }
 0x6fb   :  { %v6816_v60 = vpop.f32.mrf.mxu0  ;;  %4411 = vmatprep.mubr.bf16.mxu1 %v7183_v28 }
 0x6fd   :  { %v4054_v57 = vpop.f32.mrf.mxu0 }
 0x6fe   :  { %v4055_v39 = vadd.f32 %v9750_v46, %v4054_v57 }
 0x6ff   :  { %v6817_v48 = vpop.f32.mrf.mxu0 }
 0x700   :  { %v4228_v2 = vpack.c.bf16 %v4055_v39, %v4052_v31 }
 0x701   :  { %v4059_v19 = vpop.f32.mrf.mxu0 }
 0x702   :  { %5394 = vmatmul.mubr.msk.bf16.gmra.mxu1 %vm162_vm1, %v4228_v2  ;;  %v4060_v0 = vadd.f32 %v9750_v46, %v4059_v19 }
 0x703   :  { %v6820_v3 = vpop.f32.mrf.mxu0  ;;  %4421 = vmatprep.mubr.bf16.mxu1 %v7183_v28 }
 0x705   :  { %v4062_v10 = vpop.f32.mrf.mxu0 }
 0x706   :  { %v4063_v9 = vadd.f32 %v9750_v46, %v4062_v10 }
 0x707   :  { %v6821_v29 = vpop.f32.mrf.mxu0 }
 0x708   :  { %v4229_v21 = vpack.c.bf16 %v4063_v9, %v4060_v0 }
 0x709   :  { %v4067_v1 = vpop.f32.mrf.mxu0 }
 0x70a   :  { %5395 = vmatmul.mubr.msk.bf16.gmra.mxu1 %vm162_vm1, %v4229_v21  ;;  %v4068_v36 = vadd.f32 %v9750_v46, %v4067_v1 }
 0x70b   :  { %v6824_v35 = vpop.f32.mrf.mxu0  ;;  %4431 = vmatprep.mubr.bf16.mxu1 %v7183_v28 }
 0x70d   :  { %v4070_v62 = vpop.f32.mrf.mxu0 }
 0x70e   :  { %v4071_v53 = vadd.f32 %v9750_v46, %v4070_v62 }
 0x70f   :  { %v6825_v11 = vpop.f32.mrf.mxu0 }
 0x710   :  { %v4230_v42 = vpack.c.bf16 %v4071_v53, %v4068_v36 }
 0x711   :  { %v4075_v22 = vpop.f32.mrf.mxu0 }
 0x712   :  { %5396 = vmatmul.mubr.msk.bf16.gmra.mxu1 %vm162_vm1, %v4230_v42  ;;  %v4076_v63 = vadd.f32 %v9750_v46, %v4075_v22 }
 0x713   :  { %v6828_v26 = vpop.f32.mrf.mxu0  ;;  %4441 = vmatprep.mubr.bf16.mxu1 %v7183_v28 }
 0x715   :  { %v4078_v55 = vpop.f32.mrf.mxu0 }
 0x716   :  { %v4079_v33 = vadd.f32 %v9750_v46, %v4078_v55 }
 0x717   :  { %v6829_v16 = vpop.f32.mrf.mxu0 }
 0x718   :  { %v4231_v15 = vpack.c.bf16 %v4079_v33, %v4076_v63 }
 0x719   :  { %v4083_v8 = vpop.f32.mrf.mxu0 }
 0x71a   :  { %5397 = vmatmul.mubr.msk.bf16.gmra.mxu1 %vm162_vm1, %v4231_v15  ;;  %v4084_v56 = vadd.f32 %v9750_v46, %v4083_v8 }
 0x71b   :  { %v6832_v27 = vpop.f32.mrf.mxu0  ;;  %4451 = vmatprep.mubr.bf16.mxu1 %v7183_v28 }
 0x71d   :  { %v4086_v13 = vpop.f32.mrf.mxu0 }
 0x71e   :  { %v4087_v32 = vadd.f32 %v9750_v46, %v4086_v13 }
 0x71f   :  { %v6833_v30 = vpop.f32.mrf.mxu0 }
 0x720   :  { %v4232_v5 = vpack.c.bf16 %v4087_v32, %v4084_v56 }
 0x721   :  { %v4091_v44 = vpop.f32.mrf.mxu0 }
 0x722   :  { %5398 = vmatmul.mubr.msk.bf16.gmra.mxu1 %vm162_vm1, %v4232_v5  ;;  %v4092_v47 = vadd.f32 %v9750_v46, %v4091_v44 }
 0x723   :  { %v6836_v51 = vpop.f32.mrf.mxu0  ;;  %4461 = vmatprep.mubr.bf16.mxu1 %v7183_v28 }
 0x725   :  { %v4094_v41 = vpop.f32.mrf.mxu0 }
 0x726   :  { %v4095_v20 = vadd.f32 %v9750_v46, %v4094_v41 }
 0x727   :  { %v6837_v17 = vpop.f32.mrf.mxu0 }
 0x728   :  { %v4233_v24 = vpack.c.bf16 %v4095_v20, %v4092_v47 }
 0x729   :  { %v4099_v54 = vpop.f32.mrf.mxu0 }
 0x72a   :  { %5399 = vmatmul.mubr.msk.bf16.gmra.mxu1 %vm162_vm1, %v4233_v24  ;;  %v4100_v18 = vadd.f32 %v9750_v46, %v4099_v54 }
 0x72b   :  { %v6840_v49 = vpop.f32.mrf.mxu0  ;;  %4471 = vmatprep.mubr.bf16.mxu1 %v7183_v28 }
 0x72d   :  { %v4102_v38 = vpop.f32.mrf.mxu0 }
 0x72e   :  { %v4103_v58 = vadd.f32 %v9750_v46, %v4102_v38 }
 0x72f   :  { %v6841_v25 = vpop.f32.mrf.mxu0 }
 0x730   :  { %v4234_v23 = vpack.c.bf16 %v4103_v58, %v4100_v18 }
 0x731   :  { %v4107_v59 = vpop.f32.mrf.mxu0 }
 0x732   :  { %5400 = vmatmul.mubr.msk.bf16.gmra.mxu1 %vm162_vm1, %v4234_v23  ;;  %v4108_v34 = vadd.f32 %v9750_v46, %v4107_v59 }
 0x733   :  { %v6844_v50 = vpop.f32.mrf.mxu0  ;;  %4481 = vmatprep.mubr.bf16.mxu1 %v7183_v28 }
 0x735   :  { %v4110_v52 = vpop.f32.mrf.mxu0 }
 0x736   :  { %v4111_v37 = vadd.f32 %v9750_v46, %v4110_v52 }
 0x737   :  { %v6845_v40 = vpop.f32.mrf.mxu0 }
 0x738   :  { %v4235_v7 = vpack.c.bf16 %v4111_v37, %v4108_v34 }
 0x739   :  { %v4115_v6 = vpop.f32.mrf.mxu0 }
 0x73a   :  { %5401 = vmatmul.mubr.msk.bf16.gmra.mxu1 %vm162_vm1, %v4235_v7  ;;  %v4116_v14 = vadd.f32 %v9750_v46, %v4115_v6 }
 0x73b   :  { %v6848_v12 = vpop.f32.mrf.mxu0  ;;  %4491 = vmatprep.mubr.bf16.mxu1 %v7183_v28 }
 0x73d   :  { %v4118_v61 = vpop.f32.mrf.mxu0 }
 0x73e   :  { %v4119_v43 = vadd.f32 %v9750_v46, %v4118_v61 }
 0x73f   :  { %v6849_v45 = vpop.f32.mrf.mxu0 }
 0x740   :  { %v4236_v4 = vpack.c.bf16 %v4119_v43, %v4116_v14 }
 0x741   :  { %v4123_v60 = vpop.f32.mrf.mxu0 }
 0x742   :  { %5402 = vmatmul.mubr.msk.bf16.gmra.mxu1 %vm162_vm1, %v4236_v4  ;;  %v4124_v39 = vadd.f32 %v9750_v46, %v4123_v60 }
 0x743   :  { %v6852_v57 = vpop.f32.mrf.mxu0  ;;  %4501 = vmatprep.mubr.bf16.mxu1 %v7183_v28 }
 0x745   :  { %v4126_v31 = vpop.f32.mrf.mxu0 }
 0x746   :  { %v4127_v48 = vadd.f32 %v9750_v46, %v4126_v31 }
 0x747   :  { %v6853_v2 = vpop.f32.mrf.mxu0 }
 0x748   :  { %v4237_v19 = vpack.c.bf16 %v4127_v48, %v4124_v39 }
 0x749   :  { %v4131_v3 = vpop.f32.mrf.mxu0 }
 0x74a   :  { %5403 = vmatmul.mubr.msk.bf16.gmra.mxu1 %vm162_vm1, %v4237_v19  ;;  %v4132_v9 = vadd.f32 %v9750_v46, %v4131_v3 }
 0x74b   :  { %v6856_v10 = vpop.f32.mrf.mxu0  ;;  %4511 = vmatprep.mubr.bf16.mxu1 %v7183_v28 }
 0x74d   :  { %v4134_v0 = vpop.f32.mrf.mxu0 }
 0x74e   :  { %v4135_v29 = vadd.f32 %v9750_v46, %v4134_v0 }
 0x74f   :  { %v6857_v21 = vpop.f32.mrf.mxu0 }
 0x750   :  { %v4238_v1 = vpack.c.bf16 %v4135_v29, %v4132_v9 }
 0x751   :  { %v4139_v35 = vpop.f32.mrf.mxu0 }
 0x752   :  { %5404 = vmatmul.mubr.msk.bf16.gmra.mxu1 %vm162_vm1, %v4238_v1  ;;  %v4140_v53 = vadd.f32 %v9750_v46, %v4139_v35 }
 0x753   :  { %v6860_v62 = vpop.f32.mrf.mxu0  ;;  %4521 = vmatprep.mubr.bf16.mxu1 %v7183_v28 }
 0x755   :  { %v4142_v36 = vpop.f32.mrf.mxu0 }
 0x756   :  { %v4143_v11 = vadd.f32 %v9750_v46, %v4142_v36 }
 0x757   :  { %v6861_v42 = vpop.f32.mrf.mxu0 }
 0x758   :  { %v4239_v22 = vpack.c.bf16 %v4143_v11, %v4140_v53 }
 0x759   :  { %v4147_v26 = vpop.f32.mrf.mxu0 }
 0x75a   :  { %5405 = vmatmul.mubr.msk.bf16.gmra.mxu1 %vm162_vm1, %v4239_v22  ;;  %v4148_v33 = vadd.f32 %v9750_v46, %v4147_v26 }
 0x75b   :  { %v6864_v55 = vpop.f32.mrf.mxu0  ;;  %4531 = vmatprep.mubr.bf16.mxu1 %v7183_v28 }
 0x75d   :  { %v4150_v63 = vpop.f32.mrf.mxu0 }
 0x75e   :  { %v4151_v16 = vadd.f32 %v9750_v46, %v4150_v63 }
 0x75f   :  { %v6865_v15 = vpop.f32.mrf.mxu0 }
 0x760   :  { %v4240_v8 = vpack.c.bf16 %v4151_v16, %v4148_v33 }
 0x761   :  { %v4155_v27 = vpop.f32.mrf.mxu0 }
 0x762   :  { %5406 = vmatmul.mubr.msk.bf16.gmra.mxu1 %vm162_vm1, %v4240_v8  ;;  %v4156_v32 = vadd.f32 %v9750_v46, %v4155_v27 }
 0x763   :  { %v6868_v13 = vpop.f32.mrf.mxu0  ;;  %4541 = vmatprep.mubr.bf16.mxu1 %v7183_v28 }
 0x764   :  { %v4630_v13 = vld [vmem:[%s10440_s16] sm:$0xff] }
 0x765   :  { %v4158_v56 = vpop.f32.mrf.mxu0 }
 0x766   :  { %v4159_v30 = vadd.f32 %v9750_v46, %v4158_v56 }
 0x767   :  { %v6869_v5 = vpop.f32.mrf.mxu0 }
 0x768   :  { %v4241_v44 = vpack.c.bf16 %v4159_v30, %v4156_v32  ;;  %v4632_v32 = vld [vmem:[%s10440_s16 + $0x10] sm:$0xff]  ;;  %v4631_v30 = vld [vmem:[%s10440_s16 + $0x8] sm:$0xff]  ;;  %v4633_v5 = vld [vmem:[%s10440_s16 + $0x18] sm:$0xff] }
 0x769   :  { %v4163_v51 = vpop.f32.mrf.mxu0 }
 0x76a   :  { %5407 = vmatmul.mubr.msk.bf16.gmra.mxu1 %vm162_vm1, %v4241_v44  ;;  %v4164_v20 = vadd.f32 %v9750_v46, %v4163_v51 }
 0x76b   :  { %v6872_v41 = vpop.f32.mrf.mxu0  ;;  %4551 = vmatprep.mubr.bf16.mxu1 %v7183_v28 }
 0x76d   :  { %v4166_v47 = vpop.f32.mrf.mxu0 }
 0x76e   :  { %v4167_v17 = vadd.f32 %v9750_v46, %v4166_v47 }
 0x76f   :  { %v6873_v24 = vpop.f32.mrf.mxu0 }
 0x770   :  { %v4242_v54 = vpack.c.bf16 %v4167_v17, %v4164_v20 }
 0x771   :  { %v4171_v49 = vpop.f32.mrf.mxu0 }
 0x772   :  { %5408 = vmatmul.mubr.msk.bf16.gmra.mxu1 %vm162_vm1, %v4242_v54  ;;  %v4172_v58 = vadd.f32 %v9750_v46, %v4171_v49  ;;  %v4634_v49 = vld [vmem:[%s10440_s16 + $0x20] sm:$0xff] }
 0x773   :  { %v6876_v38 = vpop.f32.mrf.mxu0  ;;  %4561 = vmatprep.mubr.bf16.mxu1 %v7183_v28 }
 0x775   :  { %v4174_v18 = vpop.f32.mrf.mxu0 }
 0x776   :  { %v4175_v25 = vadd.f32 %v9750_v46, %v4174_v18  ;;  %v4636_v18 = vld [vmem:[%s10440_s16 + $0x30] sm:$0xff] }
 0x777   :  { %v6877_v23 = vpop.f32.mrf.mxu0 }
 0x778   :  { %v4243_v59 = vpack.c.bf16 %v4175_v25, %v4172_v58  ;;  %v4635_v58 = vld [vmem:[%s10440_s16 + $0x28] sm:$0xff]  ;;  %v4637_v23 = vld [vmem:[%s10440_s16 + $0x38] sm:$0xff] }
 0x779   :  { %v4179_v50 = vpop.f32.mrf.mxu0 }
 0x77a   :  { %5409 = vmatmul.mubr.msk.bf16.gmra.mxu1 %vm162_vm1, %v4243_v59  ;;  %v4180_v37 = vadd.f32 %v9750_v46, %v4179_v50 }
 0x77b   :  { %v6880_v52 = vpop.f32.mrf.mxu0  ;;  %4571 = vmatprep.mubr.bf16.mxu1 %v7183_v28 }
 0x77d   :  { %v4182_v34 = vpop.f32.mrf.mxu0 }
 0x77e   :  { %v4183_v40 = vadd.f32 %v9750_v46, %v4182_v34 }
 0x77f   :  { %v6881_v7 = vpop.f32.mrf.mxu0 }
 0x780   :  { %v4244_v6 = vpack.c.bf16 %v4183_v40, %v4180_v37 }
 0x781   :  { %v4187_v12 = vpop.f32.mrf.mxu0 }
 0x782   :  { %5410 = vmatmul.mubr.msk.bf16.gmra.mxu1 %vm162_vm1, %v4244_v6  ;;  %v4188_v43 = vadd.f32 %v9750_v46, %v4187_v12 }
 0x783   :  { %v6884_v61 = vpop.f32.mrf.mxu0  ;;  %4581 = vmatprep.mubr.bf16.mxu1 %v7183_v28 }
 0x785   :  { %v4190_v14 = vpop.f32.mrf.mxu0 }
 0x786   :  { %v4191_v45 = vadd.f32 %v9750_v46, %v4190_v14 }
 0x787   :  { %v6885_v4 = vpop.f32.mrf.mxu0 }
 0x788   :  { %v4245_v60 = vpack.c.bf16 %v4191_v45, %v4188_v43 }
 0x789   :  { %v4195_v57 = vpop.f32.mrf.mxu0 }
 0x78a   :  { %5411 = vmatmul.mubr.msk.bf16.gmra.mxu1 %vm162_vm1, %v4245_v60  ;;  %v4196_v48 = vadd.f32 %v9750_v46, %v4195_v57 }
 0x78b   :  { %v6888_v31 = vpop.f32.mrf.mxu0  ;;  %4591 = vmatprep.mubr.bf16.mxu1 %v7183_v28 }
 0x78d   :  { %v4198_v39 = vpop.f32.mrf.mxu0 }
 0x78e   :  { %v4199_v2 = vadd.f32 %v9750_v46, %v4198_v39 }
 0x78f   :  { %v6889_v19 = vpop.f32.mrf.mxu0 }
 0x790   :  { %v4246_v3 = vpack.c.bf16 %v4199_v2, %v4196_v48 }
 0x791   :  { %v4203_v10 = vpop.f32.mrf.mxu0 }
 0x792   :  { %5412 = vmatmul.mubr.msk.bf16.gmra.mxu1 %vm162_vm1, %v4246_v3  ;;  %v4204_v29 = vadd.f32 %v9750_v46, %v4203_v10 }
 0x793   :  { %v6892_v0 = vpop.f32.mrf.mxu0  ;;  %4601 = vmatprep.mubr.bf16.mxu1 %v7183_v28 }
 0x795   :  { %v4206_v9 = vpop.f32.mrf.mxu0 }
 0x796   :  { %v4207_v21 = vadd.f32 %v9750_v46, %v4206_v9 }
 0x797   :  { %v6893_v1 = vpop.f32.mrf.mxu0 }
 0x798   :  { %v4247_v35 = vpack.c.bf16 %v4207_v21, %v4204_v29 }
 0x799   :  { %v4211_v62 = vpop.f32.mrf.mxu0 }
 0x79a   :  { %5413 = vmatmul.mubr.msk.bf16.gmra.mxu1 %vm162_vm1, %v4247_v35  ;;  %v4212_v11 = vadd.f32 %v9750_v46, %v4211_v62  ;;  %v4660_v62 = vld [vmem:[%s10440_s16 + $0xf0] sm:$0xff] }
 0x79b   :  { %v6896_v36 = vpop.f32.mrf.mxu0  ;;  %4611 = vmatprep.mubr.bf16.mxu1 %v7183_v28 }
 0x79c   :  { %v4657_v36 = vld [vmem:[%s10440_s16 + $0xd8] sm:$0xff] }
 0x79d   :  { %v4214_v53 = vpop.f32.mrf.mxu0 }
 0x79e   :  { %v4215_v42 = vadd.f32 %v9750_v46, %v4214_v53  ;;  %v4659_v53 = vld [vmem:[%s10440_s16 + $0xe8] sm:$0xff] }
 0x79f   :  { %v6897_v22 = vpop.f32.mrf.mxu0 }
 0x7a0   :  { %v4248_v26 = vpack.c.bf16 %v4215_v42, %v4212_v11  ;;  %v4661_v42 = vld [vmem:[%s10440_s16 + $0xf8] sm:$0xff]  ;;  %v4658_v22 = vld [vmem:[%s10440_s16 + $0xe0] sm:$0xff] }
 0x7a1   :  { %v4219_v55 = vpop.f32.mrf.mxu0 }
 0x7a2   :  { %5414 = vmatmul.mubr.msk.bf16.gmra.mxu1 %vm162_vm1, %v4248_v26  ;;  %v4220_v33 = vadd.f32 %v9750_v46, %v4219_v55  ;;  %v4655_v26 = vld [vmem:[%s10440_s16 + $0xc8] sm:$0xff] }
 0x7a3   :  { %v6900_v63 = vpop.f32.mrf.mxu0  ;;  %4621 = vmatprep.mubr.bf16.mxu1 %v7183_v28 }
 0x7a4   :  { %v4249_v8 = vpack.c.bf16 %v4220_v33, %v4220_v33  ;;  %v4656_v33 = vld [vmem:[%s10440_s16 + $0xd0] sm:$0xff] }
 0x7a5   :  { %v4222_v16 = vpop.f32.mrf.mxu0 }
 0x7a7   :  { %v6901_v15 = vpop.f32.mrf.mxu0 }
 0x7aa   :  { %v4383_v27 = vpop.f32.mrf.mxu1  ;;  %5415 = vmatmul.mubr.msk.bf16.gmra.mxu1 %vm162_vm1, %v4249_v8 }
 0x7ab   :  { %v9862_v44 = vmul.f32 %v4630_v13, %v4383_v27  ;;  %v4653_v27 = vld [vmem:[%s10440_s16 + $0xb8] sm:$0xff] }
 0x7ac   :  { %v4385_v56 = vpop.f32.mrf.mxu1 }
 0x7ad   :  { %v9866_v47 = vmul.f32 %v4631_v30, %v4385_v56 }
 0x7ae   :  { %v4387_v46 = vpop.f32.mrf.mxu1 }
 0x7af   :  { %v9864_v51 = vmul.f32 %v4632_v32, %v4387_v46  ;;  %v4654_v32 = vld [vmem:[%s10440_s16 + $0xc0] sm:$0xff] }
 0x7b0   :  { %v4389_v41 = vpop.f32.mrf.mxu1 }
 0x7b1   :  { %v4826_v20 = vpack.c.bf16 %v9864_v51, %v9862_v44  ;;  %v9870_v17 = vmul.f32 %v4633_v5, %v4389_v41  ;;  %v4651_v5 = vld [vmem:[%s10440_s16 + $0xa8] sm:$0xff] }
 0x7b2   :  { %v4393_v24 = vpop.f32.mrf.mxu1 }
 0x7b3   :  { %v4827_v54 = vpack.c.bf16 %v9870_v17, %v9866_v47  ;;  %v9886_v59 = vmul.f32 %v4634_v49, %v4393_v24  ;;  %v4662_v49 = vld [vmem:[%s10440_s16 + $0x100] sm:$0xff] }
 0x7b4   :  { %v4395_v38 = vpop.f32.mrf.mxu1 }
 0x7b5   :  { %v9890_v34 = vmul.f32 %v4635_v58, %v4395_v38  ;;  %v4649_v58 = vld [vmem:[%s10440_s16 + $0x98] sm:$0xff] }
 0x7b6   :  { %v4397_v25 = vpop.f32.mrf.mxu1 }
 0x7b7   :  { %v9888_v50 = vmul.f32 %v4636_v18, %v4397_v25  ;;  %v4664_v18 = vld [vmem:[%s10440_s16 + $0x110] sm:$0xff] }
 0x7b8   :  { %v4399_v52 = vpop.f32.mrf.mxu1  ;;  %v4652_v25 = vld [vmem:[%s10440_s16 + $0xb0] sm:$0xff] }
 0x7b9   :  { %v4828_v37 = vpack.c.bf16 %v9888_v50, %v9886_v59  ;;  %v9894_v40 = vmul.f32 %v4637_v23, %v4399_v52 }
 0x7ba   :  { %v9896_v7 = vpop.f32.mrf.mxu1 }
 0x7bb   :  { %v4829_v6 = vpack.c.bf16 %v9894_v40, %v9890_v34  ;;  %v7184_v34 = vmov 1065369472  }
 0x7bc   :  { %v9900_v12 = vpop.f32.mrf.mxu1  ;;  %4919 = vmatprep.mubr.bf16.mxu0 %v7184_v34  ;;  %5417 = vmatprep.mubr.msk.bf16.mxu1 %vm4876_vm3, %v7184_v34 }
 0x7be   :  { %v9902_v61 = vpop.f32.mrf.mxu1 }
 0x7c0   :  { %v9904_v14 = vpop.f32.mrf.mxu1 }
 0x7c2   :  { %v9906_v43 = vpop.f32.mrf.mxu1 }
 0x7c4   :  { %v9908_v45 = vpop.f32.mrf.mxu1 }
 0x7c6   :  { %v9910_v4 = vpop.f32.mrf.mxu1 }
 0x7c8   :  { %v9912_v60 = vpop.f32.mrf.mxu1 }
 0x7ca   :  { %v9914_v57 = vpop.f32.mrf.mxu1 }
 0x7cc   :  { %v9916_v31 = vpop.f32.mrf.mxu1 }
 0x7ce   :  { %v9918_v39 = vpop.f32.mrf.mxu1 }
 0x7d0   :  { %v4429_v48 = vpop.f32.mrf.mxu1 }
 0x7d2   :  { %v4433_v2 = vpop.f32.mrf.mxu1 }
 0x7d4   :  { %v4435_v19 = vpop.f32.mrf.mxu1 }
 0x7d6   :  { %v4437_v3 = vpop.f32.mrf.mxu1 }
 0x7d8   :  { %v4439_v10 = vpop.f32.mrf.mxu1 }
 0x7d9   :  { %v4751_v23 = vmul.f32 %v4653_v27, %v4439_v10 }
 0x7da   :  { %v4443_v0 = vpop.f32.mrf.mxu1 }
 0x7dc   :  { %v4445_v9 = vpop.f32.mrf.mxu1 }
 0x7dd   :  { %v4753_v30 = vmul.f32 %v4655_v26, %v4445_v9  ;;  %v4752_v9 = vmul.f32 %v4654_v32, %v4443_v0  ;;  %v4647_v0 = vld [vmem:[%s10440_s16 + $0x88] sm:$0xff]  ;;  %v4648_v26 = vld [vmem:[%s10440_s16 + $0x90] sm:$0xff] }
 0x7de   :  { %v4447_v29 = vpop.f32.mrf.mxu1 }
 0x7df   :  { %v4754_v41 = vmul.f32 %v4656_v33, %v4447_v29  ;;  %v4663_v29 = vld [vmem:[%s10440_s16 + $0x108] sm:$0xff] }
 0x7e0   :  { %v4449_v21 = vpop.f32.mrf.mxu1 }
 0x7e1   :  { %v4755_v16 = vmul.f32 %v4657_v36, %v4449_v21 }
 0x7e2   :  { %v4453_v1 = vpop.f32.mrf.mxu1 }
 0x7e3   :  { %v4756_v13 = vmul.f32 %v4658_v22, %v4453_v1  ;;  %v4839_v52 = vpack.c.bf16 %v4755_v16, %v4753_v30  ;;  %v4665_v1 = vld [vmem:[%s10440_s16 + $0x118] sm:$0xff] }
 0x7e4   :  { %v4455_v35 = vpop.f32.mrf.mxu1  ;;  %v4645_v16 = vld [vmem:[%s10440_s16 + $0x78] sm:$0xff] }
 0x7e5   :  { %v4757_v15 = vmul.f32 %v4659_v53, %v4455_v35  ;;  %v4650_v35 = vld [vmem:[%s10440_s16 + $0xa0] sm:$0xff]  ;;  %v4747_v53 = vmul.f32 %v4649_v58, %v4429_v48 }
 0x7e6   :  { %v4457_v11 = vpop.f32.mrf.mxu1  ;;  %v4748_v48 = vmul.f32 %v4650_v35, %v4433_v2  ;;  %v4666_v2 = vld [vmem:[%s10440_s16 + $0x120] sm:$0xff] }
 0x7e7   :  { %v4758_v55 = vmul.f32 %v4660_v62, %v4457_v11  ;;  %v4749_v62 = vmul.f32 %v4651_v5, %v4435_v19  ;;  %v4750_v11 = vmul.f32 %v4652_v25, %v4437_v3  ;;  %v4644_v5 = vld [vmem:[%s10440_s16 + $0x70] sm:$0xff]  ;;  %v4642_v58 = vld [vmem:[%s10440_s16 + $0x60] sm:$0xff] }
 0x7e8   :  { %v4459_v63 = vpop.f32.mrf.mxu1 }
 0x7e9   :  { %v4759_v8 = vmul.f32 %v4661_v42, %v4459_v63  ;;  %v4840_v24 = vpack.c.bf16 %v4758_v55, %v4756_v13  ;;  %v4838_v42 = vpack.c.bf16 %v4754_v41, %v4752_v9  ;;  %v4837_v55 = vpack.c.bf16 %v4751_v23, %v4749_v62  ;;  %v4643_v13 = vld [vmem:[%s10440_s16 + $0x68] sm:$0xff] }
 0x7ea   :  { %v4463_v56 = vpop.f32.mrf.mxu1  ;;  %v4836_v32 = vpack.c.bf16 %v4750_v11, %v4748_v48  ;;  %v4741_v25 = vmul.f32 %v4643_v13, %v9908_v45  ;;  %v4742_v9 = vmul.f32 %v4644_v5, %v9910_v4  ;;  %v4693_v5 = vld [vmem:[%s10440_s16 + $0x1f8] sm:$0xff] }
 0x7eb   :  { %v4841_v46 = vpack.c.bf16 %v4759_v8, %v4757_v15  ;;  %v9971_v36 = vmul.f32 %v4662_v49, %v4463_v56  ;;  %v4646_v15 = vld [vmem:[%s10440_s16 + $0x80] sm:$0xff]  ;;  %v4745_v8 = vmul.f32 %v4647_v0, %v9916_v31  ;;  %v4746_v56 = vmul.f32 %v4648_v26, %v9918_v39  ;;  %v4668_v31 = vld [vmem:[%s10440_s16 + $0x130] sm:$0xff]  ;;  %v4667_v49 = vld [vmem:[%s10440_s16 + $0x128] sm:$0xff] }
 0x7ec   :  { %v4465_v38 = vpop.f32.mrf.mxu1  ;;  %v4743_v39 = vmul.f32 %v4645_v16, %v9912_v60 }
 0x7ed   :  { %4887 = vmatprep.subr.bf16.mxu0 %v4841_v46  ;;  %v9981_v63 = vmul.f32 %v4663_v29, %v4465_v38  ;;  %v4641_v46 = vld [vmem:[%s10440_s16 + $0x58] sm:$0xff]  ;;  %v4835_v41 = vpack.c.bf16 %v4747_v53, %v4745_v8  ;;  %v4740_v53 = vmul.f32 %v4642_v58, %v9906_v43 }
 0x7ee   :  { %v4467_v21 = vpop.f32.mrf.mxu1  ;;  %4888 = vmatpush1.bf16.msra.mxu0 %v4840_v24  ;;  %v4744_v24 = vmul.f32 %v4646_v15, %v9914_v57  ;;  %v4639_v57 = vld [vmem:[%s10440_s16 + $0x48] sm:$0xff]  ;;  %v4833_v45 = vpack.c.bf16 %v4743_v39, %v4741_v25  ;;  %v4690_v39 = vld [vmem:[%s10440_s16 + $0x1e0] sm:$0xff] }
 0x7ef   :  { %v9973_v10 = vmul.f32 %v4664_v18, %v4467_v21  ;;  %4889 = vmatprep.subr.bf16.mxu0 %v4839_v52  ;;  %v4669_v18 = vld [vmem:[%s10440_s16 + $0x138] sm:$0xff]  ;;  %v4739_v52 = vmul.f32 %v4641_v46, %v9904_v14  ;;  %v4638_v14 = vld [vmem:[%s10440_s16 + $0x40] sm:$0xff]  ;;  %v4737_v4 = vmul.f32 %v4639_v57, %v9900_v12  ;;  %v4832_v26 = vpack.c.bf16 %v4742_v9, %v4740_v53 }
 0x7f0   :  { %v4469_v22 = vpop.f32.mrf.mxu1  ;;  %v4834_v29 = vpack.c.bf16 %v4746_v56, %v4744_v24  ;;  %v4736_v43 = vmul.f32 %v4638_v14, %v9896_v7  ;;  %v4685_v57 = vld [vmem:[%s10440_s16 + $0x1b8] sm:$0xff] }
 0x7f1   :  { %v4842_v19 = vpack.c.bf16 %v9973_v10, %v9971_v36  ;;  %v9985_v33 = vmul.f32 %v4665_v1, %v4469_v22  ;;  %v4640_v1 = vld [vmem:[%s10440_s16 + $0x50] sm:$0xff]  ;;  %v4831_v16 = vpack.c.bf16 %v4739_v52, %v4737_v4  ;;  %v4694_v4 = vld [vmem:[%s10440_s16 + $0x200] sm:$0xff] }
 0x7f2   :  { %v4473_v3 = vpop.f32.mrf.mxu1  ;;  %4890 = vmatpush1.bf16.msra.mxu0 %v4838_v42  ;;  %v4738_v22 = vmul.f32 %v4640_v1, %v9902_v61 }
 0x7f3   :  { %v4843_v27 = vpack.c.bf16 %v9985_v33, %v9981_v63  ;;  %4891 = vmatprep.subr.bf16.mxu0 %v4837_v55  ;;  %v10024_v60 = vmul.f32 %v4666_v2, %v4473_v3  ;;  %v4692_v2 = vld [vmem:[%s10440_s16 + $0x1f0] sm:$0xff] }
 0x7f4   :  { %v4475_v30 = vpop.f32.mrf.mxu1  ;;  %v4830_v3 = vpack.c.bf16 %v4738_v22, %v4736_v43  ;;  %v4684_v43 = vld [vmem:[%s10440_s16 + $0x1b0] sm:$0xff] }
 0x7f5   :  { %v10036_v35 = vmul.f32 %v4667_v49, %v4475_v30  ;;  %v4689_v30 = vld [vmem:[%s10440_s16 + $0x1d8] sm:$0xff]  ;;  %v6948_v33 = vld [vmem:[%s10441_s17 + $0x30] sm:$0xff]  }
 0x7f6   :  { %v4477_v38 = vpop.f32.mrf.mxu1  ;;  %4892 = vmatpush1.bf16.msra.mxu0 %v4836_v32 }
 0x7f7   :  { %v10026_v23 = vmul.f32 %v4668_v31, %v4477_v38  ;;  %4893 = vmatprep.subr.bf16.mxu0 %v4835_v41  ;;  %v4691_v31 = vld [vmem:[%s10440_s16 + $0x1e8] sm:$0xff]  ;;  %v4688_v38 = vld [vmem:[%s10440_s16 + $0x1d0] sm:$0xff] }
 0x7f8   :  { %v4479_v21 = vpop.f32.mrf.mxu1  ;;  %v4687_v41 = vld [vmem:[%s10440_s16 + $0x1c8] sm:$0xff] }
 0x7f9   :  { %v4844_v62 = vpack.c.bf16 %v10026_v23, %v10024_v60  ;;  %v10040_v0 = vmul.f32 %v4669_v18, %v4479_v21 }
 0x7fa   :  { %v10043_v11 = vpop.f32.mrf.mxu1  ;;  %4894 = vmatpush1.bf16.msra.mxu0 %v4834_v29  ;;  %v4686_v29 = vld [vmem:[%s10440_s16 + $0x1c0] sm:$0xff] }
 0x7fb   :  { %v4845_v42 = vpack.c.bf16 %v10040_v0, %v10036_v35  ;;  %4895 = vmatprep.subr.bf16.mxu0 %v4833_v45  ;;  %v4683_v45 = vld [vmem:[%s10440_s16 + $0x1a8] sm:$0xff]  ;;  %v6947_v35 = vld [vmem:[%s10441_s17 + $0x38] sm:$0xff]  }
 0x7fc   :  { %v10052_v55 = vpop.f32.mrf.mxu1 }
 0x7fe   :  { %v10055_v48 = vpop.f32.mrf.mxu1  ;;  %4896 = vmatpush1.bf16.msra.mxu0 %v4832_v26  ;;  %v4696_v26 = vld [vmem:[%s10440_s16 + $0x210] sm:$0xff] }
 0x7ff   :  { %4897 = vmatprep.subr.bf16.mxu0 %v4831_v16  ;;  %v4681_v16 = vld [vmem:[%s10440_s16 + $0x198] sm:$0xff] }
 0x800   :  { %v10057_v15 = vpop.f32.mrf.mxu1 }
 0x802   :  { %v10059_v12 = vpop.f32.mrf.mxu1  ;;  %4898 = vmatpush1.bf16.msra.mxu0 %v4830_v3 }
 0x803   :  { %4899 = vmatprep.subr.bf16.mxu0 %v4829_v6 }
 0x804   :  { %v10064_v61 = vpop.f32.mrf.mxu1 }
 0x806   :  { %v10066_v8 = vpop.f32.mrf.mxu1  ;;  %4900 = vmatpush1.bf16.msra.mxu0 %v4828_v37 }
 0x807   :  { %4901 = vmatprep.subr.bf16.mxu0 %v4827_v54 }
 0x808   :  { %v10074_v7 = vpop.f32.mrf.mxu1 }
 0x80a   :  { %v10076_v13 = vpop.f32.mrf.mxu1  ;;  %4902 = vmatpush1.bf16.msra.mxu0 %v4826_v20 }
 0x80c   :  { %v10082_v40 = vpop.f32.mrf.mxu1 }
 0x80e   :  { %v10084_v6 = vpop.f32.mrf.mxu1 }
 0x810   :  { %v4509_v47 = vpop.f32.mrf.mxu1 }
 0x812   :  { %v4513_v17 = vpop.f32.mrf.mxu1 }
 0x814   :  { %v4515_v54 = vpop.f32.mrf.mxu1 }
 0x816   :  { %v4517_v59 = vpop.f32.mrf.mxu1 }
 0x818   :  { %v4519_v50 = vpop.f32.mrf.mxu1 }
 0x819   :  { %v4783_v3 = vmul.f32 %v4685_v57, %v4519_v50 }
 0x81a   :  { %v4523_v37 = vpop.f32.mrf.mxu1 }
 0x81c   :  { %v4525_v56 = vpop.f32.mrf.mxu1 }
 0x81d   :  { %v4785_v21 = vmul.f32 %v4687_v41, %v4525_v56 }
 0x81e   :  { %v4527_v32 = vpop.f32.mrf.mxu1 }
 0x81f   :  { %v4786_v53 = vmul.f32 %v4688_v38, %v4527_v32  ;;  %v4784_v32 = vmul.f32 %v4686_v29, %v4523_v37  ;;  %v4679_v37 = vld [vmem:[%s10440_s16 + $0x188] sm:$0xff] }
 0x820   :  { %v4529_v44 = vpop.f32.mrf.mxu1  ;;  %v4777_v57 = vmul.f32 %v4679_v37, %v10082_v40  ;;  %v4700_v40 = vld [vmem:[%s10440_s16 + $0x230] sm:$0xff] }
 0x821   :  { %v4787_v18 = vmul.f32 %v4689_v30, %v4529_v44  ;;  %v4695_v44 = vld [vmem:[%s10440_s16 + $0x208] sm:$0xff]  ;;  %v4781_v30 = vmul.f32 %v4683_v45, %v4515_v54  ;;  %v4673_v45 = vld [vmem:[%s10440_s16 + $0x158] sm:$0xff] }
 0x822   :  { %v4533_v51 = vpop.f32.mrf.mxu1 }
 0x823   :  { %v4788_v52 = vmul.f32 %v4690_v39, %v4533_v51  ;;  %v4855_v56 = vpack.c.bf16 %v4787_v18, %v4785_v21  ;;  %v4854_v39 = vpack.c.bf16 %v4786_v53, %v4784_v32  ;;  %v4676_v53 = vld [vmem:[%s10440_s16 + $0x170] sm:$0xff]  ;;  %v4771_v32 = vmul.f32 %v4673_v45, %v10057_v15  ;;  %v4670_v15 = vld [vmem:[%s10440_s16 + $0x140] sm:$0xff] }
 0x824   :  { %v4535_v20 = vpop.f32.mrf.mxu1 }
 0x825   :  { %v4789_v58 = vmul.f32 %v4691_v31, %v4535_v20  ;;  %v4697_v20 = vld [vmem:[%s10440_s16 + $0x218] sm:$0xff] }
 0x826   :  { %v4537_v46 = vpop.f32.mrf.mxu1 }
 0x827   :  { %v4790_v24 = vmul.f32 %v4692_v2, %v4537_v46  ;;  %v4682_v2 = vld [vmem:[%s10440_s16 + $0x1a0] sm:$0xff]  ;;  %v4779_v46 = vmul.f32 %v4681_v16, %v4509_v47  ;;  %v4701_v16 = vld [vmem:[%s10440_s16 + $0x238] sm:$0xff] }
 0x828   :  { %v4539_v49 = vpop.f32.mrf.mxu1  ;;  %v4780_v47 = vmul.f32 %v4682_v2, %v4513_v17  ;;  %v4698_v17 = vld [vmem:[%s10440_s16 + $0x220] sm:$0xff]  ;;  %v4672_v2 = vld [vmem:[%s10440_s16 + $0x150] sm:$0xff] }
 0x829   :  { %v4791_v25 = vmul.f32 %v4693_v5, %v4539_v49  ;;  %v4856_v14 = vpack.c.bf16 %v4790_v24, %v4788_v52  ;;  %v4782_v5 = vmul.f32 %v4684_v43, %v4517_v59  ;;  %v4680_v24 = vld [vmem:[%s10440_s16 + $0x190] sm:$0xff]  ;;  %v4853_v49 = vpack.c.bf16 %v4783_v3, %v4781_v30  ;;  %v4674_v43 = vld [vmem:[%s10440_s16 + $0x160] sm:$0xff] }
 0x82a   :  { %v4543_v9 = vpop.f32.mrf.mxu1  ;;  %v4778_v29 = vmul.f32 %v4680_v24, %v10084_v6  ;;  %v4770_v24 = vmul.f32 %v4672_v2, %v10055_v48 }
 0x82b   :  { %v4857_v1 = vpack.c.bf16 %v4791_v25, %v4789_v58  ;;  %v10138_v31 = vmul.f32 %v4694_v4, %v4543_v9  ;;  %v4677_v58 = vld [vmem:[%s10440_s16 + $0x178] sm:$0xff]  ;;  %v4678_v25 = vld [vmem:[%s10440_s16 + $0x180] sm:$0xff]  ;;  %v4675_v9 = vld [vmem:[%s10440_s16 + $0x168] sm:$0xff]  ;;  %v4852_v21 = vpack.c.bf16 %v4782_v5, %v4780_v47  ;;  %v4772_v5 = vmul.f32 %v4674_v43, %v10059_v12 }
 0x82c   :  { %v4545_v22 = vpop.f32.mrf.mxu1  ;;  %v4775_v6 = vmul.f32 %v4677_v58, %v10074_v7  ;;  %v4776_v4 = vmul.f32 %v4678_v25, %v10076_v13  ;;  %v4773_v3 = vmul.f32 %v4675_v9, %v10064_v61  ;;  %v4671_v13 = vld [vmem:[%s10440_s16 + $0x148] sm:$0xff]  ;;  %v4768_v12 = vmul.f32 %v4670_v15, %v10043_v11  ;;  %v4725_v43 = vld [vmem:[%s10440_s16 + $0x2f8] sm:$0xff] }
 0x82d   :  { %4903 = vmatprep.subr.bf16.mxu0 %v4857_v1  ;;  %v10148_v38 = vmul.f32 %v4695_v44, %v4545_v22  ;;  %v4699_v22 = vld [vmem:[%s10440_s16 + $0x228] sm:$0xff]  ;;  %v4774_v44 = vmul.f32 %v4676_v53, %v10066_v8  ;;  %v4769_v8 = vmul.f32 %v4671_v13, %v10052_v55  ;;  %v4722_v13 = vld [vmem:[%s10440_s16 + $0x2e0] sm:$0xff]  ;;  %v4717_v15 = vld [vmem:[%s10440_s16 + $0x2b8] sm:$0xff] }
 0x82e   :  { %v4547_v51 = vpop.f32.mrf.mxu1  ;;  %4904 = vmatpush2.bf16.msra.mxu0 %v4856_v14  ;;  %v4851_v14 = vpack.c.bf16 %v4779_v46, %v4777_v57  ;;  %v4849_v61 = vpack.c.bf16 %v4775_v6, %v4773_v3  ;;  %v4846_v25 = vpack.c.bf16 %v4770_v24, %v4768_v12  ;;  %v6953_v6 = vld [vmem:[%s10441_s17 + $0x8] sm:$0xff]   ;;  %v6954_v3 = vld [vmem:[%s10441_s17] sm:$0xff]  }
 0x82f   :  { %v10140_v50 = vmul.f32 %v4696_v26, %v4547_v51  ;;  %4905 = vmatprep.subr.bf16.mxu0 %v4855_v56  ;;  %v4850_v51 = vpack.c.bf16 %v4778_v29, %v4776_v4  ;;  %v4847_v47 = vpack.c.bf16 %v4771_v32, %v4769_v8  ;;  %v4721_v4 = vld [vmem:[%s10440_s16 + $0x2d8] sm:$0xff]  ;;  %v4719_v32 = vld [vmem:[%s10440_s16 + $0x2c8] sm:$0xff] }
 0x830   :  { %v4549_v41 = vpop.f32.mrf.mxu1 }
 0x831   :  { %v4858_v54 = vpack.c.bf16 %v10140_v50, %v10138_v31  ;;  %v10152_v18 = vmul.f32 %v4697_v20, %v4549_v41 }
 0x832   :  { %v4553_v59 = vpop.f32.mrf.mxu1  ;;  %4906 = vmatpush2.bf16.msra.mxu0 %v4854_v39 }
 0x833   :  { %v4859_v52 = vpack.c.bf16 %v10152_v18, %v10148_v38  ;;  %4907 = vmatprep.subr.bf16.mxu0 %v4853_v49  ;;  %v10191_v7 = vmul.f32 %v4698_v17, %v4553_v59  ;;  %v4848_v49 = vpack.c.bf16 %v4774_v44, %v4772_v5  ;;  %v6958_v38 = vld [vmem:[%s10441_s17 + $0x40] sm:$0xff]  }
 0x834   :  { %v4555_v1 = vpop.f32.mrf.mxu1 }
 0x835   :  { %v10203_v30 = vmul.f32 %v4699_v22, %v4555_v1  ;;  %v4724_v22 = vld [vmem:[%s10440_s16 + $0x2f0] sm:$0xff] }
 0x836   :  { %v4557_v26 = vpop.f32.mrf.mxu1  ;;  %4908 = vmatpush2.bf16.msra.mxu0 %v4852_v21  ;;  %v6951_v21 = vld [vmem:[%s10441_s17 + $0x18] sm:$0xff]  }
 0x837   :  { %v10193_v56 = vmul.f32 %v4700_v40, %v4557_v26  ;;  %4909 = vmatprep.subr.bf16.mxu0 %v4851_v14  ;;  %v6952_v40 = vld [vmem:[%s10441_s17 + $0x10] sm:$0xff]   ;;  %v4723_v26 = vld [vmem:[%s10440_s16 + $0x2e8] sm:$0xff] }
 0x838   :  { %v4559_v20 = vpop.f32.mrf.mxu1 }
 0x839   :  { %v4860_v37 = vpack.c.bf16 %v10193_v56, %v10191_v7  ;;  %v10207_v46 = vmul.f32 %v4701_v16, %v4559_v20  ;;  %v4720_v20 = vld [vmem:[%s10440_s16 + $0x2d0] sm:$0xff]  ;;  %v6957_v7 = vld [vmem:[%s10441_s17 + $0x48] sm:$0xff]  }
 0x83a   :  { %v10210_v39 = vpop.f32.mrf.mxu1  ;;  %4910 = vmatpush2.bf16.msra.mxu0 %v4850_v51 }
 0x83b   :  { %v4861_v41 = vpack.c.bf16 %v10207_v46, %v10203_v30  ;;  %4911 = vmatprep.subr.bf16.mxu0 %v4849_v61 }
 0x83c   :  { %v10219_v58 = vpop.f32.mrf.mxu1 }
 0x83e   :  { %v10222_v59 = vpop.f32.mrf.mxu1  ;;  %4912 = vmatpush2.bf16.msra.mxu0 %v4848_v49  ;;  %v6955_v49 = vld [vmem:[%s10441_s17 + $0x58] sm:$0xff]  }
 0x83f   :  { %4913 = vmatprep.subr.bf16.mxu0 %v4847_v47  ;;  %v4718_v47 = vld [vmem:[%s10440_s16 + $0x2c0] sm:$0xff] }
 0x840   :  { %v10224_v57 = vpop.f32.mrf.mxu1 }
 0x842   :  { %v10226_v55 = vpop.f32.mrf.mxu1  ;;  %4914 = vmatpush2.bf16.msra.mxu0 %v4846_v25 }
 0x843   :  { %4915 = vmatprep.subr.bf16.mxu0 %v4845_v42 }
 0x844   :  { %v10231_v48 = vpop.f32.mrf.mxu1 }
 0x846   :  { %v10233_v9 = vpop.f32.mrf.mxu1  ;;  %4916 = vmatpush2.bf16.msra.mxu0 %v4844_v62  ;;  %v6950_v62 = vld [vmem:[%s10441_s17 + $0x20] sm:$0xff]  }
 0x847   :  { %4917 = vmatprep.subr.bf16.mxu0 %v4843_v27 }
 0x848   :  { %v10241_v11 = vpop.f32.mrf.mxu1 }
 0x84a   :  { %v10243_v29 = vpop.f32.mrf.mxu1  ;;  %4918 = vmatpush2.bf16.msra.mxu0 %v4842_v19  ;;  %v6949_v19 = vld [vmem:[%s10441_s17 + $0x28] sm:$0xff]  }
 0x84b   :  { %5072 = vmatprep.subr.bf16.mxu0 %v7183_v28 }
 0x84c   :  { %v10252_v60 = vpop.f32.mrf.mxu1 }
 0x84d   :  { %4920 = vmatmul.mubr.bf16.vlgmr.msra.gmra.mxu0 %v7184_v34 }
 0x84e   :  { %v10255_v63 = vpop.f32.mrf.mxu1  ;;  %5073 = vmatpush1.bf16.msra.mxu0 %v6947_v35  ;;  %v4715_v35 = vld [vmem:[%s10440_s16 + $0x2a8] sm:$0xff] }
 0x84f   :  { %5074 = vmatprep.subr.bf16.mxu0 %v7183_v28 }
 0x850   :  { %v10261_v36 = vpop.f32.mrf.mxu1 }
 0x852   :  { %v10263_v10 = vpop.f32.mrf.mxu1  ;;  %5075 = vmatpush1.bf16.msra.mxu0 %v6948_v33 }
 0x853   :  { %5076 = vmatprep.subr.bf16.mxu0 %v7183_v28 }
 0x854   :  { %v4595_v27 = vpop.f32.mrf.mxu1 }
 0x856   :  { %v10269_v23 = vpop.f32.mrf.mxu1  ;;  %5077 = vmatpush1.bf16.msra.mxu0 %v6949_v19 }
 0x857   :  { %5078 = vmatprep.subr.bf16.mxu0 %v7183_v28 }
 0x858   :  { %v4599_v0 = vpop.f32.mrf.mxu1 }
 0x85a   :  { %v4603_v42 = vpop.f32.mrf.mxu1  ;;  %5079 = vmatpush1.bf16.msra.mxu0 %v6950_v62 }
 0x85b   :  { %5080 = vmatprep.subr.bf16.mxu0 %v7183_v28 }
 0x85c   :  { %v4605_v17 = vpop.f32.mrf.mxu1 }
 0x85d   :  { %v4817_v12 = vmul.f32 %v4719_v32, %v4605_v17  ;;  %v4713_v17 = vld [vmem:[%s10440_s16 + $0x298] sm:$0xff] }
 0x85e   :  { %v4607_v1 = vpop.f32.mrf.mxu1  ;;  %5081 = vmatpush1.bf16.msra.mxu0 %v6951_v21  ;;  %v4716_v21 = vld [vmem:[%s10440_s16 + $0x2b0] sm:$0xff] }
 0x85f   :  { %5082 = vmatprep.subr.bf16.mxu0 %v7183_v28  ;;  %v4818_v33 = vmul.f32 %v4720_v20, %v4607_v1  ;;  %v6956_v1 = vld [vmem:[%s10441_s17 + $0x50] sm:$0xff]   ;;  %s7185_s17 = smov [#allocation2]  }
 0x860   :  { %v4609_v45 = vpop.f32.mrf.mxu1  ;;  %s5120_s24 = sshll.u32 %s7185_s17, 4  ;;  %s5121_s24 = int_to_ptr.vmem [resolvable:$true] %s5120_s24 }
 0x861   :  { %v4819_v2 = vmul.f32 %v4721_v4, %v4609_v45  ;;  %v4813_v4 = vmul.f32 %v4715_v35, %v4595_v27  ;;  %v4709_v27 = vld [vmem:[%s10440_s16 + $0x278] sm:$0xff]  ;;  %s7159_s25 = scalar_lea.vmem %s5121_s24, 16  ;;  %s7163_s11 = scalar_lea.vmem %s5121_s24, 32 }
 0x862   :  { %v4613_v53 = vpop.f32.mrf.mxu1  ;;  %5083 = vmatpush1.bf16.msra.mxu0 %v6952_v40  ;;  %v4815_v40 = vmul.f32 %v4717_v15, %v4599_v0  ;;  %v4711_v0 = vld [vmem:[%s10440_s16 + $0x288] sm:$0xff]  ;;  %v4807_v20 = vmul.f32 %v4709_v27, %v10241_v11  ;;  %p7160_p0 = scmp.ne.s32.totalorder %s5121_s24, %s7159_s25  ;;  %p7164_p1 = scmp.lt.s32.totalorder %s5121_s24, %s5121_s24 }
 0x863   :  { %5084 = vmatprep.subr.bf16.mxu0 %v7183_v28  ;;  %v4820_v8 = vmul.f32 %v4722_v13, %v4613_v53  ;;  %v4871_v45 = vpack.c.bf16 %v4819_v2, %v4817_v12  ;;  %v4816_v53 = vmul.f32 %v4718_v47, %v4603_v42  ;;  %v4814_v42 = vmul.f32 %v4716_v21, %v10269_v23  ;;  %v4710_v23 = vld [vmem:[%s10440_s16 + $0x280] sm:$0xff]  ;;  %v4703_v15 = vld [vmem:[%s10440_s16 + $0x248] sm:$0xff]  ;;  %p7165_p2 = scmp.lt.s32.totalorder %s7163_s11, %s7159_s25 }
 0x864   :  { %v4615_v14 = vpop.f32.mrf.mxu1  ;;  %v4809_v32 = vmul.f32 %v4711_v0, %v10252_v60  ;;  %v4705_v60 = vld [vmem:[%s10440_s16 + $0x258] sm:$0xff]  ;;  %v4727_v21 = vld [vmem:[%s10440_s16 + $0x308] sm:$0xff] }
 0x865   :  { %v4821_v61 = vmul.f32 %v4723_v26, %v4615_v14  ;;  %v4714_v14 = vld [vmem:[%s10440_s16 + $0x2a0] sm:$0xff]  ;;  %p7166_p3 = por %p7165_p2, %p7164_p1 }
 0x866   :  { %v4617_v16 = vpop.f32.mrf.mxu1  ;;  %5085 = vmatpush1.bf16.msra.mxu0 %v6953_v6  ;;  %v4812_v13 = vmul.f32 %v4714_v14, %v10263_v10  ;;  %v4708_v10 = vld [vmem:[%s10440_s16 + $0x270] sm:$0xff] }
 0x867   :  { %5086 = vmatprep.subr.bf16.mxu0 %v7183_v28  ;;  %v4822_v44 = vmul.f32 %v4724_v22, %v4617_v16  ;;  %v4870_v22 = vpack.c.bf16 %v4818_v33, %v4816_v53  ;;  %v4712_v16 = vld [vmem:[%s10440_s16 + $0x290] sm:$0xff]  ;;  %v4806_v11 = vmul.f32 %v4708_v10, %v10233_v9  ;;  %p7167_p4 = pnand %p7166_p3, %p7160_p0 }
 0x868   :  { %v4619_v51 = vpop.f32.mrf.mxu1 }
 0x869   :  { %v4823_v5 = vmul.f32 %v4725_v43, %v4619_v51  ;;  %v4872_v19 = vpack.c.bf16 %v4822_v44, %v4820_v8  ;;  %v4811_v43 = vmul.f32 %v4713_v17, %v10261_v36  ;;  %v4707_v36 = vld [vmem:[%s10440_s16 + $0x268] sm:$0xff]  ;;  %v4810_v44 = vmul.f32 %v4712_v16, %v10255_v63 }
 0x86a   :  { %v10315_v24 = vpop.f32.mrf.mxu1  ;;  %5087 = vmatpush1.bf16.msra.mxu0 %v6954_v3  ;;  %v4869_v3 = vpack.c.bf16 %v4815_v40, %v4813_v4  ;;  %v4868_v51 = vpack.c.bf16 %v4814_v42, %v4812_v13  ;;  %v4805_v63 = vmul.f32 %v4707_v36, %v10231_v48  ;;  %v4702_v48 = vld [vmem:[%s10440_s16 + $0x240] sm:$0xff] }
 0x86b   :  { %v4873_v25 = vpack.c.bf16 %v4823_v5, %v4821_v61  ;;  %5096 = vmatprep.subr.bf16.mxu0 %v7183_v28  ;;  %v4867_v2 = vpack.c.bf16 %v4811_v43, %v4809_v32  ;;  %v4808_v61 = vmul.f32 %v4710_v23, %v10243_v29  ;;  %v4706_v5 = vld [vmem:[%s10440_s16 + $0x260] sm:$0xff]  ;;  %v4803_v29 = vmul.f32 %v4705_v60, %v10224_v57 }
 0x86c   :  { %v10327_v62 = vpop.f32.mrf.mxu1  ;;  %v4865_v47 = vpack.c.bf16 %v4807_v20, %v4805_v63  ;;  %v4804_v12 = vmul.f32 %v4706_v5, %v10226_v55  ;;  %v4726_v55 = vld [vmem:[%s10440_s16 + $0x300] sm:$0xff] }
 0x86d   :  { %4928 = vmatprep.subr.bf16.mxu1 %v4873_v25  ;;  %v4866_v8 = vpack.c.bf16 %v4810_v44, %v4808_v61  ;;  %v4801_v25 = vmul.f32 %v4703_v15, %v10219_v58  ;;  %v4824_v58 = vmul.f32 %v4726_v55, %v10315_v24 }
 0x86e   :  { %v4627_v6 = vpop.f32.mrf.mxu1  ;;  %4929 = vmatpush1.bf16.msra.mxu1 %v4872_v19  ;;  %5097 = vmatpush2.bf16.msra.mxu0 %v6955_v49  ;;  %v4704_v49 = vld [vmem:[%s10440_s16 + $0x250] sm:$0xff]  ;;  %v4864_v35 = vpack.c.bf16 %v4806_v11, %v4804_v12  ;;  %v4800_v19 = vmul.f32 %v4702_v48, %v10210_v39  ;;  %v4825_v39 = vmul.f32 %v4727_v21, %v10327_v62 }
 0x86f   :  { %4930 = vmatprep.subr.bf16.mxu1 %v4871_v45  ;;  %5098 = vmatprep.subr.bf16.mxu0 %v7183_v28  ;;  %v4802_v9 = vmul.f32 %v4704_v49, %v10222_v59  ;;  %v4863_v33 = vpack.c.bf16 %v4803_v29, %v4801_v25  ;;  %v4874_v59 = vpack.c.bf16 %v4824_v58, %v4824_v58 }
 0x870   :  { %v4628_v26 = vpop.f32.mrf.mxu1  ;;  %v4875_v40 = vpack.c.bf16 %v4825_v39, %v4825_v39 }
 0x871   :  { %v4862_v57 = vpack.c.bf16 %v4802_v9, %v4800_v19  ;;  %v4882_v30 = vsel %vm4880_vm4, %v4874_v59, 0 }
 0x872   :  { %4931 = vmatpush1.bf16.msra.mxu1 %v4870_v22  ;;  %5099 = vmatpush2.bf16.msra.mxu0 %v6956_v1 }
 0x873   :  { %4932 = vmatprep.subr.bf16.mxu1 %v4869_v3  ;;  %5100 = vmatprep.subr.bf16.mxu0 %v7183_v28 }
 0x876   :  { %4933 = vmatpush1.bf16.msra.mxu1 %v4868_v51  ;;  %5101 = vmatpush2.bf16.msra.mxu0 %v6957_v7 }
 0x877   :  { %4934 = vmatprep.subr.bf16.mxu1 %v4867_v2  ;;  %5102 = vmatprep.subr.bf16.mxu0 %v7183_v28  ;;  %v4995_v28 = vld [vmem:[%s10442_s18] sm:$0x1] }
 0x87a   :  { %4935 = vmatpush1.bf16.msra.mxu1 %v4866_v8  ;;  %5103 = vmatpush2.bf16.msra.mxu0 %v6958_v38 }
 0x87b   :  { %4936 = vmatprep.subr.bf16.mxu1 %v4865_v47 }
 0x87e   :  { %4937 = vmatpush1.bf16.msra.mxu1 %v4864_v35 }
 0x87f   :  { %4938 = vmatprep.subr.bf16.mxu1 %v4863_v33 }
 0x882   :  { %4939 = vmatpush1.bf16.msra.mxu1 %v4862_v57 }
 0x883   :  { %4940 = vmatprep.subr.bf16.mxu1 %v4861_v41 }
 0x886   :  { %4941 = vmatpush1.bf16.msra.mxu1 %v4860_v37 }
 0x887   :  { %4942 = vmatprep.subr.bf16.mxu1 %v4859_v52 }
 0x88a   :  { %4943 = vmatpush1.bf16.msra.mxu1 %v4858_v54 }
 0x88b   :  { %5416 = vmatprep.subr.msk.bf16.mxu1 %vm4880_vm4, %v4875_v40 }
 0x88e   :  { %4959 = vmatpush2.bf16.msra.mxu1 %v4882_v30 }
 0x891   :  { %4961 = vmatmul.mubr.bf16.vlgmr.msra.gmra.mxu1 %v7184_v34 }
 0x90d   :  { %v4921_v18 = vpop.f32.mrf.mxu0 }
 0x90f   :  { %v4923_v31 = vpop.f32.mrf.mxu0 }
 0x911   :  { %v4925_v50 = vpop.f32.mrf.mxu0 }
 0x913   :  { %v4926_v54 = vpop.f32.mrf.mxu0 }
 0x951   :  { %v4962_v52 = vpop.f32.mrf.mxu1 }
 0x952   :  { %v4963_v56 = vadd.f32 %v4962_v52, %v4921_v18 }
 0x953   :  { %v4964_v37 = vpop.f32.mrf.mxu1 }
 0x954   :  { %v4965_v34 = vadd.f32 %v4964_v37, %v4923_v31  ;;  %v4969_v24 = vpack.c.bf16 %v4963_v56, %v4963_v56 }
 0x955   :  { %v4966_v46 = vpop.f32.mrf.mxu1 }
 0x956   :  { %v4970_v41 = vpack.c.bf16 %v4965_v34, %v4965_v34 }
 0x957   :  { %v4967_v62 = vpop.f32.mrf.mxu1 }
 0x958   :  { %5430 = vmatprep.mubr.msk.bf16.mxu0 %vm5068_vm5, %v4970_v41 }
 0x959   :  { %5105 = vmatmul.mubr.bf16.vlgmr.msra.gmra.mxu0 %v4969_v24 }
 0xa19   :  { %v5106_v45 = vpop.f32.mrf.mxu0 }
 0xa1a   :  { %v5107_v17 = vadd.f32 %v5106_v45, %v4995_v28 }
 0xa1b   :  { %v5108_v53 = vpop.f32.mrf.mxu0 }
 0xa1c   :  { %5113 = vst.msk [vmem:[#allocation2] sm:$0x1] %vm5112_vm6, %v5107_v17 }
 0xa1d   :  { %v5109_v6 = vpop.f32.mrf.mxu0 }
 0xa1e   :  { %7170 = shalt.err (!%p7167_p4)
}
 0xa1f   :  { %5123 = dma.vmem_to_hbm [thread:$0]  %s5121_s24, 16, %s10443_s19, [#allocation3]   ;;  %v5110_v1 = vpop.f32.mrf.mxu0 }
 0xa20   :  { %7179 = dma.done.wait [#allocation3], 16  }
 0xa21   :  { %7180 = vsyncadd [#allocation3], 4294967280 }
 0xa22   :  { %5127 = vsyncpa [#allocation3], 1 }

</bundles_post_ra>
